<compile_context>
chip_gen: v5e
topology: v5e:2x2
jax: 0.10.0
libtpu: 0.0.40
codegen_flags: <defaults>
</compile_context>

<pallas_src>
import functools

import numpy as np
import jax
import jax.numpy as jnp
from jax import lax
from jax.experimental import pallas as pl
from jax.experimental.pallas import tpu as pltpu


SCALE_SURFACE_LOSS = 0.1      # config.scale_surface_loss
NUM_LOOPS = 15                # as in the torch forward
OUT_LANES = 128               # lane-dense scalar output row
TM_DEFAULT = 512              # lane tile over predicted points (multiple of 128)


# ----------------------------------------------------------------------------
# Stand-in surface sampler (glue, pure JAX)
# ----------------------------------------------------------------------------
def sample_scaling_superellipse_points(primitive_parameters, num_loops=NUM_LOOPS):
    # TODO(synk): utils.sample_scaling_superellipse_points is not provided; this is
    # a deterministic stand-in superellipsoid sampler so the forward runs
    # end-to-end.  Returns per-primitive surface points (B, N, num_loops**2, 3).
    scales = jax.nn.softplus(primitive_parameters[..., 0:3]) + 0.1          # (B, N, 3)
    eps = 0.2 + 1.6 * jax.nn.sigmoid(primitive_parameters[..., 3:5])        # (B, N, 2)
    trans = primitive_parameters[..., 5:8]                                  # (B, N, 3)

    eta = jnp.linspace(-jnp.pi / 2 + 1e-3, jnp.pi / 2 - 1e-3, num_loops)
    omega = jnp.linspace(-jnp.pi + 1e-3, jnp.pi - 1e-3, num_loops)
    eta, omega = jnp.meshgrid(eta, omega, indexing="ij")
    eta = eta.reshape(-1)                                                   # (P,)
    omega = omega.reshape(-1)                                               # (P,)

    def spow(t, e):
        return jnp.sign(t) * jnp.abs(t) ** e

    e1 = eps[..., 0:1]
    e2 = eps[..., 1:2]
    ce = spow(jnp.cos(eta), e1)                                             # (B, N, P)
    se = spow(jnp.sin(eta), e1)
    co = spow(jnp.cos(omega), e2)
    so = spow(jnp.sin(omega), e2)

    x = scales[..., 0:1] * ce * co
    y = scales[..., 1:2] * ce * so
    z = scales[..., 2:3] * se
    pts = jnp.stack([x, y, z], axis=-1) + trans[:, :, None, :]              # (B, N, P, 3)
    return pts.astype(jnp.float32)


# ----------------------------------------------------------------------------
# Pallas kernel: one batch element per outer grid step, M tiled on the inner axis
# ----------------------------------------------------------------------------
def _surface_chamfer_kernel(prim_mask_ref,      # (B, N) int32 in SMEM (scalar prefetch)
                            aT_ref,             # (1, 3, TM)  predicted points^T, lane-dense
                            pc_ref,             # (1, S, 3)   surface point cloud
                            out_ref,            # (1, 1, OUT_LANES)
                            min_b_ref,          # (S, TM) f32 running min of d2 over M tiles
                            acc_a_ref,          # (1, TM) f32 running masked sum of sqrt(min_a)
                            *, scale, num_prims, pts_per_prim, tm):
    b = pl.program_id(0)
    t = pl.program_id(1)
    nt = pl.num_programs(1)

    @pl.when(t == 0)
    def _init():
        min_b_ref[...] = jnp.full(min_b_ref.shape, jnp.inf, jnp.float32)
        acc_a_ref[...] = jnp.zeros(acc_a_ref.shape, jnp.float32)

    aT = aT_ref[0]                                                  # (3, TM)
    pc = pc_ref[0]                                                  # (S, 3)

    # Per-point (lane) mask rebuilt from the scalar-prefetched per-primitive
    # flags: column j of this tile is global point t*TM + j, belonging to
    # primitive (t*TM + j) // P.  Padded columns (past N*P) get mask 0.
    col = t * tm + lax.broadcasted_iota(jnp.int32, (1, tm), 1)      # (1, TM)
    m = jnp.zeros((1, tm), jnp.float32)
    for n in range(num_prims):                                      # static, small N
        flag = (prim_mask_ref[b, n] > 0).astype(jnp.float32)
        lo, hi = n * pts_per_prim, (n + 1) * pts_per_prim
        m = jnp.where((col >= lo) & (col < hi), flag, m)

    # Squared distances via |b|^2 + |a|^2 - 2 b.a -> one MXU matmul, slab (S, TM).
    # Mask + padding folded once into |a|^2 (+BIG) so no separate masked slab.
    BIG = jnp.float32(1e30)
    a2 = jnp.sum(aT * aT, axis=0, keepdims=True)                    # (1, TM)
    a2 = a2 + (1.0 - m) * BIG
    pc2 = jnp.sum(pc * pc, axis=1, keepdims=True)                   # (S, 1)
    cross = jnp.dot(pc, aT, preferred_element_type=jnp.float32)     # (S, TM)  MXU
    d2 = jnp.maximum(pc2 + a2 - 2.0 * cross, 0.0)                   # (S, TM), clamp >= 0

    # b -> a: element-wise running min across M tiles; lane reduce deferred to end.
    min_b_ref[...] = jnp.minimum(min_b_ref[...], d2)

    # a -> b: min over S is a sublane fold (cheap); sqrt only after the reduce;
    # masked columns give sqrt(BIG) * 0 = 0.
    min_a = jnp.min(d2, axis=0, keepdims=True)                      # (1, TM)
    acc_a_ref[...] += jnp.sqrt(min_a) * m

    @pl.when(t == nt - 1)
    def _finalize():
        cnt = jnp.int32(0)
        for n in range(num_prims):
            cnt += (prim_mask_ref[b, n] > 0).astype(jnp.int32)
        cnt_f = cnt.astype(jnp.float32) * jnp.float32(pts_per_prim)

        chamfer_a = jnp.sum(acc_a_ref[...]) / jnp.maximum(cnt_f, 1.0)

        min_b = jnp.min(min_b_ref[...], axis=1, keepdims=True)      # (S, 1), XLU once
        s = min_b.shape[0]
        chamfer_b = jnp.sum(jnp.sqrt(min_b)) * jnp.float32(1.0 / s)

        loss = (chamfer_a + chamfer_b) * jnp.float32(scale)
        # NOTE: torch yields NaN for an all-false mask (mean over empty set);
        # here the loss is gated to 0 instead.
        loss = jnp.where(cnt_f > 0.0, loss, jnp.float32(0.0))
        out_ref[...] = jnp.broadcast_to(loss, out_ref.shape)


# ----------------------------------------------------------------------------
# Wrapper (glue: sampling, masking, layout plumbing, pallas_call)
# ----------------------------------------------------------------------------
def surface_loss(primitive_parameters, surface_pointcloud, connection_weight,
                 *, scale=SCALE_SURFACE_LOSS, num_loops=NUM_LOOPS, tm=TM_DEFAULT):
    """SurfaceLoss.forward.

    primitive_parameters: (B, N, P_params) f32
    surface_pointcloud:   (B, S, 3) f32
    connection_weight:    (B, N) f32 (per-batch per-primitive weights; matches
                          torch's squeeze(0) when B=1)
    returns: (B,) f32  chamfer * scale
    """
    pred = sample_scaling_superellipse_points(primitive_parameters, num_loops)  # (B,N,P,3)
    B, N, P, _ = pred.shape
    S = surface_pointcloud.shape[1]
    M = N * P
    num_tiles = (M + tm - 1) // tm
    m_pad = num_tiles * tm

    # Lane-dense predicted points: (B, 3, M_pad), zero-padded past M.
    aT = jnp.transpose(pred.reshape(B, M, 3).astype(jnp.float32), (0, 2, 1))
    aT = jnp.pad(aT, ((0, 0), (0, 0), (0, m_pad - M)))

    pc = surface_pointcloud.astype(jnp.float32)                     # (B, S, 3)
    prim_mask = (connection_weight > 0.5).astype(jnp.int32)         # (B, N) -> SMEM

    kernel = functools.partial(
        _surface_chamfer_kernel, scale=float(scale),
        num_prims=N, pts_per_prim=P, tm=tm)

    out = pl.pallas_call(
        kernel,
        out_shape=jax.ShapeDtypeStruct((B, 1, OUT_LANES), jnp.float32),
        grid_spec=pltpu.PrefetchScalarGridSpec(
            num_scalar_prefetch=1,
            grid=(B, num_tiles),
            in_specs=[
                pl.BlockSpec((1, 3, tm), lambda b, t, pm: (b, 0, t)),   # points^T tile
                pl.BlockSpec((1, S, 3), lambda b, t, pm: (b, 0, 0)),    # point cloud
            ],
            out_specs=pl.BlockSpec((1, 1, OUT_LANES), lambda b, t, pm: (b, 0, 0)),
            scratch_shapes=[
                pltpu.VMEM((S, tm), jnp.float32),   # running b->a min
                pltpu.VMEM((1, tm), jnp.float32),   # running masked a->b sum
            ],
        ),
        compiler_params=pltpu.CompilerParams(
            dimension_semantics=("parallel", "arbitrary")),
    )(prim_mask, aT, pc)

    return out[:, 0, 0]                                              # (B,)


# ----------------------------------------------------------------------------
# Self-test against a numpy reference mirroring the torch forward
# (true boolean indexing of selected primitives, direct-difference distances).
# ----------------------------------------------------------------------------
if __name__ == "__main__":
    key = jax.random.PRNGKey(0)
    k1, k2, k3 = jax.random.split(key, 3)

    B, N, S = 2, 8, 256
    P_PARAMS = 8

    primitive_parameters = jax.random.normal(k1, (B, N, P_PARAMS), jnp.float32)
    surface_pointcloud = jax.random.normal(k2, (B, S, 3), jnp.float32)
    connection_weight = jax.random.uniform(k3, (B, N), jnp.float32)
    # guarantee at least one selected primitive per batch element
    connection_weight = connection_weight.at[:, 0].set(0.9)

    loss = surface_loss(primitive_parameters, surface_pointcloud, connection_weight)
    loss = jax.block_until_ready(loss)

    # Reference (torch semantics): boolean-index selected primitives, then
    # chamfer_distance_3d on the flattened selection, times scale.
    pred = sample_scaling_superellipse_points(primitive_parameters, NUM_LOOPS)
    pred_np = np.asarray(pred, dtype=np.float64)              # (B, N, P, 3)
    pc_np = np.asarray(surface_pointcloud, dtype=np.float64)  # (B, S, 3)
    mask_np = np.asarray(connection_weight) > 0.5             # (B, N)

    ref = []
    for b in range(B):
        a_sel = pred_np[b][mask_np[b]].reshape(-1, 3)         # (M_sel, 3)
        diff = a_sel[:, None, :] - pc_np[b][None, :, :]       # (M_sel, S, 3)
        d = np.sqrt((diff ** 2).sum(-1))                      # (M_sel, S)
        ch = d.min(axis=1).mean() + d.min(axis=0).mean()
        ref.append(ch * SCALE_SURFACE_LOSS)
    ref = np.asarray(ref, dtype=np.float64)

    np.testing.assert_allclose(np.asarray(loss), ref, rtol=1e-3, atol=1e-4)
    print("KERNEL_OK")
</pallas_src>

<mosaic_0001>
module attributes {stable_mosaic.version = 11 : i64} {
  func.func @_surface_chamfer_kernel(%arg0: i32, %arg1: i32, %arg2: memref<2x8xi32, #tpu.memory_space<smem>>, %arg3: memref<1x3x512xf32, #tpu.memory_space<vmem>>, %arg4: memref<1x256x3xf32, #tpu.memory_space<vmem>>, %arg5: memref<1x1x128xf32, #tpu.memory_space<vmem>>, %arg6: memref<256x512xf32, #tpu.memory_space<vmem>>, %arg7: memref<1x512xf32, #tpu.memory_space<vmem>>) attributes {dimension_semantics = [#tpu.dimension_semantics<parallel>, #tpu.dimension_semantics<arbitrary>], iteration_bounds = array<i64: 2, 4>, scalar_prefetch = 1 : i64, scratch_operands = 2 : i64, tpu.core_type = #tpu.core_type<tc>, window_params = [{transform_indices = @transform_0, window_bounds = array<i64: 1, 3, 512>}, {transform_indices = @transform_1, window_bounds = array<i64: 1, 256, 3>}, {transform_indices = @transform_2, window_bounds = array<i64: 1, 1, 128>}]} {
    %c0_i32 = arith.constant 0 : i32
    %0 = arith.cmpi eq, %arg1, %c0_i32 : i32
    %1 = arith.extui %0 : i1 to i32
    %c0_i32_0 = arith.constant 0 : i32
    %2 = arith.cmpi ne, %1, %c0_i32_0 : i32
    scf.if %2 {
      %cst_40 = arith.constant 0x7F800000 : f32
      %141 = vector.broadcast %cst_40 : f32 to vector<256x512xf32>
      %c0_41 = arith.constant 0 : index
      %c0_42 = arith.constant 0 : index
      %142 = vector.load %arg6[%c0_41, %c0_42] : memref<256x512xf32, #tpu.memory_space<vmem>>, vector<256x512xf32>
      tpu.vector_store %arg6[%c0_41, %c0_42], %141 {strides = array<i32>} : memref<256x512xf32, #tpu.memory_space<vmem>>, vector<256x512xf32>,
      %cst_43 = arith.constant 0.000000e+00 : f32
      %143 = vector.broadcast %cst_43 : f32 to vector<1x512xf32>
      %c0_44 = arith.constant 0 : index
      %c0_45 = arith.constant 0 : index
      %144 = vector.load %arg7[%c0_44, %c0_45] : memref<1x512xf32, #tpu.memory_space<vmem>>, vector<1x512xf32>
      tpu.vector_store %arg7[%c0_44, %c0_45], %143 {strides = array<i32>} : memref<1x512xf32, #tpu.memory_space<vmem>>, vector<1x512xf32>,
    } else {
    }
    %c0 = arith.constant 0 : index
    %c0_1 = arith.constant 0 : index
    %c0_2 = arith.constant 0 : index
    %3 = vector.load %arg3[%c0, %c0_1, %c0_2] : memref<1x3x512xf32, #tpu.memory_space<vmem>>, vector<1x3x512xf32>
    %4 = vector.shape_cast %3 : vector<1x3x512xf32> to vector<3x512xf32>
    %c0_3 = arith.constant 0 : index
    %c0_4 = arith.constant 0 : index
    %c0_5 = arith.constant 0 : index
    %5 = vector.load %arg4[%c0_3, %c0_4, %c0_5] : memref<1x256x3xf32, #tpu.memory_space<vmem>>, vector<1x256x3xf32>
    %6 = vector.shape_cast %5 : vector<1x256x3xf32> to vector<256x3xf32>
    %c512_i32 = arith.constant 512 : i32
    %7 = arith.muli %arg1, %c512_i32 : i32
    %8 = tpu.iota {dimensions = array<i32: 1>} : vector<1x512xi32>
    %9 = vector.broadcast %7 : i32 to vector<1x512xi32>
    %10 = arith.addi %9, %8 : vector<1x512xi32>
    %cst = arith.constant 0.000000e+00 : f32
    %11 = vector.broadcast %cst : f32 to vector<1x512xf32>
    %12 = arith.index_cast %arg0 : i32 to index
    %c0_6 = arith.constant 0 : index
    %13 = memref.load %arg2[%12, %c0_6] : memref<2x8xi32, #tpu.memory_space<smem>>
    %c0_i32_7 = arith.constant 0 : i32
    %14 = arith.cmpi sgt, %13, %c0_i32_7 : i32
    %15 = arith.extui %14 : i1 to i32
    %16 = arith.sitofp %15 : i32 to f32
    %c0_i32_8 = arith.constant 0 : i32
    %17 = vector.broadcast %c0_i32_8 : i32 to vector<1x512xi32>
    %18 = arith.cmpi sge, %10, %17 : vector<1x512xi32>
    %c225_i32 = arith.constant 225 : i32
    %19 = vector.broadcast %c225_i32 : i32 to vector<1x512xi32>
    %20 = arith.cmpi slt, %10, %19 : vector<1x512xi32>
    %21 = arith.andi %18, %20 : vector<1x512xi1>
    %22 = vector.broadcast %16 : f32 to vector<1x512xf32>
    %23 = arith.select %21, %22, %11 : vector<1x512xi1>, vector<1x512xf32>
    %24 = arith.index_cast %arg0 : i32 to index
    %c1 = arith.constant 1 : index
    %25 = memref.load %arg2[%24, %c1] : memref<2x8xi32, #tpu.memory_space<smem>>
    %c0_i32_9 = arith.constant 0 : i32
    %26 = arith.cmpi sgt, %25, %c0_i32_9 : i32
    %27 = arith.extui %26 : i1 to i32
    %28 = arith.sitofp %27 : i32 to f32
    %c225_i32_10 = arith.constant 225 : i32
    %29 = vector.broadcast %c225_i32_10 : i32 to vector<1x512xi32>
    %30 = arith.cmpi sge, %10, %29 : vector<1x512xi32>
    %c450_i32 = arith.constant 450 : i32
    %31 = vector.broadcast %c450_i32 : i32 to vector<1x512xi32>
    %32 = arith.cmpi slt, %10, %31 : vector<1x512xi32>
    %33 = arith.andi %30, %32 : vector<1x512xi1>
    %34 = vector.broadcast %28 : f32 to vector<1x512xf32>
    %35 = arith.select %33, %34, %23 : vector<1x512xi1>, vector<1x512xf32>
    %36 = arith.index_cast %arg0 : i32 to index
    %c2 = arith.constant 2 : index
    %37 = memref.load %arg2[%36, %c2] : memref<2x8xi32, #tpu.memory_space<smem>>
    %c0_i32_11 = arith.constant 0 : i32
    %38 = arith.cmpi sgt, %37, %c0_i32_11 : i32
    %39 = arith.extui %38 : i1 to i32
    %40 = arith.sitofp %39 : i32 to f32
    %c450_i32_12 = arith.constant 450 : i32
    %41 = vector.broadcast %c450_i32_12 : i32 to vector<1x512xi32>
    %42 = arith.cmpi sge, %10, %41 : vector<1x512xi32>
    %c675_i32 = arith.constant 675 : i32
    %43 = vector.broadcast %c675_i32 : i32 to vector<1x512xi32>
    %44 = arith.cmpi slt, %10, %43 : vector<1x512xi32>
    %45 = arith.andi %42, %44 : vector<1x512xi1>
    %46 = vector.broadcast %40 : f32 to vector<1x512xf32>
    %47 = arith.select %45, %46, %35 : vector<1x512xi1>, vector<1x512xf32>
    %48 = arith.index_cast %arg0 : i32 to index
    %c3 = arith.constant 3 : index
    %49 = memref.load %arg2[%48, %c3] : memref<2x8xi32, #tpu.memory_space<smem>>
    %c0_i32_13 = arith.constant 0 : i32
    %50 = arith.cmpi sgt, %49, %c0_i32_13 : i32
    %51 = arith.extui %50 : i1 to i32
    %52 = arith.sitofp %51 : i32 to f32
    %c675_i32_14 = arith.constant 675 : i32
    %53 = vector.broadcast %c675_i32_14 : i32 to vector<1x512xi32>
    %54 = arith.cmpi sge, %10, %53 : vector<1x512xi32>
    %c900_i32 = arith.constant 900 : i32
    %55 = vector.broadcast %c900_i32 : i32 to vector<1x512xi32>
    %56 = arith.cmpi slt, %10, %55 : vector<1x512xi32>
    %57 = arith.andi %54, %56 : vector<1x512xi1>
    %58 = vector.broadcast %52 : f32 to vector<1x512xf32>
    %59 = arith.select %57, %58, %47 : vector<1x512xi1>, vector<1x512xf32>
    %60 = arith.index_cast %arg0 : i32 to index
    %c4 = arith.constant 4 : index
    %61 = memref.load %arg2[%60, %c4] : memref<2x8xi32, #tpu.memory_space<smem>>
    %c0_i32_15 = arith.constant 0 : i32
    %62 = arith.cmpi sgt, %61, %c0_i32_15 : i32
    %63 = arith.extui %62 : i1 to i32
    %64 = arith.sitofp %63 : i32 to f32
    %c900_i32_16 = arith.constant 900 : i32
    %65 = vector.broadcast %c900_i32_16 : i32 to vector<1x512xi32>
    %66 = arith.cmpi sge, %10, %65 : vector<1x512xi32>
    %c1125_i32 = arith.constant 1125 : i32
    %67 = vector.broadcast %c1125_i32 : i32 to vector<1x512xi32>
    %68 = arith.cmpi slt, %10, %67 : vector<1x512xi32>
    %69 = arith.andi %66, %68 : vector<1x512xi1>
    %70 = vector.broadcast %64 : f32 to vector<1x512xf32>
    %71 = arith.select %69, %70, %59 : vector<1x512xi1>, vector<1x512xf32>
    %72 = arith.index_cast %arg0 : i32 to index
    %c5 = arith.constant 5 : index
    %73 = memref.load %arg2[%72, %c5] : memref<2x8xi32, #tpu.memory_space<smem>>
    %c0_i32_17 = arith.constant 0 : i32
    %74 = arith.cmpi sgt, %73, %c0_i32_17 : i32
    %75 = arith.extui %74 : i1 to i32
    %76 = arith.sitofp %75 : i32 to f32
    %c1125_i32_18 = arith.constant 1125 : i32
    %77 = vector.broadcast %c1125_i32_18 : i32 to vector<1x512xi32>
    %78 = arith.cmpi sge, %10, %77 : vector<1x512xi32>
    %c1350_i32 = arith.constant 1350 : i32
    %79 = vector.broadcast %c1350_i32 : i32 to vector<1x512xi32>
    %80 = arith.cmpi slt, %10, %79 : vector<1x512xi32>
    %81 = arith.andi %78, %80 : vector<1x512xi1>
    %82 = vector.broadcast %76 : f32 to vector<1x512xf32>
    %83 = arith.select %81, %82, %71 : vector<1x512xi1>, vector<1x512xf32>
    %84 = arith.index_cast %arg0 : i32 to index
    %c6 = arith.constant 6 : index
    %85 = memref.load %arg2[%84, %c6] : memref<2x8xi32, #tpu.memory_space<smem>>
    %c0_i32_19 = arith.constant 0 : i32
    %86 = arith.cmpi sgt, %85, %c0_i32_19 : i32
    %87 = arith.extui %86 : i1 to i32
    %88 = arith.sitofp %87 : i32 to f32
    %c1350_i32_20 = arith.constant 1350 : i32
    %89 = vector.broadcast %c1350_i32_20 : i32 to vector<1x512xi32>
    %90 = arith.cmpi sge, %10, %89 : vector<1x512xi32>
    %c1575_i32 = arith.constant 1575 : i32
    %91 = vector.broadcast %c1575_i32 : i32 to vector<1x512xi32>
    %92 = arith.cmpi slt, %10, %91 : vector<1x512xi32>
    %93 = arith.andi %90, %92 : vector<1x512xi1>
    %94 = vector.broadcast %88 : f32 to vector<1x512xf32>
    %95 = arith.select %93, %94, %83 : vector<1x512xi1>, vector<1x512xf32>
    %96 = arith.index_cast %arg0 : i32 to index
    %c7 = arith.constant 7 : index
    %97 = memref.load %arg2[%96, %c7] : memref<2x8xi32, #tpu.memory_space<smem>>
    %c0_i32_21 = arith.constant 0 : i32
    %98 = arith.cmpi sgt, %97, %c0_i32_21 : i32
    %99 = arith.extui %98 : i1 to i32
    %100 = arith.sitofp %99 : i32 to f32
    %c1575_i32_22 = arith.constant 1575 : i32
    %101 = vector.broadcast %c1575_i32_22 : i32 to vector<1x512xi32>
    %102 = arith.cmpi sge, %10, %101 : vector<1x512xi32>
    %c1800_i32 = arith.constant 1800 : i32
    %103 = vector.broadcast %c1800_i32 : i32 to vector<1x512xi32>
    %104 = arith.cmpi slt, %10, %103 : vector<1x512xi32>
    %105 = arith.andi %102, %104 : vector<1x512xi1>
    %106 = vector.broadcast %100 : f32 to vector<1x512xf32>
    %107 = arith.select %105, %106, %95 : vector<1x512xi1>, vector<1x512xf32>
    %108 = arith.mulf %4, %4 : vector<3x512xf32>
    %cst_23 = arith.constant dense<0.000000e+00> : vector<512xf32>
    %109 = vector.multi_reduction <add>, %108, %cst_23 [0] : vector<3x512xf32> to vector<512xf32>
    %110 = vector.shape_cast %109 : vector<512xf32> to vector<1x512xf32>
    %cst_24 = arith.constant 1.000000e+00 : f32
    %111 = vector.broadcast %cst_24 : f32 to vector<1x512xf32>
    %112 = arith.subf %111, %107 : vector<1x512xf32>
    %cst_25 = arith.constant 1.000000e+30 : f32
    %113 = vector.broadcast %cst_25 : f32 to vector<1x512xf32>
    %114 = arith.mulf %112, %113 : vector<1x512xf32>
    %115 = arith.addf %110, %114 : vector<1x512xf32>
    %116 = arith.mulf %6, %6 : vector<256x3xf32>
    %cst_26 = arith.constant dense<0.000000e+00> : vector<256xf32>
    %117 = vector.multi_reduction <add>, %116, %cst_26 [1] : vector<256x3xf32> to vector<256xf32>
    %118 = vector.shape_cast %117 : vector<256xf32> to vector<256x1xf32>
    %cst_27 = arith.constant dense<0.000000e+00> : vector<256x512xf32>
    %119 = tpu.matmul %6, %4, %cst_27 {dimension_numbers = #tpu.dot_dimension_numbers<[1], [0], [0], [1], [0, 0, 1, 1], [], []>} : vector<256x3xf32>, vector<3x512xf32>, vector<256x512xf32> -> vector<256x512xf32>
    %120 = vector.broadcast %118 : vector<256x1xf32> to vector<256x512xf32>
    %121 = vector.broadcast %115 : vector<1x512xf32> to vector<256x512xf32>
    %122 = arith.addf %120, %121 : vector<256x512xf32>
    %cst_28 = arith.constant 2.000000e+00 : f32
    %123 = vector.broadcast %cst_28 : f32 to vector<256x512xf32>
    %124 = arith.mulf %123, %119 : vector<256x512xf32>
    %125 = arith.subf %122, %124 : vector<256x512xf32>
    %cst_29 = arith.constant 0.000000e+00 : f32
    %126 = vector.broadcast %cst_29 : f32 to vector<256x512xf32>
    %127 = arith.maximumf %125, %126 : vector<256x512xf32>
    %c0_30 = arith.constant 0 : index
    %c0_31 = arith.constant 0 : index
    %128 = vector.load %arg6[%c0_30, %c0_31] : memref<256x512xf32, #tpu.memory_space<vmem>>, vector<256x512xf32>
    %129 = arith.minimumf %128, %127 : vector<256x512xf32>
    %c0_32 = arith.constant 0 : index
    %c0_33 = arith.constant 0 : index
    %130 = vector.load %arg6[%c0_32, %c0_33] : memref<256x512xf32, #tpu.memory_space<vmem>>, vector<256x512xf32>
    tpu.vector_store %arg6[%c0_32, %c0_33], %129 {strides = array<i32>} : memref<256x512xf32, #tpu.memory_space<vmem>>, vector<256x512xf32>,
    %cst_34 = arith.constant dense<0x7F800000> : vector<512xf32>
    %131 = vector.multi_reduction <minimumf>, %127, %cst_34 [0] : vector<256x512xf32> to vector<512xf32>
    %132 = vector.shape_cast %131 : vector<512xf32> to vector<1x512xf32>
    %c0_35 = arith.constant 0 : index
    %c0_36 = arith.constant 0 : index
    %133 = vector.load %arg7[%c0_35, %c0_36] : memref<1x512xf32, #tpu.memory_space<vmem>>, vector<1x512xf32>
    %134 = math.sqrt %132 : vector<1x512xf32>
    %135 = arith.mulf %134, %107 : vector<1x512xf32>
    %136 = arith.addf %133, %135 : vector<1x512xf32>
    %c0_37 = arith.constant 0 : index
    %c0_38 = arith.constant 0 : index
    %137 = vector.load %arg7[%c0_37, %c0_38] : memref<1x512xf32, #tpu.memory_space<vmem>>, vector<1x512xf32>
    tpu.vector_store %arg7[%c0_37, %c0_38], %136 {strides = array<i32>} : memref<1x512xf32, #tpu.memory_space<vmem>>, vector<1x512xf32>,
    %c3_i32 = arith.constant 3 : i32
    %138 = arith.cmpi eq, %arg1, %c3_i32 : i32
    %139 = arith.extui %138 : i1 to i32
    %c0_i32_39 = arith.constant 0 : i32
    %140 = arith.cmpi ne, %139, %c0_i32_39 : i32
    scf.if %140 {
      %141 = arith.index_cast %arg0 : i32 to index
      %c0_40 = arith.constant 0 : index
      %142 = memref.load %arg2[%141, %c0_40] : memref<2x8xi32, #tpu.memory_space<smem>>
      %c0_i32_41 = arith.constant 0 : i32
      %143 = arith.cmpi sgt, %142, %c0_i32_41 : i32
      %144 = arith.extui %143 : i1 to i32
      %c0_i32_42 = arith.constant 0 : i32
      %145 = arith.addi %c0_i32_42, %144 : i32
      %146 = arith.index_cast %arg0 : i32 to index
      %c1_43 = arith.constant 1 : index
      %147 = memref.load %arg2[%146, %c1_43] : memref<2x8xi32, #tpu.memory_space<smem>>
      %c0_i32_44 = arith.constant 0 : i32
      %148 = arith.cmpi sgt, %147, %c0_i32_44 : i32
      %149 = arith.extui %148 : i1 to i32
      %150 = arith.addi %145, %149 : i32
      %151 = arith.index_cast %arg0 : i32 to index
      %c2_45 = arith.constant 2 : index
      %152 = memref.load %arg2[%151, %c2_45] : memref<2x8xi32, #tpu.memory_space<smem>>
      %c0_i32_46 = arith.constant 0 : i32
      %153 = arith.cmpi sgt, %152, %c0_i32_46 : i32
      %154 = arith.extui %153 : i1 to i32
      %155 = arith.addi %150, %154 : i32
      %156 = arith.index_cast %arg0 : i32 to index
      %c3_47 = arith.constant 3 : index
      %157 = memref.load %arg2[%156, %c3_47] : memref<2x8xi32, #tpu.memory_space<smem>>
      %c0_i32_48 = arith.constant 0 : i32
      %158 = arith.cmpi sgt, %157, %c0_i32_48 : i32
      %159 = arith.extui %158 : i1 to i32
      %160 = arith.addi %155, %159 : i32
      %161 = arith.index_cast %arg0 : i32 to index
      %c4_49 = arith.constant 4 : index
      %162 = memref.load %arg2[%161, %c4_49] : memref<2x8xi32, #tpu.memory_space<smem>>
      %c0_i32_50 = arith.constant 0 : i32
      %163 = arith.cmpi sgt, %162, %c0_i32_50 : i32
      %164 = arith.extui %163 : i1 to i32
      %165 = arith.addi %160, %164 : i32
      %166 = arith.index_cast %arg0 : i32 to index
      %c5_51 = arith.constant 5 : index
      %167 = memref.load %arg2[%166, %c5_51] : memref<2x8xi32, #tpu.memory_space<smem>>
      %c0_i32_52 = arith.constant 0 : i32
      %168 = arith.cmpi sgt, %167, %c0_i32_52 : i32
      %169 = arith.extui %168 : i1 to i32
      %170 = arith.addi %165, %169 : i32
      %171 = arith.index_cast %arg0 : i32 to index
      %c6_53 = arith.constant 6 : index
      %172 = memref.load %arg2[%171, %c6_53] : memref<2x8xi32, #tpu.memory_space<smem>>
      %c0_i32_54 = arith.constant 0 : i32
      %173 = arith.cmpi sgt, %172, %c0_i32_54 : i32
      %174 = arith.extui %173 : i1 to i32
      %175 = arith.addi %170, %174 : i32
      %176 = arith.index_cast %arg0 : i32 to index
      %c7_55 = arith.constant 7 : index
      %177 = memref.load %arg2[%176, %c7_55] : memref<2x8xi32, #tpu.memory_space<smem>>
      %c0_i32_56 = arith.constant 0 : i32
      %178 = arith.cmpi sgt, %177, %c0_i32_56 : i32
      %179 = arith.extui %178 : i1 to i32
      %180 = arith.addi %175, %179 : i32
      %181 = arith.sitofp %180 : i32 to f32
      %cst_57 = arith.constant 2.250000e+02 : f32
      %182 = arith.mulf %181, %cst_57 : f32
      %c0_58 = arith.constant 0 : index
      %c0_59 = arith.constant 0 : index
      %183 = vector.load %arg7[%c0_58, %c0_59] : memref<1x512xf32, #tpu.memory_space<vmem>>, vector<1x512xf32>
      %184 = vector.shape_cast %183 : vector<1x512xf32> to vector<1x1x512xf32>
      %cst_60 = arith.constant dense<0.000000e+00> : vector<1xf32>
      %185 = vector.multi_reduction <add>, %184, %cst_60 [1, 2] : vector<1x1x512xf32> to vector<1xf32>
      %186 = vector.shape_cast %185 : vector<1xf32> to vector<1x1x1xf32>
      %187 = vector.extract %186[0, 0, 0] : f32 from vector<1x1x1xf32>
      %cst_61 = arith.constant 1.000000e+00 : f32
      %188 = arith.maximumf %182, %cst_61 : f32
      %189 = arith.divf %187, %188 : f32
      %c0_62 = arith.constant 0 : index
      %c0_63 = arith.constant 0 : index
      %190 = vector.load %arg6[%c0_62, %c0_63] : memref<256x512xf32, #tpu.memory_space<vmem>>, vector<256x512xf32>
      %cst_64 = arith.constant dense<0x7F800000> : vector<256xf32>
      %191 = vector.multi_reduction <minimumf>, %190, %cst_64 [1] : vector<256x512xf32> to vector<256xf32>
      %192 = vector.shape_cast %191 : vector<256xf32> to vector<256x1xf32>
      %193 = math.sqrt %192 : vector<256x1xf32>
      %194 = vector.shape_cast %193 : vector<256x1xf32> to vector<1x256x1xf32>
      %cst_65 = arith.constant dense<0.000000e+00> : vector<1xf32>
      %195 = vector.multi_reduction <add>, %194, %cst_65 [1, 2] : vector<1x256x1xf32> to vector<1xf32>
      %196 = vector.shape_cast %195 : vector<1xf32> to vector<1x1x1xf32>
      %197 = vector.extract %196[0, 0, 0] : f32 from vector<1x1x1xf32>
      %cst_66 = arith.constant 3.906250e-03 : f32
      %198 = arith.mulf %197, %cst_66 : f32
      %199 = arith.addf %189, %198 : f32
      %cst_67 = arith.constant 1.000000e-01 : f32
      %200 = arith.mulf %199, %cst_67 : f32
      %cst_68 = arith.constant 0.000000e+00 : f32
      %201 = arith.cmpf ogt, %182, %cst_68 : f32
      %cst_69 = arith.constant 0.000000e+00 : f32
      %202 = arith.select %201, %200, %cst_69 : f32
      %203 = vector.broadcast %202 : f32 to vector<1x1x128xf32>
      %c0_70 = arith.constant 0 : index
      %c0_71 = arith.constant 0 : index
      %c0_72 = arith.constant 0 : index
      %204 = vector.load %arg5[%c0_70, %c0_71, %c0_72] : memref<1x1x128xf32, #tpu.memory_space<vmem>>, vector<1x1x128xf32>
      tpu.vector_store %arg5[%c0_70, %c0_71, %c0_72], %203 {strides = array<i32>} : memref<1x1x128xf32, #tpu.memory_space<vmem>>, vector<1x1x128xf32>,
    } else {
    }
    return
  }
  func.func @transform_0(%arg0: i32, %arg1: i32, %arg2: memref<2x8xi32, #tpu.memory_space<smem>>) -> (i32, i32, i32) {
    %c0_i32 = arith.constant 0 : i32
    %c0_i32_0 = arith.constant 0 : i32
    return %arg0, %c0_i32, %arg1 : i32, i32, i32
  }
  func.func @transform_1(%arg0: i32, %arg1: i32, %arg2: memref<2x8xi32, #tpu.memory_space<smem>>) -> (i32, i32, i32) {
    %c0_i32 = arith.constant 0 : i32
    %c0_i32_0 = arith.constant 0 : i32
    %c0_i32_1 = arith.constant 0 : i32
    return %arg0, %c0_i32, %c0_i32_0 : i32, i32, i32
  }
  func.func @transform_2(%arg0: i32, %arg1: i32, %arg2: memref<2x8xi32, #tpu.memory_space<smem>>) -> (i32, i32, i32) {
    %c0_i32 = arith.constant 0 : i32
    %c0_i32_0 = arith.constant 0 : i32
    %c0_i32_1 = arith.constant 0 : i32
    return %arg0, %c0_i32, %c0_i32_0 : i32, i32, i32
  }
}

</mosaic_0001>

<bundles_post_ra>
// kernel: tpu_custom_call.1
= control target key start
LH: loop header
LB: loop body
LE: loop exit
PB: predicated region body
PF: predicated region fallthrough
CT: control target
= control target key end

     0   :  { %s3767_s15 = smov [#allocation5]   ;;  %s5676_s0 = inlined_call_operand.vmem [shape: s32[2,8], index: 0, kind: input, shape index: {}]   ;;  %s5677_s1 = inlined_call_operand.vmem [shape: f32[2,3,2048], index: 1, kind: input, shape index: {}]   ;;  %s5678_s2 = inlined_call_operand.vmem [shape: f32[2,256,3], index: 2, kind: input, shape index: {}]   ;;  %s5679_s3 = inlined_call_operand.hbm [shape: f32[2,1,128], index: 3, kind: output, shape index: {}]  }
   0x1   :  { %5691 = sst [smem:[#allocation15_spill]] %s5677_s1  ;;  %s9_s14 = sshll.u32 %s5676_s0, 4  ;;  %s10_s14 = int_to_ptr.vmem [resolvable:$true] %s9_s14 }
   0x2   :  { %5692 = sst [smem:[#allocation16_spill]] %s5678_s2 }
   0x3   :  { %12 = dma.vmem_to_smem %s10_s14, 32, %s3767_s15, [#allocation4] }
   0x4   :  { %3729 = dma.done.wait [#allocation4], 32 }
   0x5   :  { %3730 = vsyncadd [#allocation4], 4294967264 }
   0x6   :  { %15 = sfence }
   0x7   :  { %16 = vsyncpa [#allocation7], 0 }
   0x8   :  { %18 = vsyncpa [#allocation7 + $0x1], 0  ;;  %s3794_s16 = smov 0   ;;  %s3796_s17 = smov 0  }
   0x9   :  { %s3798_s18 = smov 0   ;;  %s3800_s19 = smov 0  }
   0xa   :  { %s3802_s20 = smov 0   ;;  %s3804_s21 = smov 0  }
   0xb   :  { %s3806_s0 = smov 0   ;;  %s3808_s22 = smov 0  }
   0xc LB: > { %5693 = sst [smem:[#allocation10_spill]] %s3757_s21  ;;  %s3353_s23 = sadd.s32 4294967295, %s3765_s22   ;;  %s3765_s22 = sphi %s3808_s22, %s24_s22   ;;  %s3761_s0 = sphi %s3806_s0, %s5736_s0   ;;  %s3757_s21 = sphi %s3804_s21, %s5735_s21   ;;  %s3753_s20 = sphi %s3802_s20, %s5734_s20   ;;  %s3749_s19 = sphi %s3800_s19, %s5733_s19   ;;  %s3745_s18 = sphi %s3798_s18, %s5739_s18   ;;  %s3741_s17 = sphi %s3796_s17, %s5738_s17   ;;  %s3737_s16 = sphi %s3794_s16, %s5737_s16  }
   0xd   : > { %5694 = sst [smem:[#allocation11_spill]] %s3761_s0  ;;  %s3354_s24 = sadd.s32 4294967294, %s3765_s22  }
   0xe   : > { %s33_s25 = sadd.s32 1, %s3757_s21  ;;  %s36_s26 = sadd.s32 1, %s3761_s0 }
   0xf   : > { %p34_p0 = scmp.ge.s32.totalorder %s33_s25, 4  ;;  %p107_p1 = scmp.ne.s32.totalorder %s3745_s18, %s3741_s17 }
  0x10   : > { %p108_p2 = scmp.eq.s32.totalorder %s3353_s23, 7  ;;  %p113_p4 = scmp.ne.s32.totalorder %s3741_s17, %s3737_s16 }
  0x11   : > { %s5741_s25 = smov (%p34_p0, %s33_s25), 0  ;;  %s5743_s26 = smov (!%p34_p0, %s36_s26), %s3761_s0 }
  0x12   : > { %5695 = sst [smem:[#allocation12_spill]] %s5741_s25  ;;  %p3843_p3 = por %p108_p2, %p107_p1 }
  0x13   : > { %p38_p5 = scmp.ge.s32.totalorder %s5743_s26, 2  ;;  %p114_p6 = scmp.eq.s32.totalorder %s3354_s24, 7 }
  0x14   : > { %p3357_p7 = scmp.ge.s32.totalorder %s3765_s22, 1  ;;  %p153_p8 = scmp.lt.s32.totalorder %s3765_s22, 9 }
  0x15   : > { %s5745_s26 = smov (%p38_p5, %s5743_s26), 0  ;;  %p3853_p9 = por %p114_p6, %p113_p4 }
  0x16   : > { %5697 = sst [smem:[#allocation13_spill]] %s5745_s26  ;;  %p154_p10 = pnand %p3357_p7, %p153_p8 }
  0x17   : > { %s94_s29 = ssub.s32 %s3761_s0, %s5745_s26  ;;  %s97_s30 = sadd.s32 1, %s3745_s18 }
  0x18   : > { %p95_p11 = scmp.eq.s32.totalorder %s94_s29, 0  ;;  %157 = sbr.rel (%p154_p10) target bundleno = 1076 (0x434), region = 28 }
  0x19   : > { %s5680_s5 = sand.u32 (!%p154_p10), 1, %s3741_s17   ;;  %s3358_s6 = sshll.u32 (!%p154_p10), %s3749_s19, 2 }
  0x1a   : > { %s3861_s4 = scalar_select %p95_p11, %s3745_s18, %s97_s30  }
  0x1b   : > { %p184_p12 = scmp.lt.s32.totalorder (!%p154_p10), %s3753_s20, 1  ;;  %p186_p13 = scmp.lt.s32.totalorder (!%p154_p10), %s3358_s6, 15 }
  0x1c   : > { %5699 = sst [smem:[#allocation14_spill]] %s3861_s4  ;;  %s3879_s29 = scalar_lea.vmem (!%p154_p10), [#allocation6], %s5680_s5 }
  0x1d   : > { %s185_s7 = scalar_select %p184_p12, %s3753_s20, 1 }
  0x1e   : > { %s5747_s6 = smov (!%p186_p13, %s3358_s6), 15  ;;  %s5700_s2 = sld [smem:[#allocation16_spill]] }
  0x1f   : > { %s3359_s8 = sshll.u32 %s185_s7, 4  ;;  %s3501_s9 = sshll.u32 %s185_s7, 8 }
  0x20   : > { %s189_s10 = sadd.s32 %s3359_s8, %s5747_s6  ;;  %s5701_s1 = sld [smem:[#allocation15_spill]] }
  0x21   : > { %s3360_s14 = sshll.u32 %s189_s10, 2  ;;  %p3363_p0 = scmp.ne.s32.totalorder %s3749_s19, 0 }
  0x23   : > { %201 = sbr.rel (%p3363_p0) target bundleno = 170 (0xaa), region = 32 }
  0x24   : > { %s3870_s13 = scalar_lea.vmem %s5700_s2, %s3501_s9 }
  0x26   : > { %s3875_s24 = scalar_lea.vmem %s5701_s1, %s3360_s14 }
  0x28   : > { %v3768_v0 = vmov inf   ;;  %v330_v1 = vlaneseq  ;;  %v3769_v2 = vmov 0.0  }
  0x29   : > { %202 = vst [vmem:[#allocation2 + $0x2b0] sm:$0xff] %v3768_v0 }
  0x2a   : > { %203 = vst [vmem:[#allocation2 + $0x3b0] sm:$0xff] %v3768_v0  ;;  %vm332_vm0 = vcmp.lt.s32.totalorder %v330_v1, 512 }
  0x2b   : > { %204 = vst [vmem:[#allocation2 + $0xd8] sm:$0xff] %v3768_v0 }
  0x2c   : > { %205 = vst [vmem:[#allocation2 + $0x18] sm:$0xff] %v3768_v0 }
  0x2d   : > { %206 = vst [vmem:[#allocation2 + $0x50] sm:$0xff] %v3768_v0 }
  0x2e   : > { %207 = vst [vmem:[#allocation2 + $0x368] sm:$0xff] %v3768_v0 }
  0x2f   : > { %208 = vst [vmem:[#allocation2 + $0x330] sm:$0xff] %v3768_v0 }
  0x30   : > { %209 = vst [vmem:[#allocation2 + $0x48] sm:$0xff] %v3768_v0 }
  0x31   : > { %210 = vst [vmem:[#allocation2 + $0x380] sm:$0xff] %v3768_v0 }
  0x32   : > { %211 = vst [vmem:[#allocation2 + $0x110] sm:$0xff] %v3768_v0 }
  0x33   : > { %212 = vst [vmem:[#allocation2 + $0x118] sm:$0xff] %v3768_v0 }
  0x34   : > { %213 = vst [vmem:[#allocation2 + $0x98] sm:$0xff] %v3768_v0 }
  0x35   : > { %214 = vst [vmem:[#allocation2 + $0x320] sm:$0xff] %v3768_v0 }
  0x36   : > { %215 = vst [vmem:[#allocation2 + $0x150] sm:$0xff] %v3768_v0 }
  0x37   : > { %216 = vst [vmem:[#allocation2 + $0x108] sm:$0xff] %v3768_v0 }
  0x38   : > { %217 = vst [vmem:[#allocation2 + $0x60] sm:$0xff] %v3768_v0 }
  0x39   : > { %218 = vst [vmem:[#allocation2 + $0x2e0] sm:$0xff] %v3768_v0 }
  0x3a   : > { %219 = vst [vmem:[#allocation2 + $0x388] sm:$0xff] %v3768_v0 }
  0x3b   : > { %220 = vst [vmem:[#allocation2 + $0x338] sm:$0xff] %v3768_v0 }
  0x3c   : > { %221 = vst [vmem:[#allocation2 + $0x340] sm:$0xff] %v3768_v0 }
  0x3d   : > { %222 = vst [vmem:[#allocation2 + $0x80] sm:$0xff] %v3768_v0 }
  0x3e   : > { %223 = vst [vmem:[#allocation2 + $0x1a8] sm:$0xff] %v3768_v0 }
  0x3f   : > { %224 = vst [vmem:[#allocation2 + $0x1b8] sm:$0xff] %v3768_v0 }
  0x40   : > { %225 = vst [vmem:[#allocation2 + $0x168] sm:$0xff] %v3768_v0 }
  0x41   : > { %226 = vst [vmem:[#allocation2 + $0x3e8] sm:$0xff] %v3768_v0 }
  0x42   : > { %227 = vst [vmem:[#allocation2 + $0x2f8] sm:$0xff] %v3768_v0 }
  0x43   : > { %228 = vst [vmem:[#allocation2 + $0x290] sm:$0xff] %v3768_v0 }
  0x44   : > { %229 = vst [vmem:[#allocation2 + $0x28] sm:$0xff] %v3768_v0 }
  0x45   : > { %230 = vst [vmem:[#allocation2 + $0x138] sm:$0xff] %v3768_v0 }
  0x46   : > { %231 = vst [vmem:[#allocation2 + $0xc0] sm:$0xff] %v3768_v0 }
  0x47   : > { %232 = vst [vmem:[#allocation2 + $0x1c0] sm:$0xff] %v3768_v0 }
  0x48   : > { %233 = vst [vmem:[#allocation2 + $0x280] sm:$0xff] %v3768_v0 }
  0x49   : > { %234 = vst [vmem:[#allocation2 + $0x100] sm:$0xff] %v3768_v0 }
  0x4a   : > { %235 = vst [vmem:[#allocation2 + $0x3c0] sm:$0xff] %v3768_v0 }
  0x4b   : > { %236 = vst [vmem:[#allocation2 + $0x158] sm:$0xff] %v3768_v0 }
  0x4c   : > { %237 = vst [vmem:[#allocation2 + $0x3e0] sm:$0xff] %v3768_v0 }
  0x4d   : > { %238 = vst [vmem:[#allocation2 + $0x218] sm:$0xff] %v3768_v0 }
  0x4e   : > { %239 = vst [vmem:[#allocation2 + $0x3f8] sm:$0xff] %v3768_v0 }
  0x4f   : > { %240 = vst [vmem:[#allocation2 + $0x8] sm:$0xff] %v3768_v0 }
  0x50   : > { %241 = vst [vmem:[#allocation2 + $0x128] sm:$0xff] %v3768_v0 }
  0x51   : > { %242 = vst [vmem:[#allocation2 + $0x2a0] sm:$0xff] %v3768_v0 }
  0x52   : > { %243 = vst [vmem:[#allocation2 + $0x3f0] sm:$0xff] %v3768_v0 }
  0x53   : > { %244 = vst [vmem:[#allocation2 + $0xa0] sm:$0xff] %v3768_v0 }
  0x54   : > { %245 = vst [vmem:[#allocation2 + $0x2c0] sm:$0xff] %v3768_v0 }
  0x55   : > { %246 = vst [vmem:[#allocation2 + $0xb0] sm:$0xff] %v3768_v0 }
  0x56   : > { %247 = vst [vmem:[#allocation2 + $0x1e0] sm:$0xff] %v3768_v0 }
  0x57   : > { %248 = vst [vmem:[#allocation2 + $0x1f0] sm:$0xff] %v3768_v0 }
  0x58   : > { %249 = vst [vmem:[#allocation2 + $0x10] sm:$0xff] %v3768_v0 }
  0x59   : > { %250 = vst [vmem:[#allocation2 + $0x230] sm:$0xff] %v3768_v0 }
  0x5a   : > { %251 = vst [vmem:[#allocation2 + $0x240] sm:$0xff] %v3768_v0 }
  0x5b   : > { %252 = vst [vmem:[#allocation2 + $0x90] sm:$0xff] %v3768_v0 }
  0x5c   : > { %253 = vst [vmem:[#allocation2 + $0x3a0] sm:$0xff] %v3768_v0 }
  0x5d   : > { %254 = vst [vmem:[#allocation2 + $0x208] sm:$0xff] %v3768_v0 }
  0x5e   : > { %255 = vst [vmem:[#allocation2 + $0xd0] sm:$0xff] %v3768_v0 }
  0x5f   : > { %256 = vst [vmem:[#allocation2 + $0x88] sm:$0xff] %v3768_v0 }
  0x60   : > { %257 = vst [vmem:[#allocation2 + $0x2f0] sm:$0xff] %v3768_v0 }
  0x61   : > { %258 = vst [vmem:[#allocation2 + $0x358] sm:$0xff] %v3768_v0 }
  0x62   : > { %259 = vst [vmem:[#allocation2 + $0x268] sm:$0xff] %v3768_v0 }
  0x63   : > { %260 = vst [vmem:[#allocation2 + $0x350] sm:$0xff] %v3768_v0 }
  0x64   : > { %261 = vst [vmem:[#allocation2 + $0x188] sm:$0xff] %v3768_v0 }
  0x65   : > { %262 = vst [vmem:[#allocation2 + $0x1d8] sm:$0xff] %v3768_v0 }
  0x66   : > { %263 = vst [vmem:[#allocation2 + $0x30] sm:$0xff] %v3768_v0 }
  0x67   : > { %264 = vst [vmem:[#allocation2 + $0x140] sm:$0xff] %v3768_v0 }
  0x68   : > { %265 = vst [vmem:[#allocation2 + $0x2a8] sm:$0xff] %v3768_v0 }
  0x69   : > { %266 = vst [vmem:[#allocation2 + $0x130] sm:$0xff] %v3768_v0 }
  0x6a   : > { %267 = vst [vmem:[#allocation2 + $0x200] sm:$0xff] %v3768_v0 }
  0x6b   : > { %268 = vst [vmem:[#allocation2 + $0x318] sm:$0xff] %v3768_v0 }
  0x6c   : > { %269 = vst [vmem:[#allocation2 + $0x220] sm:$0xff] %v3768_v0 }
  0x6d   : > { %270 = vst [vmem:[#allocation2 + $0x70] sm:$0xff] %v3768_v0 }
  0x6e   : > { %271 = vst [vmem:[#allocation2 + $0x300] sm:$0xff] %v3768_v0 }
  0x6f   : > { %272 = vst [vmem:[#allocation2 + $0xe0] sm:$0xff] %v3768_v0 }
  0x70   : > { %273 = vst [vmem:[#allocation2 + $0x178] sm:$0xff] %v3768_v0 }
  0x71   : > { %274 = vst [vmem:[#allocation2 + $0x328] sm:$0xff] %v3768_v0 }
  0x72   : > { %275 = vst [vmem:[#allocation2 + $0x260] sm:$0xff] %v3768_v0 }
  0x73   : > { %276 = vst [vmem:[#allocation2 + $0x3b8] sm:$0xff] %v3768_v0 }
  0x74   : > { %277 = vst [vmem:[#allocation2 + $0x2b8] sm:$0xff] %v3768_v0 }
  0x75   : > { %278 = vst [vmem:[#allocation2 + $0x248] sm:$0xff] %v3768_v0 }
  0x76   : > { %279 = vst [vmem:[#allocation2 + $0x40] sm:$0xff] %v3768_v0 }
  0x77   : > { %280 = vst [vmem:[#allocation2 + $0x20] sm:$0xff] %v3768_v0 }
  0x78   : > { %281 = vst [vmem:[#allocation2 + $0xe8] sm:$0xff] %v3768_v0 }
  0x79   : > { %282 = vst [vmem:[#allocation2 + $0x288] sm:$0xff] %v3768_v0 }
  0x7a   : > { %283 = vst [vmem:[#allocation2 + $0x3a8] sm:$0xff] %v3768_v0 }
  0x7b   : > { %284 = vst [vmem:[#allocation2 + $0x3c8] sm:$0xff] %v3768_v0 }
  0x7c   : > { %285 = vst [vmem:[#allocation2 + $0x160] sm:$0xff] %v3768_v0 }
  0x7d   : > { %286 = vst [vmem:[#allocation2 + $0x2c8] sm:$0xff] %v3768_v0 }
  0x7e   : > { %287 = vst [vmem:[#allocation2 + $0x210] sm:$0xff] %v3768_v0 }
  0x7f   : > { %288 = vst [vmem:[#allocation2 + $0x3d8] sm:$0xff] %v3768_v0 }
  0x80   : > { %289 = vst [vmem:[#allocation2 + $0x1e8] sm:$0xff] %v3768_v0 }
  0x81   : > { %290 = vst [vmem:[#allocation2 + $0x1b0] sm:$0xff] %v3768_v0 }
  0x82   : > { %291 = vst [vmem:[#allocation2 + $0x1c8] sm:$0xff] %v3768_v0 }
  0x83   : > { %292 = vst [vmem:[#allocation2 + $0x2d0] sm:$0xff] %v3768_v0 }
  0x84   : > { %293 = vst [vmem:[#allocation2 + $0x1d0] sm:$0xff] %v3768_v0 }
  0x85   : > { %294 = vst [vmem:[#allocation2 + $0x58] sm:$0xff] %v3768_v0 }
  0x86   : > { %295 = vst [vmem:[#allocation2 + $0x120] sm:$0xff] %v3768_v0 }
  0x87   : > { %296 = vst [vmem:[#allocation2 + $0x198] sm:$0xff] %v3768_v0 }
  0x88   : > { %297 = vst [vmem:[#allocation2 + $0x2e8] sm:$0xff] %v3768_v0 }
  0x89   : > { %298 = vst [vmem:[#allocation2 + $0x1f8] sm:$0xff] %v3768_v0 }
  0x8a   : > { %299 = vst [vmem:[#allocation2 + $0x238] sm:$0xff] %v3768_v0 }
  0x8b   : > { %300 = vst [vmem:[#allocation2 + $0x398] sm:$0xff] %v3768_v0 }
  0x8c   : > { %301 = vst [vmem:[#allocation2 + $0x390] sm:$0xff] %v3768_v0 }
  0x8d   : > { %302 = vst [vmem:[#allocation2 + $0x1a0] sm:$0xff] %v3768_v0 }
  0x8e   : > { %303 = vst [vmem:[#allocation2 + $0xa8] sm:$0xff] %v3768_v0 }
  0x8f   : > { %304 = vst [vmem:[#allocation2 + $0x258] sm:$0xff] %v3768_v0 }
  0x90   : > { %305 = vst [vmem:[#allocation2 + $0x2d8] sm:$0xff] %v3768_v0 }
  0x91   : > { %306 = vst [vmem:[#allocation2 + $0xf0] sm:$0xff] %v3768_v0 }
  0x92   : > { %307 = vst [vmem:[#allocation2 + $0x180] sm:$0xff] %v3768_v0 }
  0x93   : > { %308 = vst [vmem:[#allocation2 + $0x170] sm:$0xff] %v3768_v0 }
  0x94   : > { %309 = vst [vmem:[#allocation2 + $0x3d0] sm:$0xff] %v3768_v0 }
  0x95   : > { %310 = vst [vmem:[#allocation2 + $0x250] sm:$0xff] %v3768_v0 }
  0x96   : > { %311 = vst [vmem:[#allocation2 + $0x378] sm:$0xff] %v3768_v0 }
  0x97   : > { %312 = vst [vmem:[#allocation2 + $0xb8] sm:$0xff] %v3768_v0 }
  0x98   : > { %313 = vst [vmem:[#allocation2 + $0x38] sm:$0xff] %v3768_v0 }
  0x99   : > { %314 = vst [vmem:[#allocation2 + $0x78] sm:$0xff] %v3768_v0 }
  0x9a   : > { %315 = vst [vmem:[#allocation2 + $0x308] sm:$0xff] %v3768_v0 }
  0x9b   : > { %316 = vst [vmem:[#allocation2 + $0x370] sm:$0xff] %v3768_v0 }
  0x9c   : > { %317 = vst [vmem:[#allocation2 + $0xc8] sm:$0xff] %v3768_v0 }
  0x9d   : > { %318 = vst [vmem:[#allocation2 + $0x278] sm:$0xff] %v3768_v0 }
  0x9e   : > { %319 = vst [vmem:[#allocation2 + $0x360] sm:$0xff] %v3768_v0 }
  0x9f   : > { %320 = vst [vmem:[#allocation2 + $0x228] sm:$0xff] %v3768_v0 }
  0xa0   : > { %321 = vst [vmem:[#allocation2 + $0x348] sm:$0xff] %v3768_v0 }
  0xa1   : > { %322 = vst [vmem:[#allocation2 + $0x148] sm:$0xff] %v3768_v0 }
  0xa2   : > { %323 = vst [vmem:[#allocation2 + $0xf8] sm:$0xff] %v3768_v0 }
  0xa3   : > { %324 = vst [vmem:[#allocation2 + $0x68] sm:$0xff] %v3768_v0 }
  0xa4   : > { %325 = vst [vmem:[#allocation2] sm:$0xff] %v3768_v0 }
  0xa5   : > { %326 = vst [vmem:[#allocation2 + $0x298] sm:$0xff] %v3768_v0 }
  0xa6   : > { %327 = vst [vmem:[#allocation2 + $0x270] sm:$0xff] %v3768_v0 }
  0xa7   : > { %328 = vst [vmem:[#allocation2 + $0x310] sm:$0xff] %v3768_v0 }
  0xa8   : > { %329 = vst [vmem:[#allocation2 + $0x190] sm:$0xff] %v3768_v0 }
  0xa9   : > { %334 = vst.msk [vmem:[#allocation3] sm:$0xf] %vm332_vm0, %v3769_v2 }
  0xaa PF: > { %v335_v3 = vld [vmem:[%s3875_s24] sm:$0x77]  ;;  %v336_v4 = vld [vmem:[%s3875_s24 + $0x8] sm:$0x77]  ;;  %vm644_vm1 = vcmask 23552   ;;  %vm571_vm2 = vcmask 1042432   ;;  %v370_v58 = vlaneseq }
  0xab   : > { %v337_v5 = vld [vmem:[%s3870_s13] sm:$0xff]  ;;  %v556_v6 = vmul.f32 %v335_v3, %v335_v3  ;;  %v557_v7 = vmul.f32 %v336_v4, %v336_v4  ;;  %v338_v10 = vld [vmem:[%s3870_s13 + $0x8] sm:$0xff]  ;;  %v339_v17 = vld [vmem:[%s3870_s13 + $0x10] sm:$0xff]  ;;  %s4082_s30 = sshll.u32 %s3753_s20, 7  ;;  %p3498_p11 = scmp.ne.s32.totalorder %s3749_s19, 3 }
  0xac   : > { %v612_v8 = vmul.f32 %v337_v5, %v337_v5  ;;  %v613_v11 = vmul.f32 %v338_v10, %v338_v10  ;;  %v614_v22 = vmul.f32 %v339_v17, %v339_v17  ;;  %v340_v26 = vld [vmem:[%s3870_s13 + $0x18] sm:$0xff]  ;;  %v341_v31 = vld [vmem:[%s3870_s13 + $0x20] sm:$0xff]  ;;  %v342_v34 = vld [vmem:[%s3870_s13 + $0x28] sm:$0xff]  ;;  %s5686_s6 = sadd.s32 1, %s4082_s30  ;;  %s381_s7 = sld [smem:[#allocation5 + %s4082_s30]]  ;;  %v4148_v60 = vand.u32 127, %v370_v58 }
  0xad   : > { %560 = vst [vmem:[#allocation1] ss:$2 sm:$0xff] %v556_v6  ;;  %v615_v29 = vmul.f32 %v340_v26, %v340_v26  ;;  %v616_v32 = vmul.f32 %v341_v31, %v341_v31  ;;  %v617_v35 = vmul.f32 %v342_v34, %v342_v34  ;;  %v343_v37 = vld [vmem:[%s3870_s13 + $0x30] sm:$0xff]  ;;  %v344_v40 = vld [vmem:[%s3870_s13 + $0x38] sm:$0xff]  ;;  %v345_v43 = vld [vmem:[%s3870_s13 + $0x40] sm:$0xff]  ;;  %s5683_s8 = sadd.s32 2, %s4082_s30 }
  0xae   : > { %v645_v9 = vsel %vm644_vm1, %v612_v8, 0.0  ;;  %562 = vst [vmem:[#allocation1 + $0x10] ss:$2 sm:$0xff] %v557_v7  ;;  %v648_v12 = vsel %vm644_vm1, %v613_v11, 0.0  ;;  %v651_v23 = vsel %vm644_vm1, %v614_v22, 0.0  ;;  %v618_v38 = vmul.f32 %v343_v37, %v343_v37  ;;  %v346_v46 = vld [vmem:[%s3870_s13 + $0x48] sm:$0xff] }
  0xaf   : > { %646 = vadd.xlane.f32.xlu0 %v645_v9  ;;  %652 = vadd.xlane.f32.xlu1 %v651_v23  ;;  %v654_v30 = vsel %vm644_vm1, %v615_v29, 0.0  ;;  %v657_v33 = vsel %vm644_vm1, %v616_v32, 0.0  ;;  %v660_v36 = vsel %vm644_vm1, %v617_v35, 0.0  ;;  %v619_v41 = vmul.f32 %v344_v40, %v344_v40  ;;  %v347_v49 = vld [vmem:[%s3870_s13 + $0x50] sm:$0xff]  ;;  %v4091_v52 = vld [vmem:[%s3870_s13 + $0x58] sm:$0xff]  ;;  %s403_s9 = sld [smem:[#allocation5 + %s5686_s6]] }
  0xb0   : > { %658 = vadd.xlane.f32.xlu2 %v657_v33  ;;  %v663_v39 = vsel %vm644_vm1, %v618_v38, 0.0  ;;  %v620_v44 = vmul.f32 %v345_v43, %v345_v43  ;;  %v621_v47 = vmul.f32 %v346_v46, %v346_v46  ;;  %v622_v50 = vmul.f32 %v347_v49, %v347_v49  ;;  %s425_s10 = sld [smem:[#allocation5 + %s5683_s8]]  ;;  %s5682_s11 = sadd.s32 3, %s4082_s30  ;;  %v4112_v55 = vld [vmem:[%s3870_s13 + $0x60] sm:$0xff]  ;;  %v4144_v59 = vld [vmem:[%s3870_s13 + $0x68] sm:$0xff]  ;;  %v4202_v7 = vld [vmem:[%s3870_s13 + $0x70] sm:$0xff] }
  0xb1   : > { %v666_v42 = vsel %vm644_vm1, %v619_v41, 0.0  ;;  %v623_v53 = vmul.f32 %v4091_v52, %v4091_v52  ;;  %s4105_s12 = sld [smem:[#allocation5 + %s5682_s11]]  ;;  %s5681_s14 = sadd.s32 4, %s4082_s30  ;;  %v624_v56 = vmul.f32 %v4112_v55, %v4112_v55  ;;  %v625_v61 = vmul.f32 %v4144_v59, %v4144_v59 }
  0xb2   : > { %v669_v45 = vsel %vm644_vm1, %v620_v44, 0.0  ;;  %v672_v48 = vsel %vm644_vm1, %v621_v47, 0.0  ;;  %v675_v51 = vsel %vm644_vm1, %v622_v50, 0.0  ;;  %p382_p1 = scmp.gt.s32.totalorder %s381_s7, 0  ;;  %s5685_s15 = sadd.s32 5, %s4082_s30  ;;  %v372_v62 = vadd.s32 128, %v4148_v60 }
  0xb3   : > { %v678_v54 = vsel %vm644_vm1, %v623_v53, 0.0  ;;  %s4116_s23 = sld [smem:[#allocation5 + %s5681_s14]]  ;;  %s5684_s24 = sadd.s32 6, %s4082_s30  ;;  %v681_v57 = vsel %vm644_vm1, %v624_v56, 0.0  ;;  %v373_v63 = vadd.s32 256, %v4148_v60  ;;  %v684_v0 = vsel %vm644_vm1, %v625_v61, 0.0 }
  0xb4   : > { %v563_v13 = vld.sshfl [vmem:[#allocation1] sm:$0xff pattern:$0x75316420]  ;;  %v564_v14 = vld.sshfl [vmem:[#allocation1 + $0x8] sm:$0xff pattern:$0x75316420] }
  0xb5   : > { %v4017_v15 = vsel %vm571_vm2, %v563_v13, 0.0  ;;  %v4020_v16 = vsel %vm571_vm2, %v564_v14, 0.0  ;;  %743 = vst [vmem:[#allocation1] ss:$2 sm:$0xff] %v335_v3  ;;  %p404_p2 = scmp.gt.s32.totalorder %s403_s9, 0  ;;  %s4125_s5 = sld [smem:[#allocation5 + %s5685_s15]] }
  0xb6   : > { %v565_v18 = vld.sshfl [vmem:[#allocation1 + $0x10] sm:$0xff pattern:$0x75316420]  ;;  %v566_v19 = vld.sshfl [vmem:[#allocation1 + $0x18] sm:$0xff pattern:$0x75316420] }
  0xb7   : > { %649 = vadd.xlane.f32.xlu0 %v648_v12  ;;  %v4024_v20 = vsel %vm571_vm2, %v565_v18, 0.0  ;;  %v4027_v21 = vsel %vm571_vm2, %v566_v19, 0.0  ;;  %745 = vst [vmem:[#allocation1 + $0x10] ss:$2 sm:$0xff] %v336_v4  ;;  %655 = vadd.xlane.f32.xlu1 %v654_v30  ;;  %p426_p4 = scmp.gt.s32.totalorder %s425_s10, 0  ;;  %p448_p5 = scmp.gt.s32.totalorder %s4105_s12, 0 }
  0xb8   : > { %661 = vadd.xlane.f32.xlu2 %v660_v36  ;;  %s4129_s9 = scalar_select %p382_p1, 1, 0  ;;  %v587_v9 = vrot.slane %v4024_v20, 4 }
  0xb9   : > { %s4131_s14 = scalar_select %p404_p2, 1, 0 }
  0xba   : > { %s4136_s11 = sld [smem:[#allocation5 + %s5684_s24]]  ;;  %s5687_s8 = sadd.s32 7, %s4082_s30 }
  0xbb   : > { %s4138_s10 = scalar_select %p426_p4, 1, 0 }
  0xbc   : > { %v746_v24 = vld.sshfl [vmem:[#allocation1] sm:$0xff pattern:$0x75316420]  ;;  %v747_v25 = vld.sshfl [vmem:[#allocation1 + $0x8] sm:$0xff pattern:$0x75316420]  ;;  %s384_s24 = scvt.s32.f32 %s4129_s9  ;;  %s406_s6 = scvt.s32.f32 %s4131_s14 }
  0xbd   : > { %3366 = vmatpush.msk.msra.mxu0 %vm571_vm2, %v746_v24  ;;  %3399 = vmatpush.msk.msra.mxu1 %vm571_vm2, %v747_v25  ;;  %s3364_s7 = sshll.u32 %s3749_s19, 9  ;;  %p470_p6 = scmp.gt.s32.totalorder %s4116_s23, 0 }
  0xbe   : > { %v748_v27 = vld.sshfl [vmem:[#allocation1 + $0x10] sm:$0xff pattern:$0x75316420]  ;;  %v749_v28 = vld.sshfl [vmem:[#allocation1 + $0x18] sm:$0xff pattern:$0x75316420]  ;;  %3367 = vmatmul.msk.f32.vlgmr.msra.gmra.mxu0 %vm644_vm1, %v337_v5  ;;  %3400 = vmatmul.msk.f32.vlgmr.msra.gmra.mxu1 %vm644_vm1, %v337_v5  ;;  %v4165_v1 = vstv %s3364_s7  ;;  %s428_s14 = scvt.s32.f32 %s4138_s10  ;;  %v4206_v8 = vstv %s406_s6 }
  0xbf   : > { %3432 = vmatpush.msk.msra.mxu2 %vm571_vm2, %v748_v27  ;;  %3465 = vmatpush.msk.msra.mxu3 %vm571_vm2, %v749_v28  ;;  %s4153_s12 = scalar_select %p448_p5, 1, 0  ;;  %v4174_v2 = vadd.s32 %v4165_v1, %v372_v62  ;;  %v4177_v3 = vadd.s32 %v4165_v1, %v373_v63  ;;  %v4182_v4 = vadd.s32 %v4165_v1, %v4148_v60  ;;  %v374_v28 = vadd.s32 384, %v4148_v60 }
  0xc0   : > { %3433 = vmatmul.msk.f32.vlgmr.msra.gmra.mxu2 %vm644_vm1, %v337_v5  ;;  %3466 = vmatmul.msk.f32.vlgmr.msra.gmra.mxu3 %vm644_vm1, %v337_v5  ;;  %s4160_s15 = sld [smem:[#allocation5 + %s5687_s8]]  ;;  %p492_p7 = scmp.gt.s32.totalorder %s4125_s5, 0  ;;  %v4187_v5 = vstv %s384_s24 }
  0xc1   : > { %664 = vadd.xlane.f32.xlu0 %v663_v39  ;;  %667 = vadd.xlane.f32.xlu1 %v666_v42  ;;  %s4171_s1 = scalar_select %p470_p6, 1, 0  ;;  %vm386_vm3 = vcmp.ge.s32.totalorder %v4174_v2, 0  ;;  %vm390_vm4 = vcmp.lt.s32.totalorder %v4174_v2, 225  ;;  %vm408_vm6 = vcmp.ge.s32.totalorder %v4174_v2, 225  ;;  %vm412_vm7 = vcmp.lt.s32.totalorder %v4174_v2, 450 }
  0xc2   : > { %670 = vadd.xlane.f32.xlu2 %v669_v45  ;;  %p514_p8 = scmp.gt.s32.totalorder %s4136_s11, 0  ;;  %vm4191_vm5 = vmand %vm386_vm3, %vm390_vm4  ;;  %vm385_vm8 = vcmp.ge.s32.totalorder %v4182_v4, 0  ;;  %vm389_vm9 = vcmp.lt.s32.totalorder %v4182_v4, 225  ;;  %s450_s23 = scvt.s32.f32 %s4153_s12  ;;  %vm387_vm11 = vcmp.ge.s32.totalorder %v4177_v3, 0  ;;  %vm407_vm13 = vcmp.ge.s32.totalorder %v4182_v4, 225 }
  0xc3   : > { %s4189_s5 = scalar_select %p492_p7, 1, 0  ;;  %vm4210_vm10 = vmand %vm408_vm6, %vm412_vm7  ;;  %vm411_vm14 = vcmp.lt.s32.totalorder %v4182_v4, 450  ;;  %v399_v11 = vsel %vm4191_vm5, %v4187_v5, 0.0  ;;  %vm429_vm0 = vcmp.ge.s32.totalorder %v4182_v4, 450  ;;  %vm433_vm2 = vcmp.lt.s32.totalorder %v4182_v4, 675 }
  0xc4   : > { %s472_s24 = scvt.s32.f32 %s4171_s1  ;;  %vm393_vm12 = vmand %vm385_vm8, %vm389_vm9  ;;  %vm451_vm3 = vcmp.ge.s32.totalorder %v4182_v4, 675  ;;  %vm455_vm5 = vcmp.lt.s32.totalorder %v4182_v4, 900  ;;  %v4243_v19 = vstv %s450_s23  ;;  %vm473_vm7 = vcmp.ge.s32.totalorder %v4182_v4, 900  ;;  %s2427_s19 = sld [smem:[#allocation5 + %s4082_s30]] (!%p3498_p11) }
  0xc5   : > { %s4221_s6 = scalar_select %p514_p8, 1, 0  ;;  %v398_v12 = vsel %vm393_vm12, %v4187_v5, 0.0  ;;  %vm415_vm15 = vmand %vm407_vm13, %vm411_vm14  ;;  %vm477_vm8 = vcmp.lt.s32.totalorder %v4182_v4, 1125  ;;  %vm495_vm12 = vcmp.ge.s32.totalorder %v4182_v4, 1125  ;;  %vm499_vm13 = vcmp.lt.s32.totalorder %v4182_v4, 1350 }
  0xc6   : > { %3368 = vmatmul.msk.f32.gmra.mxu0 %vm644_vm1, %v338_v10  ;;  %3401 = vmatmul.msk.f32.gmra.mxu1 %vm644_vm1, %v338_v10  ;;  %p536_p10 = scmp.gt.s32.totalorder %s4160_s15, 0  ;;  %v420_v14 = vsel %vm415_vm15, %v4206_v8, %v398_v12  ;;  %vm437_vm4 = vmand %vm429_vm0, %vm433_vm2  ;;  %s494_s11 = scvt.s32.f32 %s4189_s5  ;;  %v4255_v24 = vstv %s472_s24  ;;  %vm517_vm15 = vcmp.ge.s32.totalorder %v4182_v4, 1350  ;;  %vm521_vm0 = vcmp.lt.s32.totalorder %v4182_v4, 1575 }
  0xc7   : > { %vm459_vm6 = vmand %vm451_vm3, %vm455_vm5  ;;  %s516_s9 = scvt.s32.f32 %s4221_s6  ;;  %vm391_vm2 = vcmp.lt.s32.totalorder %v4177_v3, 225  ;;  %vm543_vm5 = vcmp.lt.s32.totalorder %v4182_v4, 1800  ;;  %v421_v32 = vsel %vm4210_vm10, %v4206_v8, %v399_v11  ;;  %v580_v42 = vrot.slane %v4020_v16, 4  ;;  %s5725_s7 = sadd.s32 (!%p3498_p11), 2, %s4082_s30 }
  0xc8   : > { %3434 = vmatmul.msk.f32.gmra.mxu2 %vm644_vm1, %v338_v10  ;;  %3467 = vmatmul.msk.f32.gmra.mxu3 %vm644_vm1, %v338_v10  ;;  %v626_v10 = vmul.f32 %v4202_v7, %v4202_v7  ;;  %vm4249_vm9 = vmand %vm473_vm7, %vm477_vm8  ;;  %s4271_s1 = scalar_select %p536_p10, 1, 0  ;;  %v4285_v29 = vstv %s494_s11  ;;  %vm430_vm7 = vcmp.ge.s32.totalorder %v4174_v2, 450  ;;  %vm434_vm8 = vcmp.lt.s32.totalorder %v4174_v2, 675 }
  0xc9   : > { %673 = vadd.xlane.f32.xlu0 %v672_v48  ;;  %676 = vadd.xlane.f32.xlu1 %v675_v51  ;;  %vm4263_vm14 = vmand %vm495_vm12, %vm499_vm13  ;;  %vm456_vm12 = vcmp.lt.s32.totalorder %v4174_v2, 900  ;;  %v4314_v35 = vstv %s516_s9  ;;  %v581_v50 = vadd.f32 %v580_v42, %v4020_v16  ;;  %s2434_s12 = sld [smem:[#allocation5 + %s5725_s7]] (!%p3498_p11)  ;;  %s5727_s23 = sadd.s32 (!%p3498_p11), 4, %s4082_s30 }
  0xca   : > { %679 = vadd.xlane.f32.xlu2 %v678_v54  ;;  %v687_v13 = vsel %vm644_vm1, %v626_v10, 0.0  ;;  %vm4274_vm3 = vmand %vm517_vm15, %vm521_vm0  ;;  %s538_s15 = scvt.s32.f32 %s4271_s1  ;;  %vm496_vm0 = vcmp.ge.s32.totalorder %v4174_v2, 1125  ;;  %p2428_p12 = scmp.gt.s32.totalorder (!%p3498_p11), %s2427_s19, 0 }
  0xcb   : > { %vm4306_vm13 = vmand %vm387_vm11, %vm391_vm2  ;;  %vm478_vm11 = vcmp.lt.s32.totalorder %v4174_v2, 1125  ;;  %vm500_vm2 = vcmp.lt.s32.totalorder %v4174_v2, 1350  ;;  %v582_v16 = vrot.slane %v581_v50, 2  ;;  %s2442_s24 = sld [smem:[#allocation5 + %s5727_s23]] (!%p3498_p11)  ;;  %s5728_s11 = sadd.s32 (!%p3498_p11), 5, %s4082_s30 }
  0xcc   : > { %vm438_vm10 = vmand %vm430_vm7, %vm434_vm8  ;;  %vm522_vm7 = vcmp.lt.s32.totalorder %v4174_v2, 1575  ;;  %v400_v47 = vsel %vm4306_vm13, %v4187_v5, 0.0  ;;  %s2446_s9 = sld [smem:[#allocation5 + %s5728_s11]] (!%p3498_p11) }
  0xcd   : > { %vm504_vm8 = vmand %vm496_vm0, %vm500_vm2  ;;  %vm435_vm0 = vcmp.lt.s32.totalorder %v4177_v3, 675  ;;  %vm453_vm2 = vcmp.ge.s32.totalorder %v4177_v3, 675  ;;  %v583_v60 = vadd.f32 %v582_v16, %v581_v50 }
  0xce   : > { %3369 = vmatmul.msk.f32.gmra.mxu0 %vm644_vm1, %v339_v17  ;;  %3402 = vmatmul.msk.f32.gmra.mxu1 %vm644_vm1, %v339_v17 }
  0xcf   : > { %v584_v6 = vrot.slane %v583_v60, 1  ;;  %p2435_p0 = scmp.gt.s32.totalorder (!%p3498_p11), %s2434_s12, 0 }
  0xd0   : > { %3435 = vmatmul.msk.f32.gmra.mxu2 %vm644_vm1, %v339_v17  ;;  %3468 = vmatmul.msk.f32.gmra.mxu3 %vm644_vm1, %v339_v17  ;;  %v4239_v17 = vstv %s428_s14  ;;  %s5726_s14 = sadd.s32 (!%p3498_p11), 3, %s4082_s30 }
  0xd1   : > { %682 = vadd.xlane.f32.xlu0 %v681_v57  ;;  %685 = vadd.xlane.f32.xlu1 %v684_v0  ;;  %v442_v18 = vsel %vm437_vm4, %v4239_v17, %v420_v14  ;;  %vm539_vm4 = vcmp.ge.s32.totalorder %v4182_v4, 1575  ;;  %s2438_s5 = sld [smem:[#allocation5 + %s5726_s14]] (!%p3498_p11)  ;;  %p2443_p2 = scmp.gt.s32.totalorder (!%p3498_p11), %s2442_s24, 0 }
  0xd2   : > { %688 = vadd.xlane.f32.xlu2 %v687_v13  ;;  %v464_v22 = vsel %vm459_vm6, %v4243_v19, %v442_v18  ;;  %vm4287_vm6 = vmand %vm539_vm4, %vm543_vm5  ;;  %vm518_vm4 = vcmp.ge.s32.totalorder %v4174_v2, 1350  ;;  %v588_v13 = vadd.f32 %v587_v9, %v4024_v20  ;;  %v585_v18 = vadd.f32 %v584_v6, %v583_v60  ;;  %v1819_v60 = vld [vmem:[#allocation2 + $0x3b0] sm:$0xff]  ;;  %p2447_p4 = scmp.gt.s32.totalorder (!%p3498_p11), %s2446_s9, 0  ;;  %s3770_s24 = smov (!%p3498_p11), 1.0  }
  0xd3   : > { %v486_v25 = vsel %vm4249_vm9, %v4255_v24, %v464_v22  ;;  %vm452_vm9 = vcmp.ge.s32.totalorder %v4174_v2, 675 }
  0xd4   : > { %v508_v33 = vsel %vm4263_vm14, %v4285_v29, %v486_v25  ;;  %vm474_vm14 = vcmp.ge.s32.totalorder %v4174_v2, 900  ;;  %vm460_vm15 = vmand %vm452_vm9, %vm456_vm12  ;;  %vm540_vm9 = vcmp.ge.s32.totalorder %v4174_v2, 1575  ;;  %vm544_vm12 = vcmp.lt.s32.totalorder %v4174_v2, 1800 }
  0xd5   : > { %v530_v38 = vsel %vm4274_vm3, %v4314_v35, %v508_v33  ;;  %vm482_vm5 = vmand %vm474_vm14, %vm478_vm11  ;;  %vm409_vm14 = vcmp.ge.s32.totalorder %v4177_v3, 225  ;;  %vm413_vm11 = vcmp.lt.s32.totalorder %v4177_v3, 450  ;;  %v589_v22 = vrot.slane %v588_v13, 2 }
  0xd6   : > { %3370 = vmatmul.msk.f32.gmra.mxu0 %vm644_vm1, %v340_v26  ;;  %3403 = vmatmul.msk.f32.gmra.mxu1 %vm644_vm1, %v340_v26  ;;  %vm4339_vm3 = vmand %vm518_vm4, %vm522_vm7  ;;  %vm457_vm4 = vcmp.lt.s32.totalorder %v4177_v3, 900 }
  0xd7   : > { %vm417_vm13 = vmand %vm409_vm14, %vm413_vm11  ;;  %vm519_vm14 = vcmp.ge.s32.totalorder %v4177_v3, 1350  ;;  %vm523_vm11 = vcmp.lt.s32.totalorder %v4177_v3, 1575  ;;  %p2439_p1 = scmp.gt.s32.totalorder (!%p3498_p11), %s2438_s5, 0 }
  0xd8   : > { %3436 = vmatmul.msk.f32.gmra.mxu2 %vm644_vm1, %v340_v26  ;;  %3469 = vmatmul.msk.f32.gmra.mxu3 %vm644_vm1, %v340_v26  ;;  %v422_v54 = vsel %vm417_vm13, %v4206_v8, %v400_v47  ;;  %vm461_vm7 = vmand %vm453_vm2, %vm457_vm4 }
  0xd9   : > { %vm4397_vm13 = vmand %vm519_vm14, %vm523_vm11 }
  0xde   : > { %3371 = vmatmul.msk.f32.gmra.mxu0 %vm644_vm1, %v341_v31  ;;  %3404 = vmatmul.msk.f32.gmra.mxu1 %vm644_vm1, %v341_v31 }
  0xe0   : > { %3437 = vmatmul.msk.f32.gmra.mxu2 %vm644_vm1, %v341_v31  ;;  %3470 = vmatmul.msk.f32.gmra.mxu3 %vm644_vm1, %v341_v31  ;;  %v573_v31 = vrot.slane %v4017_v15, 4 }
  0xe2   : > { %v574_v36 = vadd.f32 %v573_v31, %v4017_v15 }
  0xe4   : > { %v575_v39 = vrot.slane %v574_v36, 2 }
  0xe6   : > { %3372 = vmatmul.msk.f32.gmra.mxu0 %vm644_vm1, %v342_v34  ;;  %3405 = vmatmul.msk.f32.gmra.mxu1 %vm644_vm1, %v342_v34 }
  0xe8   : > { %3438 = vmatmul.msk.f32.gmra.mxu2 %vm644_vm1, %v342_v34  ;;  %3471 = vmatmul.msk.f32.gmra.mxu3 %vm644_vm1, %v342_v34 }
  0xee   : > { %3373 = vmatmul.msk.f32.gmra.mxu0 %vm644_vm1, %v343_v37  ;;  %3406 = vmatmul.msk.f32.gmra.mxu1 %vm644_vm1, %v343_v37 }
  0xf0   : > { %3439 = vmatmul.msk.f32.gmra.mxu2 %vm644_vm1, %v343_v37  ;;  %3472 = vmatmul.msk.f32.gmra.mxu3 %vm644_vm1, %v343_v37  ;;  %v443_v37 = vsel %vm438_vm10, %v4239_v17, %v421_v32  ;;  %vm4351_vm10 = vmand %vm540_vm9, %vm544_vm12  ;;  %vm497_vm12 = vcmp.ge.s32.totalorder %v4177_v3, 1125 }
  0xf1   : > { %v465_v15 = vsel %vm460_vm15, %v4243_v19, %v443_v37  ;;  %vm431_vm15 = vcmp.ge.s32.totalorder %v4177_v3, 450 }
  0xf2   : > { %v487_v41 = vsel %vm482_vm5, %v4255_v24, %v465_v15  ;;  %vm475_vm5 = vcmp.ge.s32.totalorder %v4177_v3, 900 }
  0xf3   : > { %v509_v44 = vsel %vm504_vm8, %v4285_v29, %v487_v41  ;;  %vm479_vm8 = vcmp.lt.s32.totalorder %v4177_v3, 1125  ;;  %v4477_v41 = vld [vmem:[%s3870_s13 + $0x90] sm:$0xff] }
  0xf4   : > { %v531_v48 = vsel %vm4339_vm3, %v4314_v35, %v509_v44  ;;  %vm483_vm9 = vmand %vm475_vm5, %vm479_vm8  ;;  %vm501_vm3 = vcmp.lt.s32.totalorder %v4177_v3, 1350 }
  0xf6   : > { %3374 = vmatmul.msk.f32.gmra.mxu0 %vm644_vm1, %v344_v40  ;;  %3407 = vmatmul.msk.f32.gmra.mxu1 %vm644_vm1, %v344_v40 }
  0xf8   : > { %3440 = vmatmul.msk.f32.gmra.mxu2 %vm644_vm1, %v344_v40  ;;  %3473 = vmatmul.msk.f32.gmra.mxu3 %vm644_vm1, %v344_v40  ;;  %v4330_v40 = vld [vmem:[%s3870_s13 + $0x78] sm:$0xff] }
  0xfe   : > { %3375 = vmatmul.msk.f32.gmra.mxu0 %vm644_vm1, %v345_v43  ;;  %3408 = vmatmul.msk.f32.gmra.mxu1 %vm644_vm1, %v345_v43 }
 0x100   : > { %3441 = vmatmul.msk.f32.gmra.mxu2 %vm644_vm1, %v345_v43  ;;  %3474 = vmatmul.msk.f32.gmra.mxu3 %vm644_vm1, %v345_v43  ;;  %v4336_v43 = vstv %s538_s15  ;;  %s5729_s15 = sadd.s32 (!%p3498_p11), 6, %s4082_s30 }
 0x101   : > { %v4365_v51 = vsel %vm4287_vm6, %v4336_v43, %v530_v38  ;;  %v4381_v56 = vsel %vm4351_vm10, %v4336_v43, %v531_v48  ;;  %vm439_vm6 = vmand %vm431_vm15, %vm435_vm0  ;;  %vm541_vm15 = vcmp.ge.s32.totalorder %v4177_v3, 1575  ;;  %vm545_vm0 = vcmp.lt.s32.totalorder %v4177_v3, 1800  ;;  %s2450_s8 = sld [smem:[#allocation5 + %s5729_s15]] (!%p3498_p11) }
 0x102   : > { %v600_v57 = vsub.f32 1.0, %v4365_v51  ;;  %v444_v61 = vsel %vm439_vm6, %v4239_v17, %v422_v54  ;;  %v601_v63 = vsub.f32 1.0, %v4381_v56  ;;  %vm505_vm10 = vmand %vm497_vm12, %vm501_vm3 }
 0x103   : > { %v466_v62 = vsel %vm461_vm7, %v4243_v19, %v444_v61  ;;  %vm4412_vm2 = vmand %vm541_vm15, %vm545_vm0 }
 0x104   : > { %v488_v0 = vsel %vm483_vm9, %v4255_v24, %v466_v62  ;;  %v604_v4 = vmul.f32 1e+30, %v600_v57  ;;  %v605_v12 = vmul.f32 1e+30, %v601_v63  ;;  %v1818_v57 = vld [vmem:[#allocation2 + $0x2b0] sm:$0xff] }
 0x106   : > { %3376 = vmatmul.msk.f32.gmra.mxu0 %vm644_vm1, %v346_v46  ;;  %3409 = vmatmul.msk.f32.gmra.mxu1 %vm644_vm1, %v346_v46  ;;  %v4448_v26 = vadd.f32 %v605_v12, %v585_v18 }
 0x107   : > { %p2451_p5 = scmp.gt.s32.totalorder (!%p3498_p11), %s2450_s8, 0 }
 0x108   : > { %3442 = vmatmul.msk.f32.gmra.mxu2 %vm644_vm1, %v346_v46  ;;  %3475 = vmatmul.msk.f32.gmra.mxu3 %vm644_vm1, %v346_v46  ;;  %v627_v46 = vmul.f32 %v4330_v40, %v4330_v40 }
 0x10a   : > { %v690_v53 = vsel %vm644_vm1, %v627_v46, 0.0 }
 0x10b   : > { %691 = vadd.xlane.f32.xlu0 %v690_v53 }
 0x10e   : > { %3377 = vmatmul.msk.f32.gmra.mxu0 %vm644_vm1, %v347_v49  ;;  %3410 = vmatmul.msk.f32.gmra.mxu1 %vm644_vm1, %v347_v49 }
 0x110   : > { %3443 = vmatmul.msk.f32.gmra.mxu2 %vm644_vm1, %v347_v49  ;;  %3476 = vmatmul.msk.f32.gmra.mxu3 %vm644_vm1, %v347_v49 }
 0x116   : > { %3378 = vmatmul.msk.f32.gmra.mxu0 %vm644_vm1, %v4091_v52  ;;  %3411 = vmatmul.msk.f32.gmra.mxu1 %vm644_vm1, %v4091_v52 }
 0x118   : > { %3444 = vmatmul.msk.f32.gmra.mxu2 %vm644_vm1, %v4091_v52  ;;  %3477 = vmatmul.msk.f32.gmra.mxu3 %vm644_vm1, %v4091_v52  ;;  %v576_v52 = vadd.f32 %v575_v39, %v574_v36  ;;  %v4464_v36 = vld [vmem:[%s3870_s13 + $0x88] sm:$0xff] }
 0x11e   : > { %3379 = vmatmul.msk.f32.gmra.mxu0 %vm644_vm1, %v4112_v55  ;;  %3412 = vmatmul.msk.f32.gmra.mxu1 %vm644_vm1, %v4112_v55 }
 0x120   : > { %3445 = vmatmul.msk.f32.gmra.mxu2 %vm644_vm1, %v4112_v55  ;;  %3478 = vmatmul.msk.f32.gmra.mxu3 %vm644_vm1, %v4112_v55  ;;  %v4372_v55 = vadd.s32 %v4165_v1, %v374_v28  ;;  %v510_v1 = vsel %vm505_vm10, %v4285_v29, %v488_v0  ;;  %v594_v28 = vrot.slane %v4027_v21, 4 }
 0x121   : > { %v532_v10 = vsel %vm4397_vm13, %v4314_v35, %v510_v1 }
 0x122   : > { %vm388_vm6 = vcmp.ge.s32.totalorder %v4372_v55, 0  ;;  %vm392_vm4 = vcmp.lt.s32.totalorder %v4372_v55, 225  ;;  %vm410_vm5 = vcmp.ge.s32.totalorder %v4372_v55, 225  ;;  %vm414_vm7 = vcmp.lt.s32.totalorder %v4372_v55, 450  ;;  %v4496_v1 = vpop.xlane.xlu1 %652 }
 0x123   : > { %vm396_vm8 = vmand %vm388_vm6, %vm392_vm4  ;;  %vm432_vm9 = vcmp.ge.s32.totalorder %v4372_v55, 450  ;;  %vm436_vm3 = vcmp.lt.s32.totalorder %v4372_v55, 675  ;;  %vm454_vm10 = vcmp.ge.s32.totalorder %v4372_v55, 675  ;;  %vm458_vm14 = vcmp.lt.s32.totalorder %v4372_v55, 900 }
 0x124   : > { %v401_v14 = vsel %vm396_vm8, %v4187_v5, 0.0  ;;  %vm418_vm12 = vmand %vm410_vm5, %vm414_vm7  ;;  %v4432_v20 = vsel %vm4412_vm2, %v4336_v43, %v532_v10  ;;  %vm476_vm15 = vcmp.ge.s32.totalorder %v4372_v55, 900  ;;  %vm480_vm0 = vcmp.lt.s32.totalorder %v4372_v55, 1125 }
 0x125   : > { %v423_v23 = vsel %vm418_vm12, %v4206_v8, %v401_v14  ;;  %vm440_vm11 = vmand %vm432_vm9, %vm436_vm3  ;;  %vm498_vm6 = vcmp.ge.s32.totalorder %v4372_v55, 1125  ;;  %v590_v5 = vadd.f32 %v589_v22, %v588_v13  ;;  %vm502_vm2 = vcmp.lt.s32.totalorder %v4372_v55, 1350 }
 0x126   : > { %3380 = vmatmul.msk.f32.gmra.mxu0 %vm644_vm1, %v4144_v59  ;;  %3413 = vmatmul.msk.f32.gmra.mxu1 %vm644_vm1, %v4144_v59  ;;  %vm462_vm13 = vmand %vm454_vm10, %vm458_vm14  ;;  %vm520_vm5 = vcmp.ge.s32.totalorder %v4372_v55, 1350  ;;  %vm524_vm8 = vcmp.lt.s32.totalorder %v4372_v55, 1575  ;;  %vm542_vm9 = vcmp.ge.s32.totalorder %v4372_v55, 1575  ;;  %vm546_vm12 = vcmp.lt.s32.totalorder %v4372_v55, 1800 }
 0x127   : > { %vm484_vm4 = vmand %vm476_vm15, %vm480_vm0  ;;  %v591_v30 = vrot.slane %v590_v5, 1  ;;  %v602_v31 = vsub.f32 1.0, %v4432_v20  ;;  %v595_v34 = vadd.f32 %v594_v28, %v4027_v21  ;;  %v1820_v28 = vld [vmem:[#allocation2 + $0xd8] sm:$0xff]  ;;  %vm2410_vm15 = vcmask 1040384  }
 0x128   : > { %3446 = vmatmul.msk.f32.gmra.mxu2 %vm644_vm1, %v4144_v59  ;;  %3479 = vmatmul.msk.f32.gmra.mxu3 %vm644_vm1, %v4144_v59  ;;  %v577_v59 = vrot.slane %v576_v52, 1  ;;  %vm506_vm7 = vmand %vm498_vm6, %vm502_vm2 }
 0x129   : > { %vm528_vm3 = vmand %vm520_vm5, %vm524_vm8  ;;  %v596_v15 = vrot.slane %v595_v34, 2  ;;  %v592_v42 = vadd.f32 %v591_v30, %v590_v5  ;;  %vm2412_vm5 = vcmask 1042434   ;;  %vm2420_vm8 = vcmp.lt.s32.totalorder %v370_v58, 512 }
 0x12a   : > { %v578_v3 = vadd.f32 %v577_v59, %v576_v52  ;;  %vm550_vm10 = vmand %vm542_vm9, %vm546_vm12  ;;  %v4488_v59 = vld [vmem:[%s3870_s13 + $0x98] sm:$0xff] }
 0x12b   : > { %v597_v47 = vadd.f32 %v596_v15, %v595_v34  ;;  %v631_v2 = vmul.f32 %v4488_v59, %v4488_v59 }
 0x12d   : > { %v598_v52 = vrot.slane %v597_v47, 1  ;;  %v702_v11 = vsel %vm644_vm1, %v631_v2, 0.0 }
 0x12e   : > { %3381 = vmatmul.msk.f32.gmra.mxu0 %vm644_vm1, %v4202_v7  ;;  %3414 = vmatmul.msk.f32.gmra.mxu1 %vm644_vm1, %v4202_v7 }
 0x12f   : > { %v599_v61 = vadd.f32 %v598_v52, %v597_v47 }
 0x130   : > { %3447 = vmatmul.msk.f32.gmra.mxu2 %vm644_vm1, %v4202_v7  ;;  %3480 = vmatmul.msk.f32.gmra.mxu3 %vm644_vm1, %v4202_v7  ;;  %v445_v7 = vsel %vm440_vm11, %v4239_v17, %v423_v23  ;;  %v4446_v17 = vadd.f32 %v604_v4, %v578_v3 }
 0x131   : > { %v467_v25 = vsel %vm462_vm13, %v4243_v19, %v445_v7  ;;  %v353_v19 = vld [vmem:[%s3870_s13 + $0x80] sm:$0xff] }
 0x132   : > { %v489_v8 = vsel %vm484_vm4, %v4255_v24, %v467_v25  ;;  %v647_v24 = vpop.xlane.xlu0 %646  ;;  %v628_v33 = vmul.f32 %v353_v19, %v353_v19 }
 0x133   : > { %v511_v27 = vsel %vm506_vm7, %v4285_v29, %v489_v8  ;;  %v1306_v38 = vadd.f32 %v647_v24, %v4446_v17  ;;  %v1307_v39 = vadd.f32 %v647_v24, %v4448_v26  ;;  %vm2414_vm7 = vcmask 1041408  }
 0x134   : > { %v533_v32 = vsel %vm528_vm3, %v4314_v35, %v511_v27  ;;  %v693_v37 = vsel %vm644_vm1, %v628_v33, 0.0  ;;  %v629_v35 = vmul.f32 %v4464_v36, %v4464_v36 }
 0x135   : > { %v4460_v29 = vsel %vm550_vm10, %v4336_v43, %v533_v32  ;;  %694 = vadd.xlane.f32.xlu1 %v693_v37  ;;  %v606_v43 = vmul.f32 1e+30, %v602_v31  ;;  %v4514_v32 = vld [vmem:[%s3870_s13 + $0xa0] sm:$0xff]  ;;  %v1822_v37 = vld [vmem:[#allocation2 + $0x50] sm:$0xff] }
 0x136   : > { %3382 = vmatmul.msk.f32.gmra.mxu0 %vm644_vm1, %v4330_v40  ;;  %3415 = vmatmul.msk.f32.gmra.mxu1 %vm644_vm1, %v4330_v40  ;;  %v603_v21 = vsub.f32 1.0, %v4460_v29  ;;  %v696_v44 = vsel %vm644_vm1, %v629_v35, 0.0  ;;  %v1823_v35 = vld [vmem:[#allocation2 + $0x368] sm:$0xff] }
 0x137   : > { %697 = vadd.xlane.f32.xlu2 %v696_v44  ;;  %v4485_v55 = vadd.f32 %v606_v43, %v592_v42  ;;  %v1315_v43 = vadd.f32 %v4496_v1, %v4448_v26 }
 0x138   : > { %3448 = vmatmul.msk.f32.gmra.mxu2 %vm644_vm1, %v4330_v40  ;;  %3481 = vmatmul.msk.f32.gmra.mxu3 %vm644_vm1, %v4330_v40  ;;  %v630_v40 = vmul.f32 %v4477_v41, %v4477_v41  ;;  %v607_v53 = vmul.f32 1e+30, %v603_v21 }
 0x139   : > { %v1308_v10 = vadd.f32 %v647_v24, %v4485_v55 }
 0x13a   : > { %v699_v50 = vsel %vm644_vm1, %v630_v40, 0.0  ;;  %v650_v0 = vpop.xlane.xlu0 %649  ;;  %v4500_v4 = vadd.f32 %v607_v53, %v599_v61 }
 0x13b   : > { %v871_v45 = vpop.f32.mrf.mxu0  ;;  %v984_v46 = vpop.f32.mrf.mxu1  ;;  %700 = vadd.xlane.f32.xlu0 %v699_v50  ;;  %v1310_v14 = vadd.f32 %v650_v0, %v4446_v17  ;;  %v1311_v18 = vadd.f32 %v650_v0, %v4448_v26  ;;  %v1312_v42 = vadd.f32 %v650_v0, %v4485_v55 }
 0x13c   : > { %v1434_v48 = vmul.f32 2.0, %v871_v45  ;;  %v1435_v49 = vmul.f32 2.0, %v984_v46  ;;  %v1309_v13 = vadd.f32 %v647_v24, %v4500_v4  ;;  %v1821_v24 = vld [vmem:[#allocation2 + $0x18] sm:$0xff]  ;;  %v1313_v45 = vadd.f32 %v650_v0, %v4500_v4 }
 0x13d   : > { %703 = vadd.xlane.f32.xlu1 %v702_v11 }
 0x13e   : > { %v1562_v16 = vsub.f32 %v1306_v38, %v1434_v48  ;;  %v1563_v54 = vsub.f32 %v1307_v39, %v1435_v49  ;;  %3383 = vmatmul.msk.f32.gmra.mxu0 %vm644_vm1, %v353_v19  ;;  %3416 = vmatmul.msk.f32.gmra.mxu1 %vm644_vm1, %v353_v19  ;;  %v1314_v38 = vadd.f32 %v4496_v1, %v4446_v17 }
 0x13f   : > { %v632_v39 = vmul.f32 %v4514_v32, %v4514_v32 }
 0x140   : > { %v4490_v62 = vmax.f32 %v1562_v16, 0.0  ;;  %v4492_v63 = vmax.f32 %v1563_v54, 0.0  ;;  %3449 = vmatmul.msk.f32.gmra.mxu2 %vm644_vm1, %v353_v19  ;;  %3482 = vmatmul.msk.f32.gmra.mxu3 %vm644_vm1, %v353_v19 }
 0x141   : > { %v705_v46 = vsel %vm644_vm1, %v632_v39, 0.0 }
 0x142   : > { %v1946_v6 = vmin.f32 %v1818_v57, %v4490_v62  ;;  %v1947_v9 = vmin.f32 %v1819_v60, %v4492_v63  ;;  %706 = vadd.xlane.f32.xlu2 %v705_v46  ;;  %v1829_v46 = vld [vmem:[#allocation2 + $0x98] sm:$0xff] }
 0x143   : > { %v1097_v3 = vpop.f32.mrf.mxu2  ;;  %v1210_v12 = vpop.f32.mrf.mxu3 }
 0x144   : > { %2074 = vst [vmem:[#allocation2 + $0x2b0] sm:$0xff] %v1946_v6  ;;  %v1436_v22 = vmul.f32 2.0, %v1097_v3  ;;  %v1437_v23 = vmul.f32 2.0, %v1210_v12  ;;  %v874_v7 = vpop.f32.mrf.mxu0  ;;  %v987_v5 = vpop.f32.mrf.mxu1  ;;  %v4546_v3 = vld [vmem:[%s3870_s13 + $0xa8] sm:$0xff] }
 0x145   : > { %2075 = vst [vmem:[#allocation2 + $0x3b0] sm:$0xff] %v1947_v9  ;;  %v1438_v25 = vmul.f32 2.0, %v874_v7  ;;  %v1439_v8 = vmul.f32 2.0, %v987_v5 }
 0x146   : > { %v1564_v19 = vsub.f32 %v1308_v10, %v1436_v22  ;;  %v1565_v27 = vsub.f32 %v1309_v13, %v1437_v23  ;;  %3384 = vmatmul.msk.f32.gmra.mxu0 %vm644_vm1, %v4464_v36  ;;  %3417 = vmatmul.msk.f32.gmra.mxu1 %vm644_vm1, %v4464_v36  ;;  %v633_v23 = vmul.f32 %v4546_v3, %v4546_v3 }
 0x147   : > { %v1566_v30 = vsub.f32 %v1310_v14, %v1438_v25  ;;  %v1567_v31 = vsub.f32 %v1311_v18, %v1439_v8  ;;  %v1826_v14 = vld [vmem:[#allocation2 + $0x380] sm:$0xff]  ;;  %v1827_v18 = vld [vmem:[#allocation2 + $0x110] sm:$0xff]  ;;  %v1316_v25 = vadd.f32 %v4496_v1, %v4485_v55  ;;  %v1317_v8 = vadd.f32 %v4496_v1, %v4500_v4 }
 0x148   : > { %v4516_v33 = vmax.f32 %v1564_v19, 0.0  ;;  %v4518_v34 = vmax.f32 %v1565_v27, 0.0  ;;  %3450 = vmatmul.msk.f32.gmra.mxu2 %vm644_vm1, %v4464_v36  ;;  %3483 = vmatmul.msk.f32.gmra.mxu3 %vm644_vm1, %v4464_v36  ;;  %v4534_v36 = vpop.xlane.xlu1 %655 }
 0x149   : > { %v1694_v15 = vmax.f32 %v1566_v30, 0.0  ;;  %v1695_v21 = vmax.f32 %v1567_v31, 0.0  ;;  %v1318_v11 = vadd.f32 %v4534_v36, %v4446_v17  ;;  %v1319_v22 = vadd.f32 %v4534_v36, %v4448_v26 }
 0x14a   : > { %v1948_v44 = vmin.f32 %v1820_v28, %v4516_v33  ;;  %v1949_v40 = vmin.f32 %v1821_v24, %v4518_v34  ;;  %v4562_v24 = vpop.xlane.xlu2 %658 }
 0x14b   : > { %v1950_v47 = vmin.f32 %v1822_v37, %v1694_v15  ;;  %v2202_v48 = vmin.f32 %v4490_v62, %v1694_v15  ;;  %v1951_v49 = vmin.f32 %v1823_v35, %v1695_v21  ;;  %v2239_v50 = vmin.f32 %v4492_v63, %v1695_v21  ;;  %v1100_v52 = vpop.f32.mrf.mxu2  ;;  %v1213_v53 = vpop.f32.mrf.mxu3  ;;  %v1824_v62 = vld [vmem:[#allocation2 + $0x330] sm:$0xff]  ;;  %v1825_v63 = vld [vmem:[#allocation2 + $0x48] sm:$0xff] }
 0x14c   : > { %2076 = vst [vmem:[#allocation2 + $0xd8] sm:$0xff] %v1948_v44  ;;  %v1440_v16 = vmul.f32 2.0, %v1100_v52  ;;  %v1441_v54 = vmul.f32 2.0, %v1213_v53  ;;  %v877_v57 = vpop.f32.mrf.mxu0  ;;  %v990_v60 = vpop.f32.mrf.mxu1 }
 0x14d   : > { %2077 = vst [vmem:[#allocation2 + $0x18] sm:$0xff] %v1949_v40  ;;  %v1442_v61 = vmul.f32 2.0, %v877_v57  ;;  %v1443_v0 = vmul.f32 2.0, %v990_v60  ;;  %v1322_v57 = vadd.f32 %v4562_v24, %v4446_v17 }
 0x14e   : > { %2078 = vst [vmem:[#allocation2 + $0x50] sm:$0xff] %v1950_v47  ;;  %v1568_v2 = vsub.f32 %v1312_v42, %v1440_v16  ;;  %v1569_v6 = vsub.f32 %v1313_v45, %v1441_v54  ;;  %3385 = vmatmul.msk.f32.gmra.mxu0 %vm644_vm1, %v4477_v41  ;;  %3418 = vmatmul.msk.f32.gmra.mxu1 %vm644_vm1, %v4477_v41  ;;  %v1828_v45 = vld [vmem:[#allocation2 + $0x118] sm:$0xff]  ;;  %v1830_v16 = vld [vmem:[#allocation2 + $0x320] sm:$0xff]  ;;  %v1831_v54 = vld [vmem:[#allocation2 + $0x150] sm:$0xff] }
 0x14f   : > { %2079 = vst [vmem:[#allocation2 + $0x368] sm:$0xff] %v1951_v49  ;;  %v1570_v9 = vsub.f32 %v1314_v38, %v1442_v61  ;;  %v1571_v10 = vsub.f32 %v1315_v43, %v1443_v0  ;;  %v1320_v49 = vadd.f32 %v4534_v36, %v4485_v55 }
 0x150   : > { %v1696_v12 = vmax.f32 %v1568_v2, 0.0  ;;  %v1697_v13 = vmax.f32 %v1569_v6, 0.0  ;;  %3451 = vmatmul.msk.f32.gmra.mxu2 %vm644_vm1, %v4477_v41  ;;  %3484 = vmatmul.msk.f32.gmra.mxu3 %vm644_vm1, %v4477_v41  ;;  %v1321_v2 = vadd.f32 %v4534_v36, %v4500_v4  ;;  %v1323_v6 = vadd.f32 %v4562_v24, %v4448_v26 }
 0x151   : > { %v1698_v7 = vmax.f32 %v1570_v9, 0.0  ;;  %v1699_v5 = vmax.f32 %v1571_v10, 0.0 }
 0x152   : > { %v1952_v19 = vmin.f32 %v1824_v62, %v1696_v12  ;;  %v2276_v27 = vmin.f32 %v4516_v33, %v1696_v12  ;;  %v1953_v28 = vmin.f32 %v1825_v63, %v1697_v13  ;;  %v2313_v41 = vmin.f32 %v4518_v34, %v1697_v13 }
 0x153   : > { %v1954_v30 = vmin.f32 %v1826_v14, %v1698_v7  ;;  %v4564_v31 = vmin.f32 %v2202_v48, %v1698_v7  ;;  %v1955_v37 = vmin.f32 %v1827_v18, %v1699_v5  ;;  %v4566_v35 = vmin.f32 %v2239_v50, %v1699_v5  ;;  %v1103_v38 = vpop.f32.mrf.mxu2  ;;  %v1216_v39 = vpop.f32.mrf.mxu3  ;;  %v4576_v50 = vld [vmem:[%s3870_s13 + $0xb0] sm:$0xff] }
 0x154   : > { %2080 = vst [vmem:[#allocation2 + $0x330] sm:$0xff] %v1952_v19  ;;  %v1444_v15 = vmul.f32 2.0, %v1103_v38  ;;  %v1445_v21 = vmul.f32 2.0, %v1216_v39  ;;  %v880_v1 = vpop.f32.mrf.mxu0  ;;  %v993_v42 = vpop.f32.mrf.mxu1  ;;  %v708_v33 = vsel %vm644_vm1, %v633_v23, 0.0  ;;  %v634_v60 = vmul.f32 %v4576_v50, %v4576_v50  ;;  %v4604_v38 = vld [vmem:[%s3870_s13 + $0xb8] sm:$0xff] }
 0x155   : > { %2081 = vst [vmem:[#allocation2 + $0x48] sm:$0xff] %v1953_v28  ;;  %v1446_v34 = vmul.f32 2.0, %v880_v1  ;;  %v1447_v43 = vmul.f32 2.0, %v993_v42  ;;  %709 = vadd.xlane.f32.xlu0 %v708_v33  ;;  %v662_v28 = vpop.xlane.xlu2 %661  ;;  %v1835_v1 = vld [vmem:[#allocation2 + $0x388] sm:$0xff]  ;;  %v1325_v42 = vadd.f32 %v4562_v24, %v4500_v4  ;;  %v635_v33 = vmul.f32 %v4604_v38, %v4604_v38 }
 0x156   : > { %2082 = vst [vmem:[#allocation2 + $0x380] sm:$0xff] %v1954_v30  ;;  %v1572_v44 = vsub.f32 %v1316_v25, %v1444_v15  ;;  %v1573_v40 = vsub.f32 %v1317_v8, %v1445_v21  ;;  %3386 = vmatmul.msk.f32.gmra.mxu0 %vm644_vm1, %v4488_v59  ;;  %3419 = vmatmul.msk.f32.gmra.mxu1 %vm644_vm1, %v4488_v59  ;;  %v711_v5 = vsel %vm644_vm1, %v634_v60, 0.0  ;;  %v1833_v30 = vld [vmem:[#allocation2 + $0x60] sm:$0xff] }
 0x157   : > { %2083 = vst [vmem:[#allocation2 + $0x110] sm:$0xff] %v1955_v37  ;;  %v1574_v47 = vsub.f32 %v1318_v11, %v1446_v34  ;;  %v1575_v48 = vsub.f32 %v1319_v22, %v1447_v43  ;;  %712 = vadd.xlane.f32.xlu1 %v711_v5  ;;  %v1834_v21 = vld [vmem:[#allocation2 + $0x2e0] sm:$0xff] }
 0x158   : > { %v1700_v52 = vmax.f32 %v1572_v44, 0.0  ;;  %v1701_v53 = vmax.f32 %v1573_v40, 0.0  ;;  %3452 = vmatmul.msk.f32.gmra.mxu2 %vm644_vm1, %v4488_v59  ;;  %3485 = vmatmul.msk.f32.gmra.mxu3 %vm644_vm1, %v4488_v59  ;;  %v1326_v44 = vadd.f32 %v662_v28, %v4446_v17  ;;  %v1327_v40 = vadd.f32 %v662_v28, %v4448_v26 }
 0x159   : > { %v1702_v61 = vmax.f32 %v1574_v47, 0.0  ;;  %v1703_v0 = vmax.f32 %v1575_v48, 0.0 }
 0x15a   : > { %v1956_v62 = vmin.f32 %v1828_v45, %v1700_v52  ;;  %v4590_v63 = vmin.f32 %v2276_v27, %v1700_v52  ;;  %v1957_v9 = vmin.f32 %v1829_v46, %v1701_v53  ;;  %v4592_v10 = vmin.f32 %v2313_v41, %v1701_v53  ;;  %v1832_v41 = vld [vmem:[#allocation2 + $0x108] sm:$0xff] }
 0x15b   : > { %v1958_v59 = vmin.f32 %v1830_v16, %v1702_v61  ;;  %v2204_v11 = vmin.f32 %v4564_v31, %v1702_v61  ;;  %v1959_v12 = vmin.f32 %v1831_v54, %v1703_v0  ;;  %v2241_v13 = vmin.f32 %v4566_v35, %v1703_v0  ;;  %v1106_v14 = vpop.f32.mrf.mxu2  ;;  %v1219_v18 = vpop.f32.mrf.mxu3 }
 0x15c   : > { %2084 = vst [vmem:[#allocation2 + $0x118] sm:$0xff] %v1956_v62  ;;  %v1448_v22 = vmul.f32 2.0, %v1106_v14  ;;  %v1449_v36 = vmul.f32 2.0, %v1219_v18  ;;  %v883_v23 = vpop.f32.mrf.mxu0  ;;  %v996_v7 = vpop.f32.mrf.mxu1  ;;  %v1324_v35 = vadd.f32 %v4562_v24, %v4485_v55  ;;  %v714_v0 = vsel %vm644_vm1, %v635_v33, 0.0  ;;  %v4629_v14 = vld [vmem:[%s3870_s13 + $0xc0] sm:$0xff] }
 0x15d   : > { %2085 = vst [vmem:[#allocation2 + $0x98] sm:$0xff] %v1957_v9  ;;  %v1450_v25 = vmul.f32 2.0, %v883_v23  ;;  %v1451_v8 = vmul.f32 2.0, %v996_v7  ;;  %715 = vadd.xlane.f32.xlu2 %v714_v0  ;;  %v665_v9 = vpop.xlane.xlu0 %664  ;;  %v1839_v23 = vld [vmem:[#allocation2 + $0x1a8] sm:$0xff]  ;;  %v1329_v7 = vadd.f32 %v662_v28, %v4500_v4  ;;  %v636_v5 = vmul.f32 %v4629_v14, %v4629_v14 }
 0x15e   : > { %2086 = vst [vmem:[#allocation2 + $0x320] sm:$0xff] %v1958_v59  ;;  %v1576_v19 = vsub.f32 %v1320_v49, %v1448_v22  ;;  %v1577_v27 = vsub.f32 %v1321_v2, %v1449_v36  ;;  %3387 = vmatmul.msk.f32.gmra.mxu0 %vm644_vm1, %v4514_v32  ;;  %3420 = vmatmul.msk.f32.gmra.mxu1 %vm644_vm1, %v4514_v32  ;;  %v1837_v59 = vld [vmem:[#allocation2 + $0x340] sm:$0xff] }
 0x15f   : > { %2087 = vst [vmem:[#allocation2 + $0x150] sm:$0xff] %v1959_v12  ;;  %v1578_v31 = vsub.f32 %v1322_v57, %v1450_v25  ;;  %v1579_v37 = vsub.f32 %v1323_v6, %v1451_v8  ;;  %v1838_v36 = vld [vmem:[#allocation2 + $0x80] sm:$0xff] }
 0x160   : > { %v1704_v39 = vmax.f32 %v1576_v19, 0.0  ;;  %v1705_v15 = vmax.f32 %v1577_v27, 0.0  ;;  %3453 = vmatmul.msk.f32.gmra.mxu2 %vm644_vm1, %v4514_v32  ;;  %3486 = vmatmul.msk.f32.gmra.mxu3 %vm644_vm1, %v4514_v32  ;;  %v1330_v19 = vadd.f32 %v665_v9, %v4446_v17  ;;  %v1331_v27 = vadd.f32 %v665_v9, %v4448_v26 }
 0x161   : > { %v1706_v34 = vmax.f32 %v1578_v31, 0.0  ;;  %v1707_v43 = vmax.f32 %v1579_v37, 0.0 }
 0x162   : > { %v1960_v45 = vmin.f32 %v1832_v41, %v1704_v39  ;;  %v2278_v46 = vmin.f32 %v4590_v63, %v1704_v39  ;;  %v1961_v47 = vmin.f32 %v1833_v30, %v1705_v15  ;;  %v2315_v48 = vmin.f32 %v4592_v10, %v1705_v15  ;;  %v1836_v10 = vld [vmem:[#allocation2 + $0x338] sm:$0xff] }
 0x163   : > { %v1962_v49 = vmin.f32 %v1834_v21, %v1706_v34  ;;  %v4618_v32 = vmin.f32 %v2204_v11, %v1706_v34  ;;  %v1963_v52 = vmin.f32 %v1835_v1, %v1707_v43  ;;  %v4620_v24 = vmin.f32 %v2241_v13, %v1707_v43  ;;  %v1109_v53 = vpop.f32.mrf.mxu2  ;;  %v1222_v16 = vpop.f32.mrf.mxu3 }
 0x164   : > { %2088 = vst [vmem:[#allocation2 + $0x108] sm:$0xff] %v1960_v45  ;;  %v1452_v54 = vmul.f32 2.0, %v1109_v53  ;;  %v1453_v57 = vmul.f32 2.0, %v1222_v16  ;;  %v886_v60 = vpop.f32.mrf.mxu0  ;;  %v999_v61 = vpop.f32.mrf.mxu1  ;;  %v1328_v13 = vadd.f32 %v662_v28, %v4485_v55  ;;  %v717_v43 = vsel %vm644_vm1, %v636_v5, 0.0  ;;  %v4653_v53 = vld [vmem:[%s3870_s13 + $0xc8] sm:$0xff] }
 0x165   : > { %2089 = vst [vmem:[#allocation2 + $0x60] sm:$0xff] %v1961_v47  ;;  %v1454_v2 = vmul.f32 2.0, %v886_v60  ;;  %v1455_v6 = vmul.f32 2.0, %v999_v61  ;;  %718 = vadd.xlane.f32.xlu0 %v717_v43  ;;  %v668_v47 = vpop.xlane.xlu1 %667  ;;  %v1843_v60 = vld [vmem:[#allocation2 + $0x2f8] sm:$0xff]  ;;  %v1333_v61 = vadd.f32 %v665_v9, %v4500_v4  ;;  %v637_v0 = vmul.f32 %v4653_v53, %v4653_v53 }
 0x166   : > { %2090 = vst [vmem:[#allocation2 + $0x2e0] sm:$0xff] %v1962_v49  ;;  %v1580_v62 = vsub.f32 %v1324_v35, %v1452_v54  ;;  %v1581_v63 = vsub.f32 %v1325_v42, %v1453_v57  ;;  %3388 = vmatmul.msk.f32.gmra.mxu0 %vm644_vm1, %v4546_v3  ;;  %3421 = vmatmul.msk.f32.gmra.mxu1 %vm644_vm1, %v4546_v3  ;;  %v1841_v49 = vld [vmem:[#allocation2 + $0x168] sm:$0xff] }
 0x167   : > { %2091 = vst [vmem:[#allocation2 + $0x388] sm:$0xff] %v1963_v52  ;;  %v1582_v11 = vsub.f32 %v1326_v44, %v1454_v2  ;;  %v1583_v12 = vsub.f32 %v1327_v40, %v1455_v6  ;;  %v1842_v57 = vld [vmem:[#allocation2 + $0x3e8] sm:$0xff] }
 0x168   : > { %v1708_v18 = vmax.f32 %v1580_v62, 0.0  ;;  %v1709_v22 = vmax.f32 %v1581_v63, 0.0  ;;  %3454 = vmatmul.msk.f32.gmra.mxu2 %vm644_vm1, %v4546_v3  ;;  %3487 = vmatmul.msk.f32.gmra.mxu3 %vm644_vm1, %v4546_v3  ;;  %v1334_v62 = vadd.f32 %v668_v47, %v4446_v17  ;;  %v1335_v63 = vadd.f32 %v668_v47, %v4448_v26 }
 0x169   : > { %v1710_v25 = vmax.f32 %v1582_v11, 0.0  ;;  %v1711_v8 = vmax.f32 %v1583_v12, 0.0 }
 0x16a   : > { %v1964_v41 = vmin.f32 %v1836_v10, %v1708_v18  ;;  %v4640_v30 = vmin.f32 %v2278_v46, %v1708_v18  ;;  %v1965_v31 = vmin.f32 %v1837_v59, %v1709_v22  ;;  %v4642_v37 = vmin.f32 %v2315_v48, %v1709_v22  ;;  %v1840_v48 = vld [vmem:[#allocation2 + $0x1b8] sm:$0xff] }
 0x16b   : > { %v1966_v35 = vmin.f32 %v1838_v36, %v1710_v25  ;;  %v2206_v3 = vmin.f32 %v4618_v32, %v1710_v25  ;;  %v1967_v39 = vmin.f32 %v1839_v23, %v1711_v8  ;;  %v2243_v28 = vmin.f32 %v4620_v24, %v1711_v8  ;;  %v1112_v15 = vpop.f32.mrf.mxu2  ;;  %v1225_v21 = vpop.f32.mrf.mxu3 }
 0x16c   : > { %2092 = vst [vmem:[#allocation2 + $0x338] sm:$0xff] %v1964_v41  ;;  %v1456_v1 = vmul.f32 2.0, %v1112_v15  ;;  %v1457_v42 = vmul.f32 2.0, %v1225_v21  ;;  %v889_v33 = vpop.f32.mrf.mxu0  ;;  %v1002_v34 = vpop.f32.mrf.mxu1  ;;  %v1332_v24 = vadd.f32 %v665_v9, %v4485_v55  ;;  %v720_v8 = vsel %vm644_vm1, %v637_v0, 0.0  ;;  %v4677_v15 = vld [vmem:[%s3870_s13 + $0xd0] sm:$0xff] }
 0x16d   : > { %2093 = vst [vmem:[#allocation2 + $0x340] sm:$0xff] %v1965_v31  ;;  %v1458_v44 = vmul.f32 2.0, %v889_v33  ;;  %v1459_v40 = vmul.f32 2.0, %v1002_v34  ;;  %721 = vadd.xlane.f32.xlu1 %v720_v8  ;;  %v671_v31 = vpop.xlane.xlu2 %670  ;;  %v1847_v33 = vld [vmem:[#allocation2 + $0xc0] sm:$0xff]  ;;  %v1337_v34 = vadd.f32 %v668_v47, %v4500_v4  ;;  %v638_v43 = vmul.f32 %v4677_v15, %v4677_v15 }
 0x16e   : > { %2094 = vst [vmem:[#allocation2 + $0x80] sm:$0xff] %v1966_v35  ;;  %v1584_v45 = vsub.f32 %v1328_v13, %v1456_v1  ;;  %v1585_v46 = vsub.f32 %v1329_v7, %v1457_v42  ;;  %3389 = vmatmul.msk.f32.gmra.mxu0 %vm644_vm1, %v4576_v50  ;;  %3422 = vmatmul.msk.f32.gmra.mxu1 %vm644_vm1, %v4576_v50  ;;  %v1845_v35 = vld [vmem:[#allocation2 + $0x28] sm:$0xff]  ;;  %v1846_v42 = vld [vmem:[#allocation2 + $0x138] sm:$0xff] }
 0x16f   : > { %2095 = vst [vmem:[#allocation2 + $0x1a8] sm:$0xff] %v1967_v39  ;;  %v1586_v32 = vsub.f32 %v1330_v19, %v1458_v44  ;;  %v1587_v52 = vsub.f32 %v1331_v27, %v1459_v40 }
 0x170   : > { %v1712_v16 = vmax.f32 %v1584_v45, 0.0  ;;  %v1713_v54 = vmax.f32 %v1585_v46, 0.0  ;;  %3455 = vmatmul.msk.f32.gmra.mxu2 %vm644_vm1, %v4576_v50  ;;  %3488 = vmatmul.msk.f32.gmra.mxu3 %vm644_vm1, %v4576_v50  ;;  %v1338_v45 = vadd.f32 %v671_v31, %v4446_v17  ;;  %v1339_v46 = vadd.f32 %v671_v31, %v4448_v26 }
 0x171   : > { %v1714_v2 = vmax.f32 %v1586_v32, 0.0  ;;  %v1715_v6 = vmax.f32 %v1587_v52, 0.0 }
 0x172   : > { %v1968_v10 = vmin.f32 %v1840_v48, %v1712_v16  ;;  %v2280_v59 = vmin.f32 %v4640_v30, %v1712_v16  ;;  %v1969_v11 = vmin.f32 %v1841_v49, %v1713_v54  ;;  %v2317_v12 = vmin.f32 %v4642_v37, %v1713_v54  ;;  %v1844_v37 = vld [vmem:[#allocation2 + $0x290] sm:$0xff] }
 0x173   : > { %v1970_v13 = vmin.f32 %v1842_v57, %v1714_v2  ;;  %v4666_v18 = vmin.f32 %v2206_v3, %v1714_v2  ;;  %v1971_v50 = vmin.f32 %v1843_v60, %v1715_v6  ;;  %v4668_v9 = vmin.f32 %v2243_v28, %v1715_v6  ;;  %v1115_v22 = vpop.f32.mrf.mxu2  ;;  %v1228_v36 = vpop.f32.mrf.mxu3 }
 0x174   : > { %2096 = vst [vmem:[#allocation2 + $0x1b8] sm:$0xff] %v1968_v10  ;;  %v1460_v23 = vmul.f32 2.0, %v1115_v22  ;;  %v1461_v7 = vmul.f32 2.0, %v1228_v36  ;;  %v892_v5 = vpop.f32.mrf.mxu0  ;;  %v1005_v25 = vpop.f32.mrf.mxu1  ;;  %v1336_v28 = vadd.f32 %v668_v47, %v4485_v55  ;;  %v723_v6 = vsel %vm644_vm1, %v638_v43, 0.0  ;;  %v4701_v22 = vld [vmem:[%s3870_s13 + $0xd8] sm:$0xff] }
 0x175   : > { %2097 = vst [vmem:[#allocation2 + $0x168] sm:$0xff] %v1969_v11  ;;  %v1462_v19 = vmul.f32 2.0, %v892_v5  ;;  %v1463_v27 = vmul.f32 2.0, %v1005_v25  ;;  %724 = vadd.xlane.f32.xlu2 %v723_v6  ;;  %v674_v11 = vpop.xlane.xlu0 %673  ;;  %v1851_v5 = vld [vmem:[#allocation2 + $0x3c0] sm:$0xff]  ;;  %v1341_v25 = vadd.f32 %v671_v31, %v4500_v4  ;;  %v639_v8 = vmul.f32 %v4701_v22, %v4701_v22 }
 0x176   : > { %2098 = vst [vmem:[#allocation2 + $0x3e8] sm:$0xff] %v1970_v13  ;;  %v1588_v41 = vsub.f32 %v1332_v24, %v1460_v23  ;;  %v1589_v30 = vsub.f32 %v1333_v61, %v1461_v7  ;;  %3390 = vmatmul.msk.f32.gmra.mxu0 %vm644_vm1, %v4604_v38  ;;  %3423 = vmatmul.msk.f32.gmra.mxu1 %vm644_vm1, %v4604_v38  ;;  %v1849_v13 = vld [vmem:[#allocation2 + $0x280] sm:$0xff] }
 0x177   : > { %2099 = vst [vmem:[#allocation2 + $0x2f8] sm:$0xff] %v1971_v50  ;;  %v1590_v3 = vsub.f32 %v1334_v62, %v1462_v19  ;;  %v1591_v39 = vsub.f32 %v1335_v63, %v1463_v27  ;;  %v1850_v7 = vld [vmem:[#allocation2 + $0x100] sm:$0xff] }
 0x178   : > { %v1716_v21 = vmax.f32 %v1588_v41, 0.0  ;;  %v1717_v1 = vmax.f32 %v1589_v30, 0.0  ;;  %3456 = vmatmul.msk.f32.gmra.mxu2 %vm644_vm1, %v4604_v38  ;;  %3489 = vmatmul.msk.f32.gmra.mxu3 %vm644_vm1, %v4604_v38  ;;  %v1342_v41 = vadd.f32 %v674_v11, %v4446_v17  ;;  %v1343_v30 = vadd.f32 %v674_v11, %v4448_v26 }
 0x179   : > { %v1718_v44 = vmax.f32 %v1590_v3, 0.0  ;;  %v1719_v40 = vmax.f32 %v1591_v39, 0.0 }
 0x17a   : > { %v1972_v48 = vmin.f32 %v1844_v37, %v1716_v21  ;;  %v4688_v49 = vmin.f32 %v2280_v59, %v1716_v21  ;;  %v1973_v32 = vmin.f32 %v1845_v35, %v1717_v1  ;;  %v4690_v52 = vmin.f32 %v2317_v12, %v1717_v1  ;;  %v1848_v12 = vld [vmem:[#allocation2 + $0x1c0] sm:$0xff] }
 0x17b   : > { %v1974_v24 = vmin.f32 %v1846_v42, %v1718_v44  ;;  %v2208_v38 = vmin.f32 %v4666_v18, %v1718_v44  ;;  %v1975_v16 = vmin.f32 %v1847_v33, %v1719_v40  ;;  %v2245_v47 = vmin.f32 %v4668_v9, %v1719_v40  ;;  %v1118_v54 = vpop.f32.mrf.mxu2  ;;  %v1231_v57 = vpop.f32.mrf.mxu3 }
 0x17c   : > { %2100 = vst [vmem:[#allocation2 + $0x290] sm:$0xff] %v1972_v48  ;;  %v1464_v60 = vmul.f32 2.0, %v1118_v54  ;;  %v1465_v61 = vmul.f32 2.0, %v1231_v57  ;;  %v895_v0 = vpop.f32.mrf.mxu0  ;;  %v1008_v2 = vpop.f32.mrf.mxu1  ;;  %v1340_v9 = vadd.f32 %v671_v31, %v4485_v55  ;;  %v726_v40 = vsel %vm644_vm1, %v639_v8, 0.0  ;;  %v4725_v54 = vld [vmem:[%s3870_s13 + $0xe0] sm:$0xff] }
 0x17d   : > { %2101 = vst [vmem:[#allocation2 + $0x28] sm:$0xff] %v1973_v32  ;;  %v1466_v62 = vmul.f32 2.0, %v895_v0  ;;  %v1467_v63 = vmul.f32 2.0, %v1008_v2  ;;  %727 = vadd.xlane.f32.xlu0 %v726_v40  ;;  %v677_v32 = vpop.xlane.xlu1 %676  ;;  %v1855_v0 = vld [vmem:[#allocation2 + $0x3f8] sm:$0xff]  ;;  %v1345_v2 = vadd.f32 %v674_v11, %v4500_v4  ;;  %v640_v6 = vmul.f32 %v4725_v54, %v4725_v54 }
 0x17e   : > { %2102 = vst [vmem:[#allocation2 + $0x138] sm:$0xff] %v1974_v24  ;;  %v1592_v10 = vsub.f32 %v1336_v28, %v1464_v60  ;;  %v1593_v59 = vsub.f32 %v1337_v34, %v1465_v61  ;;  %3391 = vmatmul.msk.f32.gmra.mxu0 %vm644_vm1, %v4629_v14  ;;  %3424 = vmatmul.msk.f32.gmra.mxu1 %vm644_vm1, %v4629_v14  ;;  %v1853_v24 = vld [vmem:[#allocation2 + $0x3e0] sm:$0xff]  ;;  %v1854_v61 = vld [vmem:[#allocation2 + $0x218] sm:$0xff] }
 0x17f   : > { %2103 = vst [vmem:[#allocation2 + $0xc0] sm:$0xff] %v1975_v16  ;;  %v1594_v18 = vsub.f32 %v1338_v45, %v1466_v62  ;;  %v1595_v50 = vsub.f32 %v1339_v46, %v1467_v63 }
 0x180   : > { %v1720_v36 = vmax.f32 %v1592_v10, 0.0  ;;  %v1721_v23 = vmax.f32 %v1593_v59, 0.0  ;;  %3457 = vmatmul.msk.f32.gmra.mxu2 %vm644_vm1, %v4629_v14  ;;  %3490 = vmatmul.msk.f32.gmra.mxu3 %vm644_vm1, %v4629_v14  ;;  %v1346_v10 = vadd.f32 %v677_v32, %v4446_v17  ;;  %v1347_v59 = vadd.f32 %v677_v32, %v4448_v26 }
 0x181   : > { %v1722_v19 = vmax.f32 %v1594_v18, 0.0  ;;  %v1723_v27 = vmax.f32 %v1595_v50, 0.0 }
 0x182   : > { %v1976_v37 = vmin.f32 %v1848_v12, %v1720_v36  ;;  %v2282_v35 = vmin.f32 %v4688_v49, %v1720_v36  ;;  %v1977_v3 = vmin.f32 %v1849_v13, %v1721_v23  ;;  %v2319_v39 = vmin.f32 %v4690_v52, %v1721_v23  ;;  %v1852_v52 = vld [vmem:[#allocation2 + $0x158] sm:$0xff] }
 0x183   : > { %v1978_v28 = vmin.f32 %v1850_v7, %v1722_v19  ;;  %v4714_v21 = vmin.f32 %v2208_v38, %v1722_v19  ;;  %v1979_v14 = vmin.f32 %v1851_v5, %v1723_v27  ;;  %v4716_v31 = vmin.f32 %v2245_v47, %v1723_v27  ;;  %v1121_v1 = vpop.f32.mrf.mxu2  ;;  %v1234_v42 = vpop.f32.mrf.mxu3 }
 0x184   : > { %2104 = vst [vmem:[#allocation2 + $0x1c0] sm:$0xff] %v1976_v37  ;;  %v1468_v33 = vmul.f32 2.0, %v1121_v1  ;;  %v1469_v34 = vmul.f32 2.0, %v1234_v42  ;;  %v898_v43 = vpop.f32.mrf.mxu0  ;;  %v1011_v44 = vpop.f32.mrf.mxu1  ;;  %v1344_v47 = vadd.f32 %v674_v11, %v4485_v55  ;;  %v729_v27 = vsel %vm644_vm1, %v640_v6, 0.0  ;;  %v4749_v1 = vld [vmem:[%s3870_s13 + $0xe8] sm:$0xff] }
 0x185   : > { %2105 = vst [vmem:[#allocation2 + $0x280] sm:$0xff] %v1977_v3  ;;  %v1470_v45 = vmul.f32 2.0, %v898_v43  ;;  %v1471_v46 = vmul.f32 2.0, %v1011_v44  ;;  %730 = vadd.xlane.f32.xlu1 %v729_v27  ;;  %v680_v3 = vpop.xlane.xlu2 %679  ;;  %v1859_v43 = vld [vmem:[#allocation2 + $0x3f0] sm:$0xff]  ;;  %v1349_v44 = vadd.f32 %v677_v32, %v4500_v4  ;;  %v641_v40 = vmul.f32 %v4749_v1, %v4749_v1  ;;  %v4782_v27 = vld [vmem:[%s3870_s13 + $0xf0] sm:$0xff] }
 0x186   : > { %2106 = vst [vmem:[#allocation2 + $0x100] sm:$0xff] %v1978_v28  ;;  %v1596_v48 = vsub.f32 %v1340_v9, %v1468_v33  ;;  %v1597_v49 = vsub.f32 %v1341_v25, %v1469_v34  ;;  %3392 = vmatmul.msk.f32.gmra.mxu0 %vm644_vm1, %v4653_v53  ;;  %3425 = vmatmul.msk.f32.gmra.mxu1 %vm644_vm1, %v4653_v53  ;;  %v1857_v28 = vld [vmem:[#allocation2 + $0x128] sm:$0xff]  ;;  %v1858_v34 = vld [vmem:[#allocation2 + $0x2a0] sm:$0xff] }
 0x187   : > { %2107 = vst [vmem:[#allocation2 + $0x3c0] sm:$0xff] %v1979_v14  ;;  %v1598_v38 = vsub.f32 %v1342_v41, %v1470_v45  ;;  %v1599_v16 = vsub.f32 %v1343_v30, %v1471_v46 }
 0x188   : > { %v1724_v57 = vmax.f32 %v1596_v48, 0.0  ;;  %v1725_v60 = vmax.f32 %v1597_v49, 0.0  ;;  %3458 = vmatmul.msk.f32.gmra.mxu2 %vm644_vm1, %v4653_v53  ;;  %3491 = vmatmul.msk.f32.gmra.mxu3 %vm644_vm1, %v4653_v53  ;;  %v1350_v48 = vadd.f32 %v680_v3, %v4446_v17  ;;  %v1351_v49 = vadd.f32 %v680_v3, %v4448_v26 }
 0x189   : > { %v1726_v62 = vmax.f32 %v1598_v38, 0.0  ;;  %v1727_v63 = vmax.f32 %v1599_v16, 0.0 }
 0x18a   : > { %v1980_v12 = vmin.f32 %v1852_v52, %v1724_v57  ;;  %v4736_v13 = vmin.f32 %v2282_v35, %v1724_v57  ;;  %v1981_v18 = vmin.f32 %v1853_v24, %v1725_v60  ;;  %v4738_v50 = vmin.f32 %v2319_v39, %v1725_v60  ;;  %v1856_v39 = vld [vmem:[#allocation2 + $0x8] sm:$0xff] }
 0x18b   : > { %v1982_v9 = vmin.f32 %v1854_v61, %v1726_v62  ;;  %v2210_v53 = vmin.f32 %v4714_v21, %v1726_v62  ;;  %v1983_v36 = vmin.f32 %v1855_v0, %v1727_v63  ;;  %v2247_v11 = vmin.f32 %v4716_v31, %v1727_v63  ;;  %v1124_v23 = vpop.f32.mrf.mxu2  ;;  %v1237_v7 = vpop.f32.mrf.mxu3 }
 0x18c   : > { %2108 = vst [vmem:[#allocation2 + $0x158] sm:$0xff] %v1980_v12  ;;  %v1472_v5 = vmul.f32 2.0, %v1124_v23  ;;  %v1473_v25 = vmul.f32 2.0, %v1237_v7  ;;  %v901_v8 = vpop.f32.mrf.mxu0  ;;  %v1014_v19 = vpop.f32.mrf.mxu1  ;;  %v1348_v31 = vadd.f32 %v677_v32, %v4485_v55  ;;  %v732_v63 = vsel %vm644_vm1, %v641_v40, 0.0 }
 0x18d   : > { %2109 = vst [vmem:[#allocation2 + $0x3e0] sm:$0xff] %v1981_v18  ;;  %v1474_v41 = vmul.f32 2.0, %v901_v8  ;;  %v1475_v30 = vmul.f32 2.0, %v1014_v19  ;;  %v4767_v12 = vpop.xlane.xlu0 %682  ;;  %733 = vadd.xlane.f32.xlu2 %v732_v63  ;;  %v1353_v8 = vadd.f32 %v680_v3, %v4500_v4 }
 0x18e   : > { %2110 = vst [vmem:[#allocation2 + $0x218] sm:$0xff] %v1982_v9  ;;  %v1600_v37 = vsub.f32 %v1344_v47, %v1472_v5  ;;  %v1601_v35 = vsub.f32 %v1345_v2, %v1473_v25  ;;  %3393 = vmatmul.msk.f32.gmra.mxu0 %vm644_vm1, %v4677_v15  ;;  %3426 = vmatmul.msk.f32.gmra.mxu1 %vm644_vm1, %v4677_v15  ;;  %v1861_v9 = vld [vmem:[#allocation2 + $0x2c0] sm:$0xff]  ;;  %v1862_v5 = vld [vmem:[#allocation2 + $0xb0] sm:$0xff] }
 0x18f   : > { %2111 = vst [vmem:[#allocation2 + $0x3f8] sm:$0xff] %v1983_v36  ;;  %v1602_v21 = vsub.f32 %v1346_v10, %v1474_v41  ;;  %v1603_v14 = vsub.f32 %v1347_v59, %v1475_v30  ;;  %v1863_v25 = vld [vmem:[#allocation2 + $0x1e0] sm:$0xff]  ;;  %v1354_v19 = vadd.f32 %v4767_v12, %v4446_v17 }
 0x190   : > { %v1728_v42 = vmax.f32 %v1600_v37, 0.0  ;;  %v1729_v33 = vmax.f32 %v1601_v35, 0.0  ;;  %3459 = vmatmul.msk.f32.gmra.mxu2 %vm644_vm1, %v4677_v15  ;;  %3492 = vmatmul.msk.f32.gmra.mxu3 %vm644_vm1, %v4677_v15  ;;  %v1355_v37 = vadd.f32 %v4767_v12, %v4448_v26  ;;  %v642_v35 = vmul.f32 %v4782_v27, %v4782_v27 }
 0x191   : > { %v1730_v45 = vmax.f32 %v1602_v21, 0.0  ;;  %v1731_v46 = vmax.f32 %v1603_v14, 0.0 }
 0x192   : > { %v1984_v52 = vmin.f32 %v1856_v39, %v1728_v42  ;;  %v2284_v24 = vmin.f32 %v4736_v13, %v1728_v42  ;;  %v1985_v38 = vmin.f32 %v1857_v28, %v1729_v33  ;;  %v2321_v16 = vmin.f32 %v4738_v50, %v1729_v33  ;;  %v1860_v50 = vld [vmem:[#allocation2 + $0xa0] sm:$0xff] }
 0x193   : > { %v1986_v47 = vmin.f32 %v1858_v34, %v1730_v45  ;;  %v4762_v57 = vmin.f32 %v2210_v53, %v1730_v45  ;;  %v1987_v15 = vmin.f32 %v1859_v43, %v1731_v46  ;;  %v4764_v32 = vmin.f32 %v2247_v11, %v1731_v46  ;;  %v1127_v60 = vpop.f32.mrf.mxu2  ;;  %v1240_v61 = vpop.f32.mrf.mxu3 }
 0x194   : > { %2112 = vst [vmem:[#allocation2 + $0x8] sm:$0xff] %v1984_v52  ;;  %v1476_v0 = vmul.f32 2.0, %v1127_v60  ;;  %v1477_v2 = vmul.f32 2.0, %v1240_v61  ;;  %v904_v6 = vpop.f32.mrf.mxu0  ;;  %v1017_v62 = vpop.f32.mrf.mxu1  ;;  %v1352_v11 = vadd.f32 %v680_v3, %v4485_v55  ;;  %v4802_v60 = vld [vmem:[%s3870_s13 + $0xf8] sm:$0xff]  ;;  %s5724_s13 = sadd.s32 (!%p3498_p11), 1, %s4082_s30 }
 0x195   : > { %2113 = vst [vmem:[#allocation2 + $0x128] sm:$0xff] %v1985_v38  ;;  %v1478_v10 = vmul.f32 2.0, %v904_v6  ;;  %v1479_v59 = vmul.f32 2.0, %v1017_v62  ;;  %v686_v38 = vpop.xlane.xlu1 %685  ;;  %v1867_v6 = vld [vmem:[#allocation2 + $0x240] sm:$0xff]  ;;  %v1357_v62 = vadd.f32 %v4767_v12, %v4500_v4  ;;  %v643_v63 = vmul.f32 %v4802_v60, %v4802_v60  ;;  %s2430_s10 = sld [smem:[#allocation5 + %s5724_s13]] (!%p3498_p11)  ;;  %s5730_s13 = sadd.s32 (!%p3498_p11), 7, %s4082_s30 }
 0x196   : > { %2114 = vst [vmem:[#allocation2 + $0x2a0] sm:$0xff] %v1986_v47  ;;  %v1604_v13 = vsub.f32 %v1348_v31, %v1476_v0  ;;  %v1605_v18 = vsub.f32 %v1349_v44, %v1477_v2  ;;  %3394 = vmatmul.msk.f32.gmra.mxu0 %vm644_vm1, %v4701_v22  ;;  %3427 = vmatmul.msk.f32.gmra.mxu1 %vm644_vm1, %v4701_v22  ;;  %v1865_v47 = vld [vmem:[#allocation2 + $0x10] sm:$0xff]  ;;  %s2454_s25 = sld [smem:[#allocation5 + %s5730_s13]] (!%p3498_p11) }
 0x197   : > { %2115 = vst [vmem:[#allocation2 + $0x3f0] sm:$0xff] %v1987_v15  ;;  %v1606_v53 = vsub.f32 %v1350_v48, %v1478_v10  ;;  %v1607_v36 = vsub.f32 %v1351_v49, %v1479_v59  ;;  %v735_v49 = vsel %vm644_vm1, %v642_v35, 0.0  ;;  %v1866_v2 = vld [vmem:[#allocation2 + $0x230] sm:$0xff] }
 0x198   : > { %v1732_v23 = vmax.f32 %v1604_v13, 0.0  ;;  %v1733_v7 = vmax.f32 %v1605_v18, 0.0  ;;  %3460 = vmatmul.msk.f32.gmra.mxu2 %vm644_vm1, %v4701_v22  ;;  %3493 = vmatmul.msk.f32.gmra.mxu3 %vm644_vm1, %v4701_v22  ;;  %v1358_v13 = vadd.f32 %v686_v38, %v4446_v17  ;;  %v1359_v18 = vadd.f32 %v686_v38, %v4448_v26 }
 0x199   : > { %v1734_v41 = vmax.f32 %v1606_v53, 0.0  ;;  %v1735_v30 = vmax.f32 %v1607_v36, 0.0  ;;  %736 = vadd.xlane.f32.xlu0 %v735_v49 }
 0x19a   : > { %v1988_v39 = vmin.f32 %v1860_v50, %v1732_v23  ;;  %v4788_v28 = vmin.f32 %v2284_v24, %v1732_v23  ;;  %v1989_v21 = vmin.f32 %v1861_v9, %v1733_v7  ;;  %v4790_v22 = vmin.f32 %v2321_v16, %v1733_v7  ;;  %v1864_v16 = vld [vmem:[#allocation2 + $0x1f0] sm:$0xff] }
 0x19b   : > { %v1990_v3 = vmin.f32 %v1862_v5, %v1734_v41  ;;  %v2212_v14 = vmin.f32 %v4762_v57, %v1734_v41  ;;  %v1991_v31 = vmin.f32 %v1863_v25, %v1735_v30  ;;  %v2249_v42 = vmin.f32 %v4764_v32, %v1735_v30  ;;  %v1130_v33 = vpop.f32.mrf.mxu2  ;;  %v1243_v34 = vpop.f32.mrf.mxu3  ;;  %p2431_p13 = scmp.gt.s32.totalorder (!%p3498_p11), %s2430_s10, 0 }
 0x19c   : > { %2116 = vst [vmem:[#allocation2 + $0xa0] sm:$0xff] %v1988_v39  ;;  %v1480_v43 = vmul.f32 2.0, %v1130_v33  ;;  %v1481_v44 = vmul.f32 2.0, %v1243_v34  ;;  %v907_v40 = vpop.f32.mrf.mxu0  ;;  %v1020_v45 = vpop.f32.mrf.mxu1  ;;  %v1356_v32 = vadd.f32 %v4767_v12, %v4485_v55  ;;  %v738_v30 = vsel %vm644_vm1, %v643_v63, 0.0  ;;  %v1870_v34 = vld [vmem:[#allocation2 + $0x208] sm:$0xff]  ;;  %p2455_p6 = scmp.gt.s32.totalorder (!%p3498_p11), %s2454_s25, 0 }
 0x19d   : > { %2117 = vst [vmem:[#allocation2 + $0x2c0] sm:$0xff] %v1989_v21  ;;  %v1482_v46 = vmul.f32 2.0, %v907_v40  ;;  %v1483_v48 = vmul.f32 2.0, %v1020_v45  ;;  %739 = vadd.xlane.f32.xlu1 %v738_v30  ;;  %v689_v21 = vpop.xlane.xlu2 %688  ;;  %v1361_v40 = vadd.f32 %v686_v38, %v4500_v4 }
 0x19e   : > { %2118 = vst [vmem:[#allocation2 + $0xb0] sm:$0xff] %v1990_v3  ;;  %v1608_v52 = vsub.f32 %v1352_v11, %v1480_v43  ;;  %v1609_v24 = vsub.f32 %v1353_v8, %v1481_v44  ;;  %3395 = vmatmul.msk.f32.gmra.mxu0 %vm644_vm1, %v4725_v54  ;;  %3428 = vmatmul.msk.f32.gmra.mxu1 %vm644_vm1, %v4725_v54  ;;  %v1869_v3 = vld [vmem:[#allocation2 + $0x3a0] sm:$0xff]  ;;  %v1871_v43 = vld [vmem:[#allocation2 + $0xd0] sm:$0xff] }
 0x19f   : > { %2119 = vst [vmem:[#allocation2 + $0x1e0] sm:$0xff] %v1991_v31  ;;  %v1610_v57 = vsub.f32 %v1354_v19, %v1482_v46  ;;  %v1611_v15 = vsub.f32 %v1355_v37, %v1483_v48  ;;  %v1360_v44 = vadd.f32 %v686_v38, %v4485_v55  ;;  %v1362_v48 = vadd.f32 %v689_v21, %v4446_v17 }
 0x1a0   : > { %v1736_v61 = vmax.f32 %v1608_v52, 0.0  ;;  %v1737_v0 = vmax.f32 %v1609_v24, 0.0  ;;  %3461 = vmatmul.msk.f32.gmra.mxu2 %vm644_vm1, %v4725_v54  ;;  %3494 = vmatmul.msk.f32.gmra.mxu3 %vm644_vm1, %v4725_v54  ;;  %v1363_v49 = vadd.f32 %v689_v21, %v4448_v26 }
 0x1a1   : > { %v1738_v10 = vmax.f32 %v1610_v57, 0.0  ;;  %v1739_v59 = vmax.f32 %v1611_v15, 0.0 }
 0x1a2   : > { %v1992_v50 = vmin.f32 %v1864_v16, %v1736_v61  ;;  %v2286_v9 = vmin.f32 %v4788_v28, %v1736_v61  ;;  %v1993_v53 = vmin.f32 %v1865_v47, %v1737_v0  ;;  %v2323_v36 = vmin.f32 %v4790_v22, %v1737_v0  ;;  %v1868_v22 = vld [vmem:[#allocation2 + $0x90] sm:$0xff] }
 0x1a3   : > { %v1994_v11 = vmin.f32 %v1866_v2, %v1738_v10  ;;  %v4816_v54 = vmin.f32 %v2212_v14, %v1738_v10  ;;  %v1995_v23 = vmin.f32 %v1867_v6, %v1739_v59  ;;  %v4818_v12 = vmin.f32 %v2249_v42, %v1739_v59  ;;  %v1133_v7 = vpop.f32.mrf.mxu2  ;;  %v1246_v5 = vpop.f32.mrf.mxu3 }
 0x1a4   : > { %2120 = vst [vmem:[#allocation2 + $0x1f0] sm:$0xff] %v1992_v50  ;;  %v1484_v25 = vmul.f32 2.0, %v1133_v7  ;;  %v1485_v8 = vmul.f32 2.0, %v1246_v5  ;;  %v910_v19 = vpop.f32.mrf.mxu0  ;;  %v1023_v41 = vpop.f32.mrf.mxu1  ;;  %v1872_v50 = vld [vmem:[#allocation2 + $0x88] sm:$0xff]  ;;  %v1364_v7 = vadd.f32 %v689_v21, %v4485_v55  ;;  %v1365_v5 = vadd.f32 %v689_v21, %v4500_v4 }
 0x1a5   : > { %2121 = vst [vmem:[#allocation2 + $0x10] sm:$0xff] %v1993_v53  ;;  %v1486_v37 = vmul.f32 2.0, %v910_v19  ;;  %v1487_v35 = vmul.f32 2.0, %v1023_v41 }
 0x1a6   : > { %2122 = vst [vmem:[#allocation2 + $0x230] sm:$0xff] %v1994_v11  ;;  %v1612_v39 = vsub.f32 %v1356_v32, %v1484_v25  ;;  %v1613_v28 = vsub.f32 %v1357_v62, %v1485_v8  ;;  %3396 = vmatmul.msk.f32.gmra.mxu0 %vm644_vm1, %v4749_v1  ;;  %3429 = vmatmul.msk.f32.gmra.mxu1 %vm644_vm1, %v4749_v1 }
 0x1a7   : > { %2123 = vst [vmem:[#allocation2 + $0x240] sm:$0xff] %v1995_v23  ;;  %v1614_v14 = vsub.f32 %v1358_v13, %v1486_v37  ;;  %v1615_v31 = vsub.f32 %v1359_v18, %v1487_v35  ;;  %v692_v18 = vpop.xlane.xlu0 %691  ;;  %v1874_v23 = vld [vmem:[#allocation2 + $0x358] sm:$0xff] }
 0x1a8   : > { %v1740_v42 = vmax.f32 %v1612_v39, 0.0  ;;  %v1741_v33 = vmax.f32 %v1613_v28, 0.0  ;;  %3462 = vmatmul.msk.f32.gmra.mxu2 %vm644_vm1, %v4749_v1  ;;  %3495 = vmatmul.msk.f32.gmra.mxu3 %vm644_vm1, %v4749_v1  ;;  %v1366_v19 = vadd.f32 %v692_v18, %v4446_v17  ;;  %v1367_v41 = vadd.f32 %v692_v18, %v4448_v26 }
 0x1a9   : > { %v1742_v45 = vmax.f32 %v1614_v14, 0.0  ;;  %v1743_v46 = vmax.f32 %v1615_v31, 0.0 }
 0x1aa   : > { %v1996_v52 = vmin.f32 %v1868_v22, %v1740_v42  ;;  %v4833_v24 = vmin.f32 %v2286_v9, %v1740_v42  ;;  %v1997_v16 = vmin.f32 %v1869_v3, %v1741_v33  ;;  %v4835_v47 = vmin.f32 %v2323_v36, %v1741_v33  ;;  %v1873_v9 = vld [vmem:[#allocation2 + $0x2f0] sm:$0xff] }
 0x1ab   : > { %v1998_v57 = vmin.f32 %v1870_v34, %v1742_v45  ;;  %v2214_v15 = vmin.f32 %v4816_v54, %v1742_v45  ;;  %v1999_v1 = vmin.f32 %v1871_v43, %v1743_v46  ;;  %v2251_v32 = vmin.f32 %v4818_v12, %v1743_v46  ;;  %v1136_v61 = vpop.f32.mrf.mxu2  ;;  %v1249_v38 = vpop.f32.mrf.mxu3  ;;  %v1875_v12 = vld [vmem:[#allocation2 + $0x268] sm:$0xff] }
 0x1ac   : > { %2124 = vst [vmem:[#allocation2 + $0x90] sm:$0xff] %v1996_v52  ;;  %v1488_v0 = vmul.f32 2.0, %v1136_v61  ;;  %v1489_v2 = vmul.f32 2.0, %v1249_v38  ;;  %v913_v6 = vpop.f32.mrf.mxu0  ;;  %v1026_v62 = vpop.f32.mrf.mxu1 }
 0x1ad   : > { %2125 = vst [vmem:[#allocation2 + $0x3a0] sm:$0xff] %v1997_v16  ;;  %v1490_v63 = vmul.f32 2.0, %v913_v6  ;;  %v1491_v10 = vmul.f32 2.0, %v1026_v62  ;;  %v695_v46 = vpop.xlane.xlu1 %694 }
 0x1ae   : > { %2126 = vst [vmem:[#allocation2 + $0x208] sm:$0xff] %v1998_v57  ;;  %v1616_v59 = vsub.f32 %v1360_v44, %v1488_v0  ;;  %v1617_v13 = vsub.f32 %v1361_v40, %v1489_v2  ;;  %3397 = vmatmul.msk.f32.gmra.mxu0 %vm644_vm1, %v4782_v27  ;;  %3430 = vmatmul.msk.f32.gmra.mxu1 %vm644_vm1, %v4782_v27  ;;  %v1878_v57 = vld [vmem:[#allocation2 + $0x1d8] sm:$0xff] }
 0x1af   : > { %2127 = vst [vmem:[#allocation2 + $0xd0] sm:$0xff] %v1999_v1  ;;  %v1618_v53 = vsub.f32 %v1362_v48, %v1490_v63  ;;  %v1619_v36 = vsub.f32 %v1363_v49, %v1491_v10  ;;  %v1876_v48 = vld [vmem:[#allocation2 + $0x350] sm:$0xff]  ;;  %v1877_v49 = vld [vmem:[#allocation2 + $0x188] sm:$0xff]  ;;  %v1368_v1 = vadd.f32 %v692_v18, %v4485_v55  ;;  %v1370_v0 = vadd.f32 %v695_v46, %v4446_v17 }
 0x1b0   : > { %v1744_v11 = vmax.f32 %v1616_v59, 0.0  ;;  %v1745_v54 = vmax.f32 %v1617_v13, 0.0  ;;  %3463 = vmatmul.msk.f32.gmra.mxu2 %vm644_vm1, %v4782_v27  ;;  %3496 = vmatmul.msk.f32.gmra.mxu3 %vm644_vm1, %v4782_v27  ;;  %v1371_v2 = vadd.f32 %v695_v46, %v4448_v26 }
 0x1b1   : > { %v1746_v25 = vmax.f32 %v1618_v53, 0.0  ;;  %v1747_v8 = vmax.f32 %v1619_v36, 0.0 }
 0x1b2   : > { %v2000_v30 = vmin.f32 %v1872_v50, %v1744_v11  ;;  %v2288_v37 = vmin.f32 %v4833_v24, %v1744_v11  ;;  %v2001_v35 = vmin.f32 %v1873_v9, %v1745_v54  ;;  %v2325_v39 = vmin.f32 %v4835_v47, %v1745_v54 }
 0x1b3   : > { %v2002_v28 = vmin.f32 %v1874_v23, %v1746_v25  ;;  %v4853_v22 = vmin.f32 %v2214_v15, %v1746_v25  ;;  %v2003_v27 = vmin.f32 %v1875_v12, %v1747_v8  ;;  %v4855_v3 = vmin.f32 %v2251_v32, %v1747_v8  ;;  %v1139_v14 = vpop.f32.mrf.mxu2  ;;  %v1252_v21 = vpop.f32.mrf.mxu3  ;;  %v1879_v15 = vld [vmem:[#allocation2 + $0x30] sm:$0xff]  ;;  %v1880_v8 = vld [vmem:[#allocation2 + $0x140] sm:$0xff] }
 0x1b4   : > { %2128 = vst [vmem:[#allocation2 + $0x88] sm:$0xff] %v2000_v30  ;;  %v1492_v31 = vmul.f32 2.0, %v1139_v14  ;;  %v1493_v42 = vmul.f32 2.0, %v1252_v21  ;;  %v916_v33 = vpop.f32.mrf.mxu0  ;;  %v1029_v34 = vpop.f32.mrf.mxu1  ;;  %v1369_v32 = vadd.f32 %v692_v18, %v4500_v4 }
 0x1b5   : > { %2129 = vst [vmem:[#allocation2 + $0x2f0] sm:$0xff] %v2001_v35  ;;  %v1494_v43 = vmul.f32 2.0, %v916_v33  ;;  %v1495_v44 = vmul.f32 2.0, %v1029_v34  ;;  %v698_v25 = vpop.xlane.xlu2 %697 }
 0x1b6   : > { %2130 = vst [vmem:[#allocation2 + $0x358] sm:$0xff] %v2002_v28  ;;  %v1620_v40 = vsub.f32 %v1364_v7, %v1492_v31  ;;  %v1621_v45 = vsub.f32 %v1365_v5, %v1493_v42  ;;  %3398 = vmatmul.msk.f32.gmra.mxu0 %vm644_vm1, %v4802_v60  ;;  %3431 = vmatmul.msk.f32.gmra.mxu1 %vm644_vm1, %v4802_v60  ;;  %v1883_v28 = vld [vmem:[#allocation2 + $0x200] sm:$0xff] }
 0x1b7   : > { %2131 = vst [vmem:[#allocation2 + $0x268] sm:$0xff] %v2003_v27  ;;  %v1622_v52 = vsub.f32 %v1366_v19, %v1494_v43  ;;  %v1623_v24 = vsub.f32 %v1367_v41, %v1495_v44  ;;  %v1881_v19 = vld [vmem:[#allocation2 + $0x2a8] sm:$0xff]  ;;  %v1373_v27 = vadd.f32 %v695_v46, %v4500_v4  ;;  %v1374_v21 = vadd.f32 %v698_v25, %v4446_v17 }
 0x1b8   : > { %v1748_v16 = vmax.f32 %v1620_v40, 0.0  ;;  %v1749_v47 = vmax.f32 %v1621_v45, 0.0  ;;  %3464 = vmatmul.msk.f32.gmra.mxu2 %vm644_vm1, %v4802_v60  ;;  %3497 = vmatmul.msk.f32.gmra.mxu3 %vm644_vm1, %v4802_v60  ;;  %v1375_v31 = vadd.f32 %v698_v25, %v4448_v26 }
 0x1b9   : > { %v1750_v61 = vmax.f32 %v1622_v52, 0.0  ;;  %v1751_v38 = vmax.f32 %v1623_v24, 0.0 }
 0x1ba   : > { %v2004_v6 = vmin.f32 %v1876_v48, %v1748_v16  ;;  %v4869_v62 = vmin.f32 %v2288_v37, %v1748_v16  ;;  %v2005_v63 = vmin.f32 %v1877_v49, %v1749_v47  ;;  %v4871_v10 = vmin.f32 %v2325_v39, %v1749_v47  ;;  %v1882_v39 = vld [vmem:[#allocation2 + $0x130] sm:$0xff] }
 0x1bb   : > { %v2006_v59 = vmin.f32 %v1878_v57, %v1750_v61  ;;  %v2216_v13 = vmin.f32 %v4853_v22, %v1750_v61  ;;  %v2007_v60 = vmin.f32 %v1879_v15, %v1751_v38  ;;  %v2253_v50 = vmin.f32 %v4855_v3, %v1751_v38  ;;  %v1142_v9 = vpop.f32.mrf.mxu2  ;;  %v1255_v18 = vpop.f32.mrf.mxu3  ;;  %v1884_v38 = vld [vmem:[#allocation2 + $0x318] sm:$0xff] }
 0x1bc   : > { %2132 = vst [vmem:[#allocation2 + $0x350] sm:$0xff] %v2004_v6  ;;  %v1496_v53 = vmul.f32 2.0, %v1142_v9  ;;  %v1497_v36 = vmul.f32 2.0, %v1255_v18  ;;  %v919_v11 = vpop.f32.mrf.mxu0  ;;  %v1032_v54 = vpop.f32.mrf.mxu1  ;;  %v1372_v22 = vadd.f32 %v695_v46, %v4485_v55 }
 0x1bd   : > { %2133 = vst [vmem:[#allocation2 + $0x188] sm:$0xff] %v2005_v63  ;;  %v1498_v23 = vmul.f32 2.0, %v919_v11  ;;  %v1499_v12 = vmul.f32 2.0, %v1032_v54  ;;  %v701_v61 = vpop.xlane.xlu0 %700 }
 0x1be   : > { %2134 = vst [vmem:[#allocation2 + $0x1d8] sm:$0xff] %v2006_v59  ;;  %v1624_v7 = vsub.f32 %v1368_v1, %v1496_v53  ;;  %v1625_v5 = vsub.f32 %v1369_v32, %v1497_v36  ;;  %v1887_v59 = vld [vmem:[#allocation2 + $0x300] sm:$0xff]  ;;  %v1378_v18 = vadd.f32 %v701_v61, %v4446_v17  ;;  %v1379_v53 = vadd.f32 %v701_v61, %v4448_v26 }
 0x1bf   : > { %2135 = vst [vmem:[#allocation2 + $0x30] sm:$0xff] %v2007_v60  ;;  %v1626_v41 = vsub.f32 %v1370_v0, %v1498_v23  ;;  %v1627_v30 = vsub.f32 %v1371_v2, %v1499_v12  ;;  %v1885_v0 = vld [vmem:[#allocation2 + $0x220] sm:$0xff]  ;;  %v1377_v60 = vadd.f32 %v698_v25, %v4500_v4 }
 0x1c0   : > { %v1752_v37 = vmax.f32 %v1624_v7, 0.0  ;;  %v1753_v35 = vmax.f32 %v1625_v5, 0.0 }
 0x1c1   : > { %v1754_v3 = vmax.f32 %v1626_v41, 0.0  ;;  %v1755_v14 = vmax.f32 %v1627_v30, 0.0 }
 0x1c2   : > { %v2008_v42 = vmin.f32 %v1880_v8, %v1752_v37  ;;  %v2290_v33 = vmin.f32 %v4869_v62, %v1752_v37  ;;  %v2009_v34 = vmin.f32 %v1881_v19, %v1753_v35  ;;  %v2327_v43 = vmin.f32 %v4871_v10, %v1753_v35  ;;  %v1886_v10 = vld [vmem:[#allocation2 + $0x70] sm:$0xff] }
 0x1c3   : > { %v2010_v44 = vmin.f32 %v1882_v39, %v1754_v3  ;;  %v4881_v40 = vmin.f32 %v2216_v13, %v1754_v3  ;;  %v2011_v45 = vmin.f32 %v1883_v28, %v1755_v14  ;;  %v4883_v48 = vmin.f32 %v2253_v50, %v1755_v14  ;;  %v1145_v49 = vpop.f32.mrf.mxu2  ;;  %v1258_v46 = vpop.f32.mrf.mxu3  ;;  %v1888_v14 = vld [vmem:[#allocation2 + $0xe0] sm:$0xff] }
 0x1c4   : > { %2136 = vst [vmem:[#allocation2 + $0x140] sm:$0xff] %v2008_v42  ;;  %v1500_v52 = vmul.f32 2.0, %v1145_v49  ;;  %v1501_v24 = vmul.f32 2.0, %v1258_v46  ;;  %v922_v16 = vpop.f32.mrf.mxu0  ;;  %v1035_v47 = vpop.f32.mrf.mxu1  ;;  %v1376_v13 = vadd.f32 %v698_v25, %v4485_v55 }
 0x1c5   : > { %2137 = vst [vmem:[#allocation2 + $0x2a8] sm:$0xff] %v2009_v34  ;;  %v1502_v57 = vmul.f32 2.0, %v922_v16  ;;  %v1503_v15 = vmul.f32 2.0, %v1035_v47  ;;  %v704_v3 = vpop.xlane.xlu1 %703 }
 0x1c6   : > { %2138 = vst [vmem:[#allocation2 + $0x130] sm:$0xff] %v2010_v44  ;;  %v1628_v1 = vsub.f32 %v1372_v22, %v1500_v52  ;;  %v1629_v32 = vsub.f32 %v1373_v27, %v1501_v24  ;;  %v1891_v44 = vld [vmem:[#allocation2 + $0x260] sm:$0xff]  ;;  %v1382_v46 = vadd.f32 %v704_v3, %v4446_v17  ;;  %v1383_v52 = vadd.f32 %v704_v3, %v4448_v26 }
 0x1c7   : > { %2139 = vst [vmem:[#allocation2 + $0x200] sm:$0xff] %v2011_v45  ;;  %v1630_v2 = vsub.f32 %v1374_v21, %v1502_v57  ;;  %v1631_v6 = vsub.f32 %v1375_v31, %v1503_v15  ;;  %v1889_v21 = vld [vmem:[#allocation2 + $0x178] sm:$0xff]  ;;  %v1381_v45 = vadd.f32 %v701_v61, %v4500_v4 }
 0x1c8   : > { %v1756_v62 = vmax.f32 %v1628_v1, 0.0  ;;  %v1757_v63 = vmax.f32 %v1629_v32, 0.0 }
 0x1c9   : > { %v1758_v50 = vmax.f32 %v1630_v2, 0.0  ;;  %v1759_v9 = vmax.f32 %v1631_v6, 0.0 }
 0x1ca   : > { %v2012_v36 = vmin.f32 %v1884_v38, %v1756_v62  ;;  %v4889_v11 = vmin.f32 %v2290_v33, %v1756_v62  ;;  %v2013_v54 = vmin.f32 %v1885_v0, %v1757_v63  ;;  %v4891_v23 = vmin.f32 %v2327_v43, %v1757_v63  ;;  %v1890_v43 = vld [vmem:[#allocation2 + $0x328] sm:$0xff] }
 0x1cb   : > { %v2014_v12 = vmin.f32 %v1886_v10, %v1758_v50  ;;  %v2218_v7 = vmin.f32 %v4881_v40, %v1758_v50  ;;  %v2015_v5 = vmin.f32 %v1887_v59, %v1759_v9  ;;  %v2255_v8 = vmin.f32 %v4883_v48, %v1759_v9  ;;  %v1148_v19 = vpop.f32.mrf.mxu2  ;;  %v1261_v25 = vpop.f32.mrf.mxu3  ;;  %v1892_v9 = vld [vmem:[#allocation2 + $0x3b8] sm:$0xff] }
 0x1cc   : > { %2140 = vst [vmem:[#allocation2 + $0x318] sm:$0xff] %v2012_v36  ;;  %v1504_v41 = vmul.f32 2.0, %v1148_v19  ;;  %v1505_v30 = vmul.f32 2.0, %v1261_v25  ;;  %v925_v37 = vpop.f32.mrf.mxu0  ;;  %v1038_v35 = vpop.f32.mrf.mxu1  ;;  %v1380_v40 = vadd.f32 %v701_v61, %v4485_v55 }
 0x1cd   : > { %2141 = vst [vmem:[#allocation2 + $0x220] sm:$0xff] %v2013_v54  ;;  %v1506_v39 = vmul.f32 2.0, %v925_v37  ;;  %v1507_v28 = vmul.f32 2.0, %v1038_v35  ;;  %v707_v50 = vpop.xlane.xlu2 %706 }
 0x1ce   : > { %2142 = vst [vmem:[#allocation2 + $0x70] sm:$0xff] %v2014_v12  ;;  %v1632_v22 = vsub.f32 %v1376_v13, %v1504_v41  ;;  %v1633_v27 = vsub.f32 %v1377_v60, %v1505_v30  ;;  %v1895_v12 = vld [vmem:[#allocation2 + $0x40] sm:$0xff]  ;;  %v1386_v25 = vadd.f32 %v707_v50, %v4446_v17  ;;  %v1387_v41 = vadd.f32 %v707_v50, %v4448_v26 }
 0x1cf   : > { %2143 = vst [vmem:[#allocation2 + $0x300] sm:$0xff] %v2015_v5  ;;  %v1634_v31 = vsub.f32 %v1378_v18, %v1506_v39  ;;  %v1635_v42 = vsub.f32 %v1379_v53, %v1507_v28  ;;  %v1893_v18 = vld [vmem:[#allocation2 + $0x2b8] sm:$0xff]  ;;  %v1385_v5 = vadd.f32 %v704_v3, %v4500_v4 }
 0x1d0   : > { %v1760_v33 = vmax.f32 %v1632_v22, 0.0  ;;  %v1761_v34 = vmax.f32 %v1633_v27, 0.0 }
 0x1d1   : > { %v1762_v48 = vmax.f32 %v1634_v31, 0.0  ;;  %v1763_v49 = vmax.f32 %v1635_v42, 0.0 }
 0x1d2   : > { %v2016_v24 = vmin.f32 %v1888_v14, %v1760_v33  ;;  %v2292_v16 = vmin.f32 %v4889_v11, %v1760_v33  ;;  %v2017_v47 = vmin.f32 %v1889_v21, %v1761_v34  ;;  %v2329_v57 = vmin.f32 %v4891_v23, %v1761_v34  ;;  %v1894_v23 = vld [vmem:[#allocation2 + $0x248] sm:$0xff] }
 0x1d3   : > { %v2018_v15 = vmin.f32 %v1890_v43, %v1762_v48  ;;  %v4901_v1 = vmin.f32 %v2218_v7, %v1762_v48  ;;  %v2019_v32 = vmin.f32 %v1891_v44, %v1763_v49  ;;  %v4903_v38 = vmin.f32 %v2255_v8, %v1763_v49  ;;  %v1151_v0 = vpop.f32.mrf.mxu2  ;;  %v1264_v61 = vpop.f32.mrf.mxu3  ;;  %v1896_v49 = vld [vmem:[#allocation2 + $0x20] sm:$0xff] }
 0x1d4   : > { %2144 = vst [vmem:[#allocation2 + $0xe0] sm:$0xff] %v2016_v24  ;;  %v1508_v2 = vmul.f32 2.0, %v1151_v0  ;;  %v1509_v6 = vmul.f32 2.0, %v1264_v61  ;;  %v928_v62 = vpop.f32.mrf.mxu0  ;;  %v1041_v63 = vpop.f32.mrf.mxu1  ;;  %v1384_v7 = vadd.f32 %v704_v3, %v4485_v55 }
 0x1d5   : > { %2145 = vst [vmem:[#allocation2 + $0x178] sm:$0xff] %v2017_v47  ;;  %v1510_v10 = vmul.f32 2.0, %v928_v62  ;;  %v1511_v59 = vmul.f32 2.0, %v1041_v63  ;;  %v710_v48 = vpop.xlane.xlu0 %709 }
 0x1d6   : > { %2146 = vst [vmem:[#allocation2 + $0x328] sm:$0xff] %v2018_v15  ;;  %v1636_v13 = vsub.f32 %v1380_v40, %v1508_v2  ;;  %v1637_v60 = vsub.f32 %v1381_v45, %v1509_v6  ;;  %v1899_v15 = vld [vmem:[#allocation2 + $0x3a8] sm:$0xff]  ;;  %v1390_v61 = vadd.f32 %v710_v48, %v4446_v17  ;;  %v1391_v2 = vadd.f32 %v710_v48, %v4448_v26 }
 0x1d7   : > { %2147 = vst [vmem:[#allocation2 + $0x260] sm:$0xff] %v2019_v32  ;;  %v1638_v53 = vsub.f32 %v1382_v46, %v1510_v10  ;;  %v1639_v36 = vsub.f32 %v1383_v52, %v1511_v59  ;;  %v1897_v46 = vld [vmem:[#allocation2 + $0xe8] sm:$0xff]  ;;  %v1389_v32 = vadd.f32 %v707_v50, %v4500_v4 }
 0x1d8   : > { %v1764_v11 = vmax.f32 %v1636_v13, 0.0  ;;  %v1765_v54 = vmax.f32 %v1637_v60, 0.0 }
 0x1d9   : > { %v1766_v8 = vmax.f32 %v1638_v53, 0.0  ;;  %v1767_v19 = vmax.f32 %v1639_v36, 0.0 }
 0x1da   : > { %v2020_v30 = vmin.f32 %v1892_v9, %v1764_v11  ;;  %v4909_v37 = vmin.f32 %v2292_v16, %v1764_v11  ;;  %v2021_v35 = vmin.f32 %v1893_v18, %v1765_v54  ;;  %v4911_v39 = vmin.f32 %v2329_v57, %v1765_v54  ;;  %v1898_v57 = vld [vmem:[#allocation2 + $0x288] sm:$0xff] }
 0x1db   : > { %v2022_v28 = vmin.f32 %v1894_v23, %v1766_v8  ;;  %v2220_v22 = vmin.f32 %v4901_v1, %v1766_v8  ;;  %v2023_v27 = vmin.f32 %v1895_v12, %v1767_v19  ;;  %v2257_v14 = vmin.f32 %v4903_v38, %v1767_v19  ;;  %v1154_v21 = vpop.f32.mrf.mxu2  ;;  %v1267_v3 = vpop.f32.mrf.mxu3  ;;  %v1900_v19 = vld [vmem:[#allocation2 + $0x3c8] sm:$0xff] }
 0x1dc   : > { %2148 = vst [vmem:[#allocation2 + $0x3b8] sm:$0xff] %v2020_v30  ;;  %v1512_v31 = vmul.f32 2.0, %v1154_v21  ;;  %v1513_v42 = vmul.f32 2.0, %v1267_v3  ;;  %v931_v33 = vpop.f32.mrf.mxu0  ;;  %v1044_v34 = vpop.f32.mrf.mxu1  ;;  %v1388_v1 = vadd.f32 %v707_v50, %v4485_v55 }
 0x1dd   : > { %2149 = vst [vmem:[#allocation2 + $0x2b8] sm:$0xff] %v2021_v35  ;;  %v1514_v43 = vmul.f32 2.0, %v931_v33  ;;  %v1515_v44 = vmul.f32 2.0, %v1044_v34  ;;  %v713_v8 = vpop.xlane.xlu1 %712 }
 0x1de   : > { %2150 = vst [vmem:[#allocation2 + $0x248] sm:$0xff] %v2022_v28  ;;  %v1640_v40 = vsub.f32 %v1384_v7, %v1512_v31  ;;  %v1641_v45 = vsub.f32 %v1385_v5, %v1513_v42  ;;  %v1903_v28 = vld [vmem:[#allocation2 + $0x210] sm:$0xff]  ;;  %v1394_v3 = vadd.f32 %v713_v8, %v4446_v17  ;;  %v1395_v31 = vadd.f32 %v713_v8, %v4448_v26 }
 0x1df   : > { %2151 = vst [vmem:[#allocation2 + $0x40] sm:$0xff] %v2023_v27  ;;  %v1642_v52 = vsub.f32 %v1386_v25, %v1514_v43  ;;  %v1643_v24 = vsub.f32 %v1387_v41, %v1515_v44  ;;  %v1901_v25 = vld [vmem:[#allocation2 + $0x160] sm:$0xff]  ;;  %v1393_v27 = vadd.f32 %v710_v48, %v4500_v4 }
 0x1e0   : > { %v1768_v16 = vmax.f32 %v1640_v40, 0.0  ;;  %v1769_v47 = vmax.f32 %v1641_v45, 0.0 }
 0x1e1   : > { %v1770_v38 = vmax.f32 %v1642_v52, 0.0  ;;  %v1771_v0 = vmax.f32 %v1643_v24, 0.0 }
 0x1e2   : > { %v2024_v6 = vmin.f32 %v1896_v49, %v1768_v16  ;;  %v2294_v62 = vmin.f32 %v4909_v37, %v1768_v16  ;;  %v2025_v63 = vmin.f32 %v1897_v46, %v1769_v47  ;;  %v2331_v10 = vmin.f32 %v4911_v39, %v1769_v47  ;;  %v1902_v39 = vld [vmem:[#allocation2 + $0x2c8] sm:$0xff] }
 0x1e3   : > { %v2026_v59 = vmin.f32 %v1898_v57, %v1770_v38  ;;  %v4921_v13 = vmin.f32 %v2220_v22, %v1770_v38  ;;  %v2027_v60 = vmin.f32 %v1899_v15, %v1771_v0  ;;  %v4923_v9 = vmin.f32 %v2257_v14, %v1771_v0  ;;  %v1157_v18 = vpop.f32.mrf.mxu2  ;;  %v1270_v50 = vpop.f32.mrf.mxu3  ;;  %v1904_v38 = vld [vmem:[#allocation2 + $0x3d8] sm:$0xff]  ;;  %v1905_v0 = vld [vmem:[#allocation2 + $0x1e8] sm:$0xff] }
 0x1e4   : > { %2152 = vst [vmem:[#allocation2 + $0x20] sm:$0xff] %v2024_v6  ;;  %v1516_v53 = vmul.f32 2.0, %v1157_v18  ;;  %v1517_v36 = vmul.f32 2.0, %v1270_v50  ;;  %v934_v11 = vpop.f32.mrf.mxu0  ;;  %v1047_v54 = vpop.f32.mrf.mxu1  ;;  %v1392_v22 = vadd.f32 %v710_v48, %v4485_v55  ;;  %v1396_v18 = vadd.f32 %v713_v8, %v4485_v55 }
 0x1e5   : > { %2153 = vst [vmem:[#allocation2 + $0xe8] sm:$0xff] %v2025_v63  ;;  %v1518_v23 = vmul.f32 2.0, %v934_v11  ;;  %v1519_v12 = vmul.f32 2.0, %v1047_v54  ;;  %v716_v6 = vpop.xlane.xlu2 %715 }
 0x1e6   : > { %2154 = vst [vmem:[#allocation2 + $0x288] sm:$0xff] %v2026_v59  ;;  %v1644_v7 = vsub.f32 %v1388_v1, %v1516_v53  ;;  %v1645_v5 = vsub.f32 %v1389_v32, %v1517_v36  ;;  %v1907_v59 = vld [vmem:[#allocation2 + $0x1c8] sm:$0xff]  ;;  %v1397_v36 = vadd.f32 %v713_v8, %v4500_v4  ;;  %v1398_v11 = vadd.f32 %v716_v6, %v4446_v17 }
 0x1e7   : > { %2155 = vst [vmem:[#allocation2 + $0x3a8] sm:$0xff] %v2027_v60  ;;  %v1646_v41 = vsub.f32 %v1390_v61, %v1518_v23  ;;  %v1647_v30 = vsub.f32 %v1391_v2, %v1519_v12 }
 0x1e8   : > { %v1772_v37 = vmax.f32 %v1644_v7, 0.0  ;;  %v1773_v35 = vmax.f32 %v1645_v5, 0.0 }
 0x1e9   : > { %v1774_v14 = vmax.f32 %v1646_v41, 0.0  ;;  %v4927_v21 = vmax.f32 %v1647_v30, 0.0 }
 0x1ea   : > { %v2028_v42 = vmin.f32 %v1900_v19, %v1772_v37  ;;  %v4931_v33 = vmin.f32 %v2294_v62, %v1772_v37  ;;  %v2029_v34 = vmin.f32 %v1901_v25, %v1773_v35  ;;  %v4933_v43 = vmin.f32 %v2331_v10, %v1773_v35  ;;  %v1906_v10 = vld [vmem:[#allocation2 + $0x1b0] sm:$0xff] }
 0x1eb   : > { %v2030_v44 = vmin.f32 %v1902_v39, %v1774_v14  ;;  %v2222_v40 = vmin.f32 %v4921_v13, %v1774_v14  ;;  %v2031_v45 = vmin.f32 %v1903_v28, %v4927_v21  ;;  %v2259_v48 = vmin.f32 %v4923_v9, %v4927_v21  ;;  %v1160_v49 = vpop.f32.mrf.mxu2  ;;  %v1273_v46 = vpop.f32.mrf.mxu3 }
 0x1ec   : > { %2156 = vst [vmem:[#allocation2 + $0x3c8] sm:$0xff] %v2028_v42  ;;  %v1520_v52 = vmul.f32 2.0, %v1160_v49  ;;  %v1521_v24 = vmul.f32 2.0, %v1273_v46  ;;  %v937_v16 = vpop.f32.mrf.mxu0  ;;  %v1050_v47 = vpop.f32.mrf.mxu1  ;;  %v1399_v19 = vadd.f32 %v716_v6, %v4448_v26 }
 0x1ed   : > { %2157 = vst [vmem:[#allocation2 + $0x160] sm:$0xff] %v2029_v34  ;;  %v1522_v57 = vmul.f32 2.0, %v937_v16  ;;  %v1523_v15 = vmul.f32 2.0, %v1050_v47  ;;  %v1910_v34 = vld [vmem:[#allocation2 + $0x58] sm:$0xff]  ;;  %v1401_v16 = vadd.f32 %v716_v6, %v4500_v4 }
 0x1ee   : > { %2158 = vst [vmem:[#allocation2 + $0x2c8] sm:$0xff] %v2030_v44  ;;  %v1648_v1 = vsub.f32 %v1392_v22, %v1520_v52  ;;  %v1649_v32 = vsub.f32 %v1393_v27, %v1521_v24  ;;  %v1908_v22 = vld [vmem:[#allocation2 + $0x2d0] sm:$0xff]  ;;  %v1911_v44 = vld [vmem:[#allocation2 + $0x120] sm:$0xff]  ;;  %v1400_v24 = vadd.f32 %v716_v6, %v4485_v55 }
 0x1ef   : > { %2159 = vst [vmem:[#allocation2 + $0x210] sm:$0xff] %v2031_v45  ;;  %v1650_v61 = vsub.f32 %v1394_v3, %v1522_v57  ;;  %v1651_v2 = vsub.f32 %v1395_v31, %v1523_v15  ;;  %v1909_v27 = vld [vmem:[#allocation2 + $0x1d0] sm:$0xff] }
 0x1f0   : > { %v4939_v62 = vmax.f32 %v1648_v1, 0.0  ;;  %v4941_v63 = vmax.f32 %v1649_v32, 0.0 }
 0x1f1   : > { %v1778_v13 = vmax.f32 %v1650_v61, 0.0  ;;  %v4943_v60 = vmax.f32 %v1651_v2, 0.0 }
 0x1f2   : > { %v2032_v50 = vmin.f32 %v1904_v38, %v4939_v62  ;;  %v2033_v53 = vmin.f32 %v1905_v0, %v4941_v63 }
 0x1f3   : > { %v2034_v54 = vmin.f32 %v1906_v10, %v1778_v13  ;;  %v4950_v23 = vmin.f32 %v2222_v40, %v1778_v13  ;;  %v2035_v12 = vmin.f32 %v1907_v59, %v4943_v60  ;;  %v1163_v7 = vpop.f32.mrf.mxu2  ;;  %v1276_v5 = vpop.f32.mrf.mxu3 }
 0x1f4   : > { %2160 = vst [vmem:[#allocation2 + $0x3d8] sm:$0xff] %v2032_v50  ;;  %v1524_v25 = vmul.f32 2.0, %v1163_v7  ;;  %v1525_v41 = vmul.f32 2.0, %v1276_v5  ;;  %v940_v30 = vpop.f32.mrf.mxu0  ;;  %v1053_v37 = vpop.f32.mrf.mxu1  ;;  %v1912_v50 = vld [vmem:[#allocation2 + $0x198] sm:$0xff] }
 0x1f5   : > { %2161 = vst [vmem:[#allocation2 + $0x1e8] sm:$0xff] %v2033_v53  ;;  %v1526_v35 = vmul.f32 2.0, %v940_v30  ;;  %v1527_v39 = vmul.f32 2.0, %v1053_v37  ;;  %v719_v40 = vpop.xlane.xlu0 %718  ;;  %v1913_v53 = vld [vmem:[#allocation2 + $0x2e8] sm:$0xff]  ;;  %v1914_v7 = vld [vmem:[#allocation2 + $0x1f8] sm:$0xff] }
 0x1f6   : > { %2162 = vst [vmem:[#allocation2 + $0x1b0] sm:$0xff] %v2034_v54  ;;  %v1652_v8 = vsub.f32 %v1396_v18, %v1524_v25  ;;  %v1653_v28 = vsub.f32 %v1397_v36, %v1525_v41  ;;  %v1402_v32 = vadd.f32 %v719_v40, %v4446_v17  ;;  %v1403_v38 = vadd.f32 %v719_v40, %v4448_v26  ;;  %v1915_v5 = vld [vmem:[#allocation2 + $0x238] sm:$0xff] }
 0x1f7   : > { %2163 = vst [vmem:[#allocation2 + $0x1c8] sm:$0xff] %v2035_v12  ;;  %v1654_v14 = vsub.f32 %v1398_v11, %v1526_v35  ;;  %v1655_v3 = vsub.f32 %v1399_v19, %v1527_v39  ;;  %v722_v19 = vpop.xlane.xlu1 %721  ;;  %v1404_v35 = vadd.f32 %v719_v40, %v4485_v55  ;;  %v1405_v39 = vadd.f32 %v719_v40, %v4500_v4 }
 0x1f8   : > { %v4954_v31 = vmax.f32 %v1652_v8, 0.0  ;;  %v4956_v42 = vmax.f32 %v1653_v28, 0.0 }
 0x1f9   : > { %v4958_v45 = vmax.f32 %v1654_v14, 0.0  ;;  %v4960_v49 = vmax.f32 %v1655_v3, 0.0  ;;  %v1406_v14 = vadd.f32 %v722_v19, %v4446_v17  ;;  %v1407_v3 = vadd.f32 %v722_v19, %v4448_v26 }
 0x1fa   : > { %v2036_v46 = vmin.f32 %v1908_v22, %v4954_v31  ;;  %v2037_v52 = vmin.f32 %v1909_v27, %v4956_v42 }
 0x1fb   : > { %v2038_v47 = vmin.f32 %v1910_v34, %v4958_v45  ;;  %v2039_v57 = vmin.f32 %v1911_v44, %v4960_v49  ;;  %v1166_v15 = vpop.f32.mrf.mxu2  ;;  %v1279_v1 = vpop.f32.mrf.mxu3  ;;  %v2224_v9 = vmin.f32 %v4950_v23, %v4958_v45 }
 0x1fc   : > { %2164 = vst [vmem:[#allocation2 + $0x2d0] sm:$0xff] %v2036_v46  ;;  %v1528_v0 = vmul.f32 2.0, %v1166_v15  ;;  %v1529_v61 = vmul.f32 2.0, %v1279_v1  ;;  %v943_v2 = vpop.f32.mrf.mxu0  ;;  %v1056_v10 = vpop.f32.mrf.mxu1  ;;  %v1917_v15 = vld [vmem:[#allocation2 + $0x390] sm:$0xff] }
 0x1fd   : > { %2165 = vst [vmem:[#allocation2 + $0x1d0] sm:$0xff] %v2037_v52  ;;  %v1530_v59 = vmul.f32 2.0, %v943_v2  ;;  %v1531_v13 = vmul.f32 2.0, %v1056_v10  ;;  %v1919_v2 = vld [vmem:[#allocation2 + $0xa8] sm:$0xff]  ;;  %v725_v10 = vpop.xlane.xlu2 %724 }
 0x1fe   : > { %2166 = vst [vmem:[#allocation2 + $0x58] sm:$0xff] %v2038_v47  ;;  %v1656_v6 = vsub.f32 %v1400_v24, %v1528_v0  ;;  %v1657_v18 = vsub.f32 %v1401_v16, %v1529_v61  ;;  %v1918_v61 = vld [vmem:[#allocation2 + $0x1a0] sm:$0xff] }
 0x1ff   : > { %2167 = vst [vmem:[#allocation2 + $0x120] sm:$0xff] %v2039_v57  ;;  %v1658_v36 = vsub.f32 %v1402_v32, %v1530_v59  ;;  %v1659_v11 = vsub.f32 %v1403_v38, %v1531_v13  ;;  %v1916_v57 = vld [vmem:[#allocation2 + $0x398] sm:$0xff] }
 0x200   : > { %v4970_v54 = vmax.f32 %v1656_v6, 0.0  ;;  %v4972_v12 = vmax.f32 %v1657_v18, 0.0 }
 0x201   : > { %v4974_v25 = vmax.f32 %v1658_v36, 0.0  ;;  %v4976_v41 = vmax.f32 %v1659_v11, 0.0 }
 0x202   : > { %v2040_v30 = vmin.f32 %v1912_v50, %v4970_v54  ;;  %v2041_v37 = vmin.f32 %v1913_v53, %v4972_v12  ;;  %v1408_v50 = vadd.f32 %v722_v19, %v4485_v55  ;;  %v1409_v53 = vadd.f32 %v722_v19, %v4500_v4 }
 0x203   : > { %v2042_v8 = vmin.f32 %v1914_v7, %v4974_v25  ;;  %v2043_v28 = vmin.f32 %v1915_v5, %v4976_v41  ;;  %v1169_v22 = vpop.f32.mrf.mxu2  ;;  %v1282_v27 = vpop.f32.mrf.mxu3 }
 0x204   : > { %2168 = vst [vmem:[#allocation2 + $0x198] sm:$0xff] %v2040_v30  ;;  %v1532_v34 = vmul.f32 2.0, %v1169_v22  ;;  %v1533_v44 = vmul.f32 2.0, %v1282_v27  ;;  %v946_v46 = vpop.f32.mrf.mxu0  ;;  %v1059_v52 = vpop.f32.mrf.mxu1  ;;  %v1410_v30 = vadd.f32 %v725_v10, %v4446_v17 }
 0x205   : > { %2169 = vst [vmem:[#allocation2 + $0x2e8] sm:$0xff] %v2041_v37  ;;  %v1534_v24 = vmul.f32 2.0, %v946_v46  ;;  %v1535_v16 = vmul.f32 2.0, %v1059_v52  ;;  %v1411_v37 = vadd.f32 %v725_v10, %v4448_v26 }
 0x206   : > { %2170 = vst [vmem:[#allocation2 + $0x1f8] sm:$0xff] %v2042_v8  ;;  %v1660_v40 = vsub.f32 %v1404_v35, %v1532_v34  ;;  %v1661_v47 = vsub.f32 %v1405_v39, %v1533_v44  ;;  %v1921_v34 = vld [vmem:[#allocation2 + $0x2d8] sm:$0xff] }
 0x207   : > { %2171 = vst [vmem:[#allocation2 + $0x238] sm:$0xff] %v2043_v28  ;;  %v1662_v1 = vsub.f32 %v1406_v14, %v1534_v24  ;;  %v1663_v32 = vsub.f32 %v1407_v3, %v1535_v16  ;;  %v1920_v3 = vld [vmem:[#allocation2 + $0x258] sm:$0xff]  ;;  %v1922_v16 = vld [vmem:[#allocation2 + $0xf0] sm:$0xff] }
 0x208   : > { %v4986_v38 = vmax.f32 %v1660_v40, 0.0  ;;  %v4988_v0 = vmax.f32 %v1661_v47, 0.0  ;;  %v1923_v40 = vld [vmem:[#allocation2 + $0x180] sm:$0xff]  ;;  %v728_v47 = vpop.xlane.xlu0 %727 }
 0x209   : > { %v4990_v59 = vmax.f32 %v1662_v1, 0.0  ;;  %v4992_v13 = vmax.f32 %v1663_v32, 0.0 }
 0x20a   : > { %v2044_v6 = vmin.f32 %v1916_v57, %v4986_v38  ;;  %v2045_v18 = vmin.f32 %v1917_v15, %v4988_v0 }
 0x20b   : > { %v2046_v36 = vmin.f32 %v1918_v61, %v4990_v59  ;;  %v2047_v11 = vmin.f32 %v1919_v2, %v4992_v13  ;;  %v1172_v7 = vpop.f32.mrf.mxu2  ;;  %v1285_v5 = vpop.f32.mrf.mxu3  ;;  %v1412_v61 = vadd.f32 %v725_v10, %v4485_v55  ;;  %v1413_v2 = vadd.f32 %v725_v10, %v4500_v4 }
 0x20c   : > { %2172 = vst [vmem:[#allocation2 + $0x398] sm:$0xff] %v2044_v6  ;;  %v1536_v35 = vmul.f32 2.0, %v1172_v7  ;;  %v1537_v39 = vmul.f32 2.0, %v1285_v5  ;;  %v949_v8 = vpop.f32.mrf.mxu0  ;;  %v1062_v28 = vpop.f32.mrf.mxu1 }
 0x20d   : > { %2173 = vst [vmem:[#allocation2 + $0x390] sm:$0xff] %v2045_v18  ;;  %v1538_v22 = vmul.f32 2.0, %v949_v8  ;;  %v1539_v27 = vmul.f32 2.0, %v1062_v28  ;;  %v1924_v28 = vld [vmem:[#allocation2 + $0x170] sm:$0xff] }
 0x20e   : > { %2174 = vst [vmem:[#allocation2 + $0x1a0] sm:$0xff] %v2046_v36  ;;  %v1664_v19 = vsub.f32 %v1408_v50, %v1536_v35  ;;  %v1665_v14 = vsub.f32 %v1409_v53, %v1537_v39  ;;  %v1414_v36 = vadd.f32 %v728_v47, %v4446_v17 }
 0x20f   : > { %2175 = vst [vmem:[#allocation2 + $0xa8] sm:$0xff] %v2047_v11  ;;  %v1666_v44 = vsub.f32 %v1410_v30, %v1538_v22  ;;  %v1667_v46 = vsub.f32 %v1411_v37, %v1539_v27  ;;  %v1415_v11 = vadd.f32 %v728_v47, %v4448_v26  ;;  %v1925_v22 = vld [vmem:[#allocation2 + $0x3d0] sm:$0xff] }
 0x210   : > { %v5002_v52 = vmax.f32 %v1664_v19, 0.0  ;;  %v5004_v24 = vmax.f32 %v1665_v14, 0.0 }
 0x211   : > { %v5006_v57 = vmax.f32 %v1666_v44, 0.0  ;;  %v5008_v15 = vmax.f32 %v1667_v46, 0.0  ;;  %v1927_v44 = vld [vmem:[#allocation2 + $0x378] sm:$0xff]  ;;  %v731_v46 = vpop.xlane.xlu1 %730 }
 0x212   : > { %v2048_v1 = vmin.f32 %v1920_v3, %v5002_v52  ;;  %v2049_v32 = vmin.f32 %v1921_v34, %v5004_v24  ;;  %v1926_v34 = vld [vmem:[#allocation2 + $0x250] sm:$0xff] }
 0x213   : > { %v2050_v6 = vmin.f32 %v1922_v16, %v5006_v57  ;;  %v2051_v18 = vmin.f32 %v1923_v40, %v5008_v15  ;;  %v1175_v50 = vpop.f32.mrf.mxu2  ;;  %v1288_v53 = vpop.f32.mrf.mxu3 }
 0x214   : > { %2176 = vst [vmem:[#allocation2 + $0x258] sm:$0xff] %v2048_v1  ;;  %v1540_v7 = vmul.f32 2.0, %v1175_v50  ;;  %v1541_v5 = vmul.f32 2.0, %v1288_v53  ;;  %v952_v30 = vpop.f32.mrf.mxu0  ;;  %v1065_v37 = vpop.f32.mrf.mxu1 }
 0x215   : > { %2177 = vst [vmem:[#allocation2 + $0x2d8] sm:$0xff] %v2049_v32  ;;  %v1542_v35 = vmul.f32 2.0, %v952_v30  ;;  %v1543_v39 = vmul.f32 2.0, %v1065_v37 }
 0x216   : > { %2178 = vst [vmem:[#allocation2 + $0xf0] sm:$0xff] %v2050_v6  ;;  %v1668_v10 = vsub.f32 %v1412_v61, %v1540_v7  ;;  %v1669_v8 = vsub.f32 %v1413_v2, %v1541_v5  ;;  %v1416_v61 = vadd.f32 %v728_v47, %v4485_v55  ;;  %v1417_v2 = vadd.f32 %v728_v47, %v4500_v4 }
 0x217   : > { %2179 = vst [vmem:[#allocation2 + $0x180] sm:$0xff] %v2051_v18  ;;  %v1670_v27 = vsub.f32 %v1414_v36, %v1542_v35  ;;  %v1671_v19 = vsub.f32 %v1415_v11, %v1543_v39  ;;  %v1418_v36 = vadd.f32 %v731_v46, %v4446_v17  ;;  %v1419_v11 = vadd.f32 %v731_v46, %v4448_v26 }
 0x218   : > { %v5018_v14 = vmax.f32 %v1668_v10, 0.0  ;;  %v5020_v3 = vmax.f32 %v1669_v8, 0.0  ;;  %v1928_v8 = vld [vmem:[#allocation2 + $0xb8] sm:$0xff] }
 0x219   : > { %v5022_v16 = vmax.f32 %v1670_v27, 0.0  ;;  %v5024_v40 = vmax.f32 %v1671_v19, 0.0 }
 0x21a   : > { %v2052_v1 = vmin.f32 %v1924_v28, %v5018_v14  ;;  %v2053_v32 = vmin.f32 %v1925_v22, %v5020_v3  ;;  %v1929_v28 = vld [vmem:[#allocation2 + $0x38] sm:$0xff] }
 0x21b   : > { %v2054_v6 = vmin.f32 %v1926_v34, %v5022_v16  ;;  %v2055_v18 = vmin.f32 %v1927_v44, %v5024_v40  ;;  %v1178_v50 = vpop.f32.mrf.mxu2  ;;  %v1291_v53 = vpop.f32.mrf.mxu3  ;;  %v1930_v44 = vld [vmem:[#allocation2 + $0x78] sm:$0xff] }
 0x21c   : > { %2180 = vst [vmem:[#allocation2 + $0x170] sm:$0xff] %v2052_v1  ;;  %v1544_v7 = vmul.f32 2.0, %v1178_v50  ;;  %v1545_v5 = vmul.f32 2.0, %v1291_v53  ;;  %v955_v30 = vpop.f32.mrf.mxu0  ;;  %v1068_v37 = vpop.f32.mrf.mxu1  ;;  %v1931_v1 = vld [vmem:[#allocation2 + $0x308] sm:$0xff] }
 0x21d   : > { %2181 = vst [vmem:[#allocation2 + $0x3d0] sm:$0xff] %v2053_v32  ;;  %v1546_v35 = vmul.f32 2.0, %v955_v30  ;;  %v1547_v39 = vmul.f32 2.0, %v1068_v37  ;;  %v734_v50 = vpop.xlane.xlu2 %733 }
 0x21e   : > { %2182 = vst [vmem:[#allocation2 + $0x250] sm:$0xff] %v2054_v6  ;;  %v1672_v47 = vsub.f32 %v1416_v61, %v1544_v7  ;;  %v1673_v10 = vsub.f32 %v1417_v2, %v1545_v5  ;;  %v1420_v2 = vadd.f32 %v731_v46, %v4485_v55  ;;  %v1422_v30 = vadd.f32 %v734_v50, %v4446_v17 }
 0x21f   : > { %2183 = vst [vmem:[#allocation2 + $0x378] sm:$0xff] %v2055_v18  ;;  %v1674_v22 = vsub.f32 %v1418_v36, %v1546_v35  ;;  %v1675_v27 = vsub.f32 %v1419_v11, %v1547_v39  ;;  %v1421_v18 = vadd.f32 %v731_v46, %v4500_v4  ;;  %v1423_v37 = vadd.f32 %v734_v50, %v4448_v26 }
 0x220   : > { %v5034_v19 = vmax.f32 %v1672_v47, 0.0  ;;  %v5036_v34 = vmax.f32 %v1673_v10, 0.0  ;;  %v2296_v46 = vmin.f32 %v4931_v33, %v4939_v62 }
 0x221   : > { %v5038_v53 = vmax.f32 %v1674_v22, 0.0  ;;  %v5040_v32 = vmax.f32 %v1675_v27, 0.0  ;;  %v2333_v22 = vmin.f32 %v4933_v43, %v4941_v63  ;;  %v1934_v63 = vld [vmem:[#allocation2 + $0x278] sm:$0xff] }
 0x222   : > { %v2056_v6 = vmin.f32 %v1928_v8, %v5034_v19  ;;  %v2057_v61 = vmin.f32 %v1929_v28, %v5036_v34 }
 0x223   : > { %v2058_v36 = vmin.f32 %v1930_v44, %v5038_v53  ;;  %v2059_v11 = vmin.f32 %v1931_v1, %v5040_v32  ;;  %v1181_v7 = vpop.f32.mrf.mxu2  ;;  %v1294_v5 = vpop.f32.mrf.mxu3  ;;  %v2260_v1 = vmin.f32 %v2259_v48, %v4943_v60  ;;  %v2334_v33 = vmin.f32 %v2333_v22, %v4956_v42 }
 0x224   : > { %2184 = vst [vmem:[#allocation2 + $0xb8] sm:$0xff] %v2056_v6  ;;  %v1548_v35 = vmul.f32 2.0, %v1181_v7  ;;  %v1549_v39 = vmul.f32 2.0, %v1294_v5  ;;  %v958_v47 = vpop.f32.mrf.mxu0  ;;  %v1071_v10 = vpop.f32.mrf.mxu1  ;;  %v1932_v6 = vld [vmem:[#allocation2 + $0x370] sm:$0xff]  ;;  %v1933_v7 = vld [vmem:[#allocation2 + $0xc8] sm:$0xff] }
 0x225   : > { %2185 = vst [vmem:[#allocation2 + $0x38] sm:$0xff] %v2057_v61  ;;  %v1550_v8 = vmul.f32 2.0, %v958_v47  ;;  %v1551_v28 = vmul.f32 2.0, %v1071_v10  ;;  %v2297_v47 = vmin.f32 %v2296_v46, %v4954_v31  ;;  %v2261_v21 = vmin.f32 %v2260_v1, %v4960_v49 }
 0x226   : > { %2186 = vst [vmem:[#allocation2 + $0x78] sm:$0xff] %v2058_v36  ;;  %v1676_v27 = vsub.f32 %v1420_v2, %v1548_v35  ;;  %v1677_v44 = vsub.f32 %v1421_v18, %v1549_v39  ;;  %v1935_v2 = vld [vmem:[#allocation2 + $0x360] sm:$0xff]  ;;  %v737_v18 = vpop.xlane.xlu0 %736  ;;  %v1424_v36 = vadd.f32 %v734_v50, %v4485_v55  ;;  %v2225_v39 = vmin.f32 %v2224_v9, %v4974_v25 }
 0x227   : > { %2187 = vst [vmem:[#allocation2 + $0x308] sm:$0xff] %v2059_v11  ;;  %v1678_v61 = vsub.f32 %v1422_v30, %v1550_v8  ;;  %v1679_v5 = vsub.f32 %v1423_v37, %v1551_v28  ;;  %v1425_v11 = vadd.f32 %v734_v50, %v4500_v4  ;;  %v1426_v45 = vadd.f32 %v737_v18, %v4446_v17 }
 0x228   : > { %v5060_v62 = vmax.f32 %v1676_v27, 0.0  ;;  %v5062_v43 = vmax.f32 %v1677_v44, 0.0  ;;  %v1427_v49 = vadd.f32 %v737_v18, %v4448_v26  ;;  %v2262_v10 = vmin.f32 %v2261_v21, %v4976_v41  ;;  %v1938_v21 = vld [vmem:[#allocation2 + $0x148] sm:$0xff] }
 0x229   : > { %v5067_v48 = vmax.f32 %v1678_v61, 0.0  ;;  %v5069_v60 = vmax.f32 %v1679_v5, 0.0  ;;  %v2298_v50 = vmin.f32 %v2297_v47, %v4970_v54  ;;  %v2335_v27 = vmin.f32 %v2334_v33, %v4972_v12  ;;  %v740_v12 = vpop.xlane.xlu1 %739 }
 0x22a   : > { %v2060_v31 = vmin.f32 %v1932_v6, %v5060_v62  ;;  %v2061_v42 = vmin.f32 %v1933_v7, %v5062_v43  ;;  %v2226_v6 = vmin.f32 %v2225_v39, %v4990_v59  ;;  %v2263_v7 = vmin.f32 %v2262_v10, %v4992_v13 }
 0x22b   : > { %v2062_v30 = vmin.f32 %v1934_v63, %v5067_v48  ;;  %v2063_v37 = vmin.f32 %v1935_v2, %v5069_v60  ;;  %v1184_v35 = vpop.f32.mrf.mxu2  ;;  %v1297_v23 = vpop.f32.mrf.mxu3  ;;  %v2299_v41 = vmin.f32 %v2298_v50, %v4986_v38  ;;  %v2336_v5 = vmin.f32 %v2335_v27, %v4988_v0  ;;  %v1936_v63 = vld [vmem:[#allocation2 + $0x228] sm:$0xff] }
 0x22c   : > { %2188 = vst [vmem:[#allocation2 + $0x370] sm:$0xff] %v2060_v31  ;;  %v1552_v8 = vmul.f32 2.0, %v1184_v35  ;;  %v1553_v28 = vmul.f32 2.0, %v1297_v23  ;;  %v961_v46 = vpop.f32.mrf.mxu0  ;;  %v1074_v22 = vpop.f32.mrf.mxu1  ;;  %v1937_v2 = vld [vmem:[#allocation2 + $0x348] sm:$0xff]  ;;  %v2227_v33 = vmin.f32 %v2226_v6, %v5006_v57  ;;  %v2264_v9 = vmin.f32 %v2263_v7, %v5008_v15  ;;  %v1939_v31 = vld [vmem:[#allocation2 + $0xf8] sm:$0xff]  ;;  %v1941_v7 = vld [vmem:[#allocation2] sm:$0xff] }
 0x22d   : > { %2189 = vst [vmem:[#allocation2 + $0xc8] sm:$0xff] %v2061_v42  ;;  %v1554_v44 = vmul.f32 2.0, %v961_v46  ;;  %v1555_v1 = vmul.f32 2.0, %v1074_v22  ;;  %v1428_v38 = vadd.f32 %v737_v18, %v4485_v55  ;;  %v1429_v0 = vadd.f32 %v737_v18, %v4500_v4  ;;  %v1940_v6 = vld [vmem:[#allocation2 + $0x68] sm:$0xff] }
 0x22e   : > { %2190 = vst [vmem:[#allocation2 + $0x278] sm:$0xff] %v2062_v30  ;;  %v1680_v25 = vsub.f32 %v1424_v36, %v1552_v8  ;;  %v1681_v61 = vsub.f32 %v1425_v11, %v1553_v28  ;;  %v1430_v57 = vadd.f32 %v740_v12, %v4446_v17  ;;  %v1431_v15 = vadd.f32 %v740_v12, %v4448_v26 }
 0x22f   : > { %2191 = vst [vmem:[#allocation2 + $0x360] sm:$0xff] %v2063_v37  ;;  %v1682_v54 = vsub.f32 %v1426_v45, %v1554_v44  ;;  %v1683_v47 = vsub.f32 %v1427_v49, %v1555_v1  ;;  %v2228_v37 = vmin.f32 %v2227_v33, %v5022_v16  ;;  %v2265_v35 = vmin.f32 %v2264_v9, %v5024_v40 }
 0x230   : > { %v5089_v59 = vmax.f32 %v1680_v25, 0.0  ;;  %v5091_v13 = vmax.f32 %v1681_v61, 0.0  ;;  %v2300_v18 = vmin.f32 %v2299_v41, %v5002_v52  ;;  %v2337_v10 = vmin.f32 %v2336_v5, %v5004_v24  ;;  %v1942_v5 = vld [vmem:[#allocation2 + $0x298] sm:$0xff] }
 0x231   : > { %v1810_v42 = vmax.f32 %v1682_v54, 0.0  ;;  %v1811_v36 = vmax.f32 %v1683_v47, 0.0  ;;  %v2229_v17 = vmin.f32 %v2228_v37, %v5038_v53  ;;  %v2266_v26 = vmin.f32 %v2265_v35, %v5040_v32 }
 0x232   : > { %v2064_v11 = vmin.f32 %v1936_v63, %v5089_v59  ;;  %v2065_v30 = vmin.f32 %v1937_v2, %v5091_v13  ;;  %v2301_v50 = vmin.f32 %v2300_v18, %v5018_v14  ;;  %v2338_v27 = vmin.f32 %v2337_v10, %v5020_v3  ;;  %v1943_v3 = vld [vmem:[#allocation2 + $0x270] sm:$0xff] }
 0x233   : > { %v2066_v23 = vmin.f32 %v1938_v21, %v1810_v42  ;;  %v2067_v45 = vmin.f32 %v1939_v31, %v1811_v36  ;;  %v1187_v49 = vpop.f32.mrf.mxu2  ;;  %v1300_v39 = vpop.f32.mrf.mxu3  ;;  %v2230_v24 = vmin.f32 %v2229_v17, %v5067_v48  ;;  %v2267_v1 = vmin.f32 %v2266_v26, %v5069_v60 }
 0x234   : > { %2192 = vst [vmem:[#allocation2 + $0x228] sm:$0xff] %v2064_v11  ;;  %v1556_v8 = vmul.f32 2.0, %v1187_v49  ;;  %v1557_v28 = vmul.f32 2.0, %v1300_v39  ;;  %v964_v46 = vpop.f32.mrf.mxu0  ;;  %v1077_v22 = vpop.f32.mrf.mxu1  ;;  %v1432_v41 = vadd.f32 %v740_v12, %v4485_v55  ;;  %v1433_v14 = vadd.f32 %v740_v12, %v4500_v4 }
 0x235   : > { %2193 = vst [vmem:[#allocation2 + $0x348] sm:$0xff] %v2065_v30  ;;  %v1558_v16 = vmul.f32 2.0, %v964_v46  ;;  %v1559_v40 = vmul.f32 2.0, %v1077_v22  ;;  %v2231_v63 = vmin.f32 %v2230_v24, %v1810_v42  ;;  %v2268_v2 = vmin.f32 %v2267_v1, %v1811_v36 }
 0x236   : > { %2194 = vst [vmem:[#allocation2 + $0x148] sm:$0xff] %v2066_v23  ;;  %v1684_v52 = vsub.f32 %v1428_v38, %v1556_v8  ;;  %v1685_v44 = vsub.f32 %v1429_v0, %v1557_v28  ;;  %v2302_v48 = vmin.f32 %v2301_v50, %v5034_v19  ;;  %v2339_v60 = vmin.f32 %v2338_v27, %v5036_v34 }
 0x237   : > { %2195 = vst [vmem:[#allocation2 + $0xf8] sm:$0xff] %v2067_v45  ;;  %v1686_v53 = vsub.f32 %v1430_v57, %v1558_v16  ;;  %v1687_v25 = vsub.f32 %v1431_v15, %v1559_v40  ;;  %v1944_v45 = vld [vmem:[#allocation2 + $0x310] sm:$0xff] }
 0x238   : > { %v1812_v32 = vmax.f32 %v1684_v52, 0.0  ;;  %v1813_v61 = vmax.f32 %v1685_v44, 0.0  ;;  %v2303_v4 = vmin.f32 %v2302_v48, %v5060_v62  ;;  %v2340_v12 = vmin.f32 %v2339_v60, %v5062_v43  ;;  %v1945_v62 = vld [vmem:[#allocation2 + $0x190] sm:$0xff] }
 0x239   : > { %v1814_v54 = vmax.f32 %v1686_v53, 0.0  ;;  %v1815_v47 = vmax.f32 %v1687_v25, 0.0 }
 0x23a   : > { %v2068_v33 = vmin.f32 %v1940_v6, %v1812_v32  ;;  %v2069_v9 = vmin.f32 %v1941_v7, %v1813_v61  ;;  %v2304_v34 = vmin.f32 %v2303_v4, %v5089_v59  ;;  %v2341_v57 = vmin.f32 %v2340_v12, %v5091_v13 }
 0x23b   : > { %v2070_v21 = vmin.f32 %v1942_v5, %v1814_v54  ;;  %v2232_v31 = vmin.f32 %v2231_v63, %v1814_v54  ;;  %v2071_v38 = vmin.f32 %v1943_v3, %v1815_v47  ;;  %v2269_v0 = vmin.f32 %v2268_v2, %v1815_v47  ;;  %v1190_v11 = vpop.f32.mrf.mxu2  ;;  %v1303_v55 = vpop.f32.mrf.mxu3 }
 0x23c   : > { %2196 = vst [vmem:[#allocation2 + $0x68] sm:$0xff] %v2068_v33  ;;  %v1560_v42 = vmul.f32 2.0, %v1190_v11  ;;  %v1561_v36 = vmul.f32 2.0, %v1303_v55  ;;  %v2305_v49 = vmin.f32 %v2304_v34, %v1812_v32  ;;  %v2342_v43 = vmin.f32 %v2341_v57, %v1813_v61 }
 0x23d   : > { %2197 = vst [vmem:[#allocation2] sm:$0xff] %v2069_v9  ;;  %v2233_v30 = vrot.slane %v2232_v31, 4  ;;  %v2270_v19 = vrot.slane %v2269_v0, 4 }
 0x23e   : > { %2198 = vst [vmem:[#allocation2 + $0x298] sm:$0xff] %v2070_v21  ;;  %v1688_v15 = vsub.f32 %v1432_v41, %v1560_v42  ;;  %v1689_v37 = vsub.f32 %v1433_v14, %v1561_v36 }
 0x23f   : > { %v2234_v35 = vmin.f32 %v2232_v31, %v2233_v30  ;;  %2199 = vst [vmem:[#allocation2 + $0x270] sm:$0xff] %v2071_v38  ;;  %v2271_v23 = vmin.f32 %v2269_v0, %v2270_v19 }
 0x240   : > { %v1816_v39 = vmax.f32 %v1688_v15, 0.0  ;;  %v1817_v18 = vmax.f32 %v1689_v37, 0.0 }
 0x241   : > { %v2235_v10 = vrot.slane %v2234_v35, 2  ;;  %v2272_v8 = vrot.slane %v2271_v23, 2 }
 0x242   : > { %v2072_v28 = vmin.f32 %v1944_v45, %v1816_v39  ;;  %v2306_v46 = vmin.f32 %v2305_v49, %v1816_v39  ;;  %v2073_v22 = vmin.f32 %v1945_v62, %v1817_v18  ;;  %v2343_v59 = vmin.f32 %v2342_v43, %v1817_v18 }
 0x243   : > { %v2236_v17 = vmin.f32 %v2234_v35, %v2235_v10  ;;  %v2273_v13 = vmin.f32 %v2271_v23, %v2272_v8 }
 0x244   : > { %2200 = vst [vmem:[#allocation2 + $0x310] sm:$0xff] %v2072_v28  ;;  %v2307_v26 = vrot.slane %v2306_v46, 4  ;;  %v2344_v16 = vrot.slane %v2343_v59, 4 }
 0x245   : > { %v2237_v40 = vrot.slane %v2236_v17, 1  ;;  %v2274_v50 = vrot.slane %v2273_v13, 1  ;;  %2201 = vst [vmem:[#allocation2 + $0x190] sm:$0xff] %v2073_v22 }
 0x246   : > { %v2308_v27 = vmin.f32 %v2306_v46, %v2307_v26  ;;  %v2345_v52 = vmin.f32 %v2343_v59, %v2344_v16 }
 0x247   : > { %v2238_v44 = vmin.f32 %v2236_v17, %v2237_v40  ;;  %v2275_v24 = vmin.f32 %v2273_v13, %v2274_v50  ;;  %v2350_v50 = vld [vmem:[#allocation3] sm:$0xf] }
 0x248   : > { %v2309_v1 = vrot.slane %v2308_v27, 2  ;;  %v2346_v6 = vrot.slane %v2345_v52, 2 }
 0x249   : > { %3583 = vrsqrt.f32 %v2238_v44  ;;  %vm2358_vm1 = vcmp.eq.f32.partialorder %v2238_v44, inf  ;;  %v2361_v12 = vand.u32 2147483648, %v2238_v44  ;;  %vm2370_vm14 = vcmp.eq.f32.partialorder %v2275_v24, inf }
 0x24a   : > { %3585 = vrsqrt.f32 %v2275_v24  ;;  %v2310_v7 = vmin.f32 %v2308_v27, %v2309_v1  ;;  %v2347_v53 = vmin.f32 %v2345_v52, %v2346_v6  ;;  %v2373_v19 = vand.u32 2147483648, %v2275_v24 }
 0x24b   : > { %vm2360_vm11 = vcmp.eq.f32.partialorder %v2238_v44, 0.0  ;;  %vm2372_vm13 = vcmp.eq.f32.partialorder %v2275_v24, 0.0 }
 0x24c   : > { %v2311_v25 = vrot.slane %v2310_v7, 1  ;;  %v2348_v32 = vrot.slane %v2347_v53, 1 }
 0x24e   : > { %v2312_v41 = vmin.f32 %v2310_v7, %v2311_v25  ;;  %v2349_v14 = vmin.f32 %v2347_v53, %v2348_v32 }
 0x24f   : > { %v3584_v61 = vpop.eup %3583 }
 0x250   : > { %v3586_v5 = vpop.eup %3585  ;;  %v2352_v3 = vmul.f32 %v3584_v61, %v2238_v44  ;;  %3587 = vrsqrt.f32 %v2312_v41  ;;  %vm2382_vm0 = vcmp.eq.f32.partialorder %v2312_v41, inf  ;;  %v2385_v28 = vand.u32 2147483648, %v2312_v41 }
 0x251   : > { %v2364_v63 = vmul.f32 %v3586_v5, %v2275_v24  ;;  %3589 = vrsqrt.f32 %v2349_v14  ;;  %vm2384_vm6 = vcmp.eq.f32.partialorder %v2312_v41, 0.0  ;;  %vm2394_vm4 = vcmp.eq.f32.partialorder %v2349_v14, inf }
 0x252   : > { %v2353_v2 = vmul.f32 %v3584_v61, %v2352_v3  ;;  %v2397_v59 = vand.u32 2147483648, %v2349_v14  ;;  %vm2396_vm2 = vcmp.eq.f32.partialorder %v2349_v14, 0.0 }
 0x253   : > { %v2365_v54 = vmul.f32 %v3586_v5, %v2364_v63 }
 0x254   : > { %v2354_v47 = vmul.f32 0.5, %v2353_v2 }
 0x255   : > { %v2366_v48 = vmul.f32 0.5, %v2365_v54 }
 0x256   : > { %v2355_v60 = vsub.f32 1.5, %v2354_v47  ;;  %v3588_v33 = vpop.eup %3587 }
 0x257   : > { %v2367_v9 = vsub.f32 1.5, %v2366_v48  ;;  %v3590_v21 = vpop.eup %3589  ;;  %v2376_v38 = vmul.f32 %v3588_v33, %v2312_v41 }
 0x258   : > { %v2356_v31 = vmul.f32 %v3584_v61, %v2355_v60  ;;  %v2388_v11 = vmul.f32 %v3590_v21, %v2349_v14 }
 0x259   : > { %v2368_v0 = vmul.f32 %v3586_v5, %v2367_v9  ;;  %v2377_v4 = vmul.f32 %v3588_v33, %v2376_v38 }
 0x25a   : > { %v2357_v55 = vmul.f32 %v2356_v31, %v2238_v44  ;;  %v2389_v36 = vmul.f32 %v3590_v21, %v2388_v11 }
 0x25b   : > { %v2369_v42 = vmul.f32 %v2368_v0, %v2275_v24  ;;  %v2378_v34 = vmul.f32 0.5, %v2377_v4 }
 0x25c   : > { %v2359_v30 = vsel %vm2358_vm1, %v2238_v44, %v2357_v55  ;;  %v2390_v15 = vmul.f32 0.5, %v2389_v36 }
 0x25d   : > { %v2371_v57 = vsel %vm2370_vm14, %v2275_v24, %v2369_v42  ;;  %v2362_v37 = vsel %vm2360_vm11, %v2361_v12, %v2359_v30  ;;  %v2379_v23 = vsub.f32 1.5, %v2378_v34 }
 0x25e   : > { %v2374_v35 = vsel %vm2372_vm13, %v2373_v19, %v2371_v57  ;;  %v2391_v62 = vsub.f32 1.5, %v2390_v15  ;;  %v2399_v43 = vmul.f32 %v2362_v37, %v4365_v51 }
 0x25f   : > { %v2400_v45 = vmul.f32 %v2374_v35, %v4381_v56  ;;  %v2380_v49 = vmul.f32 %v3588_v33, %v2379_v23 }
 0x260   : > { %v2392_v18 = vmul.f32 %v3590_v21, %v2391_v62 }
 0x261   : > { %v2407_v39 = vrot.slane %v2400_v45, 7  ;;  %v2381_v10 = vmul.f32 %v2380_v49, %v2312_v41 }
 0x262   : > { %v2393_v46 = vmul.f32 %v2392_v18, %v2349_v14 }
 0x263   : > { %v2411_v8 = vsel %vm2410_vm15, %v2399_v43, %v2407_v39  ;;  %v2383_v22 = vsel %vm2382_vm0, %v2312_v41, %v2381_v10 }
 0x264   : > { %v2386_v17 = vsel %vm2384_vm6, %v2385_v28, %v2383_v22  ;;  %v2395_v13 = vsel %vm2394_vm4, %v2349_v14, %v2393_v46 }
 0x265   : > { %v2401_v56 = vmul.f32 %v2386_v17, %v4432_v20  ;;  %v2398_v26 = vsel %vm2396_vm2, %v2397_v59, %v2395_v13 }
 0x266   : > { %v2402_v51 = vmul.f32 %v2398_v26, %v4460_v29 }
 0x267   : > { %v2408_v16 = vrot.slane %v2401_v56, 6 }
 0x268   : > { %v2409_v40 = vrot.slane %v2402_v51, 5 }
 0x26a   : > { %v2413_v27 = vsel %vm2412_vm5, %v2408_v16, %v2409_v40  ;;  %2426 = sbr.rel (%p3498_p11) target bundleno = 1062 (0x426), region = 36 }
 0x26b   : > { %v2415_v52 = vsel %vm2414_vm7, %v2411_v8, %v2413_v27 }
 0x26c   : > { %v2417_v44 = vadd.f32 %v2415_v52, %v2350_v50 }
 0x26e   : > { %2422 = vst.msk [vmem:[#allocation3] sm:$0xf] %vm2420_vm8, %v2417_v44 }
 0x26f   : > { %v2520_v24 = vld [vmem:[#allocation2 + $0x2e0] sm:$0xff]  ;;  %v2521_v1 = vld [vmem:[#allocation2 + $0x388] sm:$0xff]  ;;  %v2522_v20 = vld [vmem:[#allocation2 + $0x338] sm:$0xff]  ;;  %vm3176_vm9 = vcmask 7168   ;;  %s2429_s6 = scalar_select %p2428_p12, 1, 0 }
 0x270   : > { %v2652_v6 = vmin.f32 %v2520_v24, %v2521_v1  ;;  %v2512_v7 = vld [vmem:[#allocation2 + $0x380] sm:$0xff]  ;;  %v2513_v29 = vld [vmem:[#allocation2 + $0x110] sm:$0xff]  ;;  %v2514_v25 = vld [vmem:[#allocation2 + $0x118] sm:$0xff]  ;;  %s2432_s1 = scalar_select %p2431_p13, 1, 0 }
 0x271   : > { %v2523_v53 = vld [vmem:[#allocation2 + $0x340] sm:$0xff]  ;;  %v2642_v32 = vmin.f32 %v2512_v7, %v2513_v29  ;;  %v2504_v61 = vld [vmem:[#allocation2 + $0x2b0] sm:$0xff]  ;;  %v2515_v14 = vld [vmem:[#allocation2 + $0x98] sm:$0xff]  ;;  %s2436_s2 = scalar_select %p2435_p0, 1, 0 }
 0x272   : > { %v2653_v41 = vmin.f32 %v2652_v6, %v2522_v20  ;;  %v2505_v5 = vld [vmem:[#allocation2 + $0x3b0] sm:$0xff]  ;;  %v2506_v3 = vld [vmem:[#allocation2 + $0xd8] sm:$0xff]  ;;  %v2524_v2 = vld [vmem:[#allocation2 + $0x80] sm:$0xff]  ;;  %s2433_s26 = sadd.s32 %s2432_s1, %s2429_s6 }
 0x273   : > { %v2643_v58 = vmin.f32 %v2642_v32, %v2514_v25  ;;  %v2632_v63 = vmin.f32 %v2504_v61, %v2505_v5  ;;  %v2525_v54 = vld [vmem:[#allocation2 + $0x1a8] sm:$0xff]  ;;  %v2526_v47 = vld [vmem:[#allocation2 + $0x1b8] sm:$0xff]  ;;  %v2516_v9 = vld [vmem:[#allocation2 + $0x320] sm:$0xff]  ;;  %s2440_s7 = scalar_select %p2439_p1, 1, 0 }
 0x274   : > { %v2654_v48 = vmin.f32 %v2653_v41, %v2523_v53  ;;  %v2507_v60 = vld [vmem:[#allocation2 + $0x18] sm:$0xff]  ;;  %v2657_v33 = vmin.f32 %v2524_v2, %v2525_v54  ;;  %v2517_v21 = vld [vmem:[#allocation2 + $0x150] sm:$0xff]  ;;  %v2518_v0 = vld [vmem:[#allocation2 + $0x108] sm:$0xff]  ;;  %s2437_s19 = sadd.s32 %s2436_s2, %s2433_s26 }
 0x275   : > { %v2644_v31 = vmin.f32 %v2643_v58, %v2515_v14  ;;  %v2633_v38 = vmin.f32 %v2632_v63, %v2506_v3  ;;  %v2647_v11 = vmin.f32 %v2516_v9, %v2517_v21  ;;  %v2508_v55 = vld [vmem:[#allocation2 + $0x50] sm:$0xff]  ;;  %v2509_v12 = vld [vmem:[#allocation2 + $0x368] sm:$0xff]  ;;  %v2536_v57 = vld [vmem:[#allocation2 + $0x100] sm:$0xff]  ;;  %s2444_s14 = scalar_select %p2443_p2, 1, 0 }
 0x276   : > { %2655 = vmin.xlane.f32.xlu2 %v2654_v48  ;;  %v2658_v4 = vmin.f32 %v2657_v33, %v2526_v47  ;;  %v2510_v42 = vld [vmem:[#allocation2 + $0x330] sm:$0xff]  ;;  %v2527_v30 = vld [vmem:[#allocation2 + $0x168] sm:$0xff]  ;;  %v2637_v34 = vmin.f32 %v2508_v55, %v2509_v12  ;;  %v2537_v15 = vld [vmem:[#allocation2 + $0x3c0] sm:$0xff]  ;;  %s2441_s10 = sadd.s32 %s2440_s7, %s2437_s19 }
 0x277   : > { %2645 = vmin.xlane.f32.xlu1 %v2644_v31  ;;  %v2634_v36 = vmin.f32 %v2633_v38, %v2507_v60  ;;  %v2648_v19 = vmin.f32 %v2647_v11, %v2518_v0  ;;  %v2519_v37 = vld [vmem:[#allocation2 + $0x60] sm:$0xff]  ;;  %v2532_v35 = vld [vmem:[#allocation2 + $0x138] sm:$0xff]  ;;  %v2511_v49 = vld [vmem:[#allocation2 + $0x48] sm:$0xff]  ;;  %v2672_v43 = vmin.f32 %v2536_v57, %v2537_v15  ;;  %s2448_s23 = scalar_select %p2447_p4, 1, 0 }
 0x278   : > { %v2533_v23 = vld [vmem:[#allocation2 + $0xc0] sm:$0xff]  ;;  %v2638_v45 = vmin.f32 %v2637_v34, %v2510_v42  ;;  %v2659_v62 = vmin.f32 %v2658_v4, %v2527_v30  ;;  %v2528_v39 = vld [vmem:[#allocation2 + $0x3e8] sm:$0xff]  ;;  %v2529_v18 = vld [vmem:[#allocation2 + $0x2f8] sm:$0xff]  ;;  %s2445_s0 = sadd.s32 %s2444_s14, %s2441_s10 }
 0x279   : > { %2635 = vmin.xlane.f32.xlu0 %v2634_v36  ;;  %v2649_v10 = vmin.f32 %v2648_v19, %v2519_v37  ;;  %v2538_v8 = vld [vmem:[#allocation2 + $0x158] sm:$0xff]  ;;  %v2667_v28 = vmin.f32 %v2532_v35, %v2533_v23  ;;  %v2534_v46 = vld [vmem:[#allocation2 + $0x1c0] sm:$0xff]  ;;  %v2662_v59 = vmin.f32 %v2528_v39, %v2529_v18  ;;  %v2530_v13 = vld [vmem:[#allocation2 + $0x290] sm:$0xff]  ;;  %s2452_s12 = scalar_select %p2451_p5, 1, 0 }
 0x27a   : > { %v2639_v22 = vmin.f32 %v2638_v45, %v2511_v49  ;;  %v2673_v17 = vmin.f32 %v2672_v43, %v2538_v8  ;;  %v2539_v56 = vld [vmem:[#allocation2 + $0x3e0] sm:$0xff]  ;;  %v2548_v51 = vld [vmem:[#allocation2 + $0xb0] sm:$0xff]  ;;  %v2531_v24 = vld [vmem:[#allocation2 + $0x28] sm:$0xff]  ;;  %s2449_s11 = sadd.s32 %s2448_s23, %s2445_s0 }
 0x27b   : > { %v2668_v26 = vmin.f32 %v2667_v28, %v2534_v46  ;;  %v2549_v16 = vld [vmem:[#allocation2 + $0x1e0] sm:$0xff]  ;;  %v2545_v27 = vld [vmem:[#allocation2 + $0x3f0] sm:$0xff]  ;;  %v2663_v52 = vmin.f32 %v2662_v59, %v2530_v13  ;;  %v2540_v20 = vld [vmem:[#allocation2 + $0x218] sm:$0xff]  ;;  %s2456_s21 = scalar_select %p2455_p6, 1, 0 }
 0x27c   : > { %v2535_v40 = vld [vmem:[#allocation2 + $0x280] sm:$0xff]  ;;  %v2674_v44 = vmin.f32 %v2673_v17, %v2539_v56  ;;  %v2687_v1 = vmin.f32 %v2548_v51, %v2549_v16  ;;  %v2541_v6 = vld [vmem:[#allocation2 + $0x3f8] sm:$0xff]  ;;  %v2550_v29 = vld [vmem:[#allocation2 + $0x1f0] sm:$0xff]  ;;  %s2453_s5 = sadd.s32 %s2452_s12, %s2449_s11 }
 0x27d   : > { %v2544_v50 = vld [vmem:[#allocation2 + $0x2a0] sm:$0xff]  ;;  %v2669_v7 = vmin.f32 %v2668_v26, %v2535_v40  ;;  %v2664_v32 = vmin.f32 %v2663_v52, %v2531_v24  ;;  %v2677_v61 = vmin.f32 %v2540_v20, %v2541_v6  ;;  %v2542_v14 = vld [vmem:[#allocation2 + $0x8] sm:$0xff]  ;;  %v2551_v5 = vld [vmem:[#allocation2 + $0x10] sm:$0xff]  ;;  %s2457_s4 = sadd.s32 %s2456_s21, %s2453_s5 }
 0x27e   : > { %2660 = vmin.xlane.f32.xlu2 %v2659_v62  ;;  %v2682_v53 = vmin.f32 %v2544_v50, %v2545_v27  ;;  %v2546_v25 = vld [vmem:[#allocation2 + $0xa0] sm:$0xff]  ;;  %v2688_v41 = vmin.f32 %v2687_v1, %v2550_v29  ;;  %v2560_v58 = vld [vmem:[#allocation2 + $0x358] sm:$0xff]  ;;  %v2561_v63 = vld [vmem:[#allocation2 + $0x268] sm:$0xff]  ;;  %s5623_s15 = scvt.s32.f32 %s2457_s4 }
 0x27f   : > { %2650 = vmin.xlane.f32.xlu1 %v2649_v10  ;;  %v2547_v2 = vld [vmem:[#allocation2 + $0x2c0] sm:$0xff]  ;;  %v2556_v54 = vld [vmem:[#allocation2 + $0x208] sm:$0xff]  ;;  %v2557_v47 = vld [vmem:[#allocation2 + $0xd0] sm:$0xff]  ;;  %v2678_v48 = vmin.f32 %v2677_v61, %v2542_v14  ;;  %v2702_v9 = vmin.f32 %v2560_v58, %v2561_v63 }
 0x280   : > { %v2683_v3 = vmin.f32 %v2682_v53, %v2546_v25  ;;  %v2689_v60 = vmin.f32 %v2688_v41, %v2551_v5  ;;  %v2543_v33 = vld [vmem:[#allocation2 + $0x128] sm:$0xff]  ;;  %v2552_v21 = vld [vmem:[#allocation2 + $0x230] sm:$0xff]  ;;  %v2553_v31 = vld [vmem:[#allocation2 + $0x240] sm:$0xff]  ;;  %v2697_v11 = vmin.f32 %v2556_v54, %v2557_v47  ;;  %s2459_s30 = smul.f32 225.0, %s5623_s15 }
 0x281   : > { %2640 = vmin.xlane.f32.xlu0 %v2639_v22  ;;  %v2562_v0 = vld [vmem:[#allocation2 + $0x350] sm:$0xff]  ;;  %v2558_v55 = vld [vmem:[#allocation2 + $0x88] sm:$0xff]  ;;  %v2679_v4 = vmin.f32 %v2678_v48, %v2543_v33  ;;  %v2692_v12 = vmin.f32 %v2552_v21, %v2553_v31  ;;  %v2573_v57 = vld [vmem:[#allocation2 + $0x300] sm:$0xff] }
 0x282   : > { %v2684_v38 = vmin.f32 %v2683_v3, %v2547_v2  ;;  %v2703_v42 = vmin.f32 %v2702_v9, %v2562_v0  ;;  %v2554_v36 = vld [vmem:[#allocation2 + $0x90] sm:$0xff]  ;;  %v2563_v30 = vld [vmem:[#allocation2 + $0x188] sm:$0xff]  ;;  %v2698_v19 = vmin.f32 %v2697_v11, %v2558_v55  ;;  %v2569_v35 = vld [vmem:[#allocation2 + $0x200] sm:$0xff]  ;;  %s2486_s2 = smax.f32 %s3770_s24, %s2459_s30  ;;  %p3252_p7 = scmp.gt.f32.partialorder %s2459_s30, 0.0 }
 0x283   : > { %v2572_v34 = vld [vmem:[#allocation2 + $0x70] sm:$0xff]  ;;  %v2693_v23 = vmin.f32 %v2692_v12, %v2554_v36  ;;  %v2555_v62 = vld [vmem:[#allocation2 + $0x3a0] sm:$0xff]  ;;  %v2564_v43 = vld [vmem:[#allocation2 + $0x1d8] sm:$0xff] }
 0x284   : > { %v2559_v15 = vld [vmem:[#allocation2 + $0x2f0] sm:$0xff]  ;;  %v2704_v45 = vmin.f32 %v2703_v42, %v2563_v30  ;;  %v2717_v49 = vmin.f32 %v2572_v34, %v2573_v57  ;;  %v2574_v10 = vld [vmem:[#allocation2 + $0xe0] sm:$0xff]  ;;  %v2570_v28 = vld [vmem:[#allocation2 + $0x318] sm:$0xff] }
 0x285   : > { %v2568_v37 = vld [vmem:[#allocation2 + $0x130] sm:$0xff]  ;;  %v2699_v18 = vmin.f32 %v2698_v19, %v2559_v15  ;;  %v2694_v46 = vmin.f32 %v2693_v23, %v2555_v62  ;;  %v2566_v17 = vld [vmem:[#allocation2 + $0x140] sm:$0xff]  ;;  %v2575_v13 = vld [vmem:[#allocation2 + $0x178] sm:$0xff] }
 0x286   : > { %2675 = vmin.xlane.f32.xlu2 %v2674_v44  ;;  %v2565_v39 = vld [vmem:[#allocation2 + $0x30] sm:$0xff]  ;;  %v2712_v8 = vmin.f32 %v2568_v37, %v2569_v35  ;;  %v2718_v59 = vmin.f32 %v2717_v49, %v2574_v10  ;;  %v2584_v26 = vld [vmem:[#allocation2 + $0x288] sm:$0xff]  ;;  %v2571_v16 = vld [vmem:[#allocation2 + $0x220] sm:$0xff] }
 0x287   : > { %2670 = vmin.xlane.f32.xlu1 %v2669_v7  ;;  %v2707_v22 = vmin.f32 %v2564_v43, %v2565_v39  ;;  %v2585_v51 = vld [vmem:[#allocation2 + $0x3a8] sm:$0xff]  ;;  %v2581_v50 = vld [vmem:[#allocation2 + $0x40] sm:$0xff]  ;;  %v2578_v41 = vld [vmem:[#allocation2 + $0x3b8] sm:$0xff] }
 0x288   : > { %v2713_v56 = vmin.f32 %v2712_v8, %v2570_v28  ;;  %v2580_v40 = vld [vmem:[#allocation2 + $0x248] sm:$0xff]  ;;  %v2719_v52 = vmin.f32 %v2718_v59, %v2575_v13  ;;  %v2732_v24 = vmin.f32 %v2584_v26, %v2585_v51  ;;  %v2577_v20 = vld [vmem:[#allocation2 + $0x260] sm:$0xff]  ;;  %v2596_v3 = vld [vmem:[#allocation2 + $0x58] sm:$0xff] }
 0x289   : > { %2665 = vmin.xlane.f32.xlu0 %v2664_v32  ;;  %v2708_v27 = vmin.f32 %v2707_v22, %v2566_v17  ;;  %v2567_v44 = vld [vmem:[#allocation2 + $0x2a8] sm:$0xff]  ;;  %v2727_v29 = vmin.f32 %v2580_v40, %v2581_v50  ;;  %v2582_v53 = vld [vmem:[#allocation2 + $0x20] sm:$0xff]  ;;  %v2592_v2 = vld [vmem:[#allocation2 + $0x1b0] sm:$0xff] }
 0x28a   : > { %v2576_v1 = vld [vmem:[#allocation2 + $0x328] sm:$0xff]  ;;  %v2714_v6 = vmin.f32 %v2713_v56, %v2571_v16  ;;  %v2587_v14 = vld [vmem:[#allocation2 + $0x160] sm:$0xff]  ;;  %v2589_v21 = vld [vmem:[#allocation2 + $0x210] sm:$0xff] }
 0x28b   : > { %v2586_v7 = vld [vmem:[#allocation2 + $0x3c8] sm:$0xff]  ;;  %v2709_v25 = vmin.f32 %v2708_v27, %v2567_v44  ;;  %v2722_v32 = vmin.f32 %v2576_v1, %v2577_v20  ;;  %v2728_v5 = vmin.f32 %v2727_v29, %v2582_v53  ;;  %v2597_v58 = vld [vmem:[#allocation2 + $0x120] sm:$0xff]  ;;  %v2594_v11 = vld [vmem:[#allocation2 + $0x2d0] sm:$0xff] }
 0x28c   : > { %v2733_v61 = vmin.f32 %v2732_v24, %v2586_v7  ;;  %v2583_v63 = vld [vmem:[#allocation2 + $0xe8] sm:$0xff]  ;;  %v2747_v33 = vmin.f32 %v2596_v3, %v2597_v58  ;;  %v2590_v42 = vld [vmem:[#allocation2 + $0x3d8] sm:$0xff]  ;;  %v2608_v19 = vld [vmem:[#allocation2 + $0xf0] sm:$0xff] }
 0x28d   : > { %v2593_v54 = vld [vmem:[#allocation2 + $0x1c8] sm:$0xff]  ;;  %v2723_v47 = vmin.f32 %v2722_v32, %v2578_v41  ;;  %v2729_v31 = vmin.f32 %v2728_v5, %v2583_v63  ;;  %v2609_v34 = vld [vmem:[#allocation2 + $0x180] sm:$0xff]  ;;  %v2595_v57 = vld [vmem:[#allocation2 + $0x1d0] sm:$0xff] }
 0x28e   : > { %2690 = vmin.xlane.f32.xlu2 %v2689_v60  ;;  %v2734_v48 = vmin.f32 %v2733_v61, %v2587_v14  ;;  %v2579_v60 = vld [vmem:[#allocation2 + $0x2b8] sm:$0xff]  ;;  %v2588_v9 = vld [vmem:[#allocation2 + $0x2c8] sm:$0xff]  ;;  %v2742_v0 = vmin.f32 %v2592_v2, %v2593_v54  ;;  %v2604_v15 = vld [vmem:[#allocation2 + $0x1a0] sm:$0xff]  ;;  %v2762_v62 = vmin.f32 %v2608_v19, %v2609_v34 }
 0x28f   : > { %2685 = vmin.xlane.f32.xlu1 %v2684_v38  ;;  %v2598_v38 = vld [vmem:[#allocation2 + $0x198] sm:$0xff]  ;;  %v2724_v55 = vmin.f32 %v2723_v47, %v2579_v60  ;;  %v2599_v36 = vld [vmem:[#allocation2 + $0x2e8] sm:$0xff]  ;;  %v2611_v17 = vld [vmem:[#allocation2 + $0x3d0] sm:$0xff] }
 0x290   : > { %v2748_v12 = vmin.f32 %v2747_v33, %v2598_v38  ;;  %v2743_v30 = vmin.f32 %v2742_v0, %v2594_v11  ;;  %v2605_v37 = vld [vmem:[#allocation2 + $0xa8] sm:$0xff]  ;;  %v2600_v49 = vld [vmem:[#allocation2 + $0x1f8] sm:$0xff]  ;;  %v2621_v26 = vld [vmem:[#allocation2 + $0x360] sm:$0xff] }
 0x291   : > { %2680 = vmin.xlane.f32.xlu0 %v2679_v4  ;;  %v2737_v4 = vmin.f32 %v2588_v9, %v2589_v21  ;;  %v2601_v43 = vld [vmem:[#allocation2 + $0x238] sm:$0xff]  ;;  %v2757_v10 = vmin.f32 %v2604_v15, %v2605_v37  ;;  %v2617_v40 = vld [vmem:[#allocation2 + $0x308] sm:$0xff]  ;;  %v2612_v24 = vld [vmem:[#allocation2 + $0x250] sm:$0xff] }
 0x292   : > { %v2749_v23 = vmin.f32 %v2748_v12, %v2599_v36  ;;  %v2744_v39 = vmin.f32 %v2743_v30, %v2595_v57  ;;  %v2606_v8 = vld [vmem:[#allocation2 + $0x258] sm:$0xff]  ;;  %v2618_v29 = vld [vmem:[#allocation2 + $0x370] sm:$0xff]  ;;  %v2623_v41 = vld [vmem:[#allocation2 + $0x348] sm:$0xff] }
 0x293   : > { %v2738_v35 = vmin.f32 %v2737_v4, %v2590_v42  ;;  %v2602_v59 = vld [vmem:[#allocation2 + $0x398] sm:$0xff]  ;;  %v2758_v13 = vmin.f32 %v2757_v10, %v2606_v8  ;;  %v2619_v5 = vld [vmem:[#allocation2 + $0xc8] sm:$0xff]  ;;  %v2629_v58 = vld [vmem:[#allocation2 + $0x270] sm:$0xff] }
 0x294   : > { %v2620_v56 = vld [vmem:[#allocation2 + $0x278] sm:$0xff]  ;;  %v2624_v47 = vld [vmem:[#allocation2 + $0x148] sm:$0xff]  ;;  %v2630_v9 = vld [vmem:[#allocation2 + $0x310] sm:$0xff] }
 0x295   : > { %v2607_v51 = vld [vmem:[#allocation2 + $0x2d8] sm:$0xff]  ;;  %v2777_v44 = vmin.f32 %v2620_v56, %v2621_v26  ;;  %v2626_v38 = vld [vmem:[#allocation2 + $0x68] sm:$0xff]  ;;  %v2631_v11 = vld [vmem:[#allocation2 + $0x190] sm:$0xff] }
 0x296   : > { %2705 = vmin.xlane.f32.xlu2 %v2704_v45  ;;  %v2591_v45 = vld [vmem:[#allocation2 + $0x1e8] sm:$0xff]  ;;  %v2616_v16 = vld [vmem:[#allocation2 + $0x78] sm:$0xff]  ;;  %v2759_v20 = vmin.f32 %v2758_v13, %v2607_v51  ;;  %v2627_v4 = vld [vmem:[#allocation2] sm:$0xff] }
 0x297   : > { %2700 = vmin.xlane.f32.xlu1 %v2699_v18  ;;  %v2610_v18 = vld [vmem:[#allocation2 + $0x170] sm:$0xff]  ;;  %v2739_v28 = vmin.f32 %v2738_v35, %v2591_v45  ;;  %v2613_v1 = vld [vmem:[#allocation2 + $0x378] sm:$0xff]  ;;  %v2772_v7 = vmin.f32 %v2616_v16, %v2617_v40 }
 0x298   : > { %v2763_v22 = vmin.f32 %v2762_v62, %v2610_v18  ;;  %v2614_v61 = vld [vmem:[#allocation2 + $0xb8] sm:$0xff] }
 0x299   : > { %2695 = vmin.xlane.f32.xlu0 %v2694_v46  ;;  %v2752_v46 = vmin.f32 %v2600_v49, %v2601_v43  ;;  %v2773_v14 = vmin.f32 %v2772_v7, %v2618_v29  ;;  %v2628_v3 = vld [vmem:[#allocation2 + $0x298] sm:$0xff] }
 0x29a   : > { %v2764_v27 = vmin.f32 %v2763_v22, %v2611_v17  ;;  %v2615_v54 = vld [vmem:[#allocation2 + $0x38] sm:$0xff]  ;;  %v2787_v33 = vmin.f32 %v2628_v3, %v2629_v58 }
 0x29b   : > { %v2753_v50 = vmin.f32 %v2752_v46, %v2602_v59  ;;  %v2774_v60 = vmin.f32 %v2773_v14, %v2619_v5 }
 0x29c   : > { %v2788_v0 = vmin.f32 %v2787_v33, %v2630_v9 }
 0x29e   : > { %2720 = vmin.xlane.f32.xlu2 %v2719_v52  ;;  %v2603_v52 = vld [vmem:[#allocation2 + $0x390] sm:$0xff]  ;;  %v2789_v12 = vmin.f32 %v2788_v0, %v2631_v11 }
 0x29f   : > { %2715 = vmin.xlane.f32.xlu1 %v2714_v6  ;;  %v2622_v6 = vld [vmem:[#allocation2 + $0x228] sm:$0xff]  ;;  %v2754_v53 = vmin.f32 %v2753_v50, %v2603_v52 }
 0x2a0   : > { %v2778_v32 = vmin.f32 %v2777_v44, %v2622_v6 }
 0x2a1   : > { %2710 = vmin.xlane.f32.xlu0 %v2709_v25  ;;  %v2767_v25 = vmin.f32 %v2612_v24, %v2613_v1 }
 0x2a2   : > { %v2779_v2 = vmin.f32 %v2778_v32, %v2623_v41 }
 0x2a3   : > { %v2768_v63 = vmin.f32 %v2767_v25, %v2614_v61 }
 0x2a5   : > { %v2769_v21 = vmin.f32 %v2768_v63, %v2615_v54 }
 0x2a6   : > { %2735 = vmin.xlane.f32.xlu2 %v2734_v48  ;;  %v2625_v48 = vld [vmem:[#allocation2 + $0xf8] sm:$0xff] }
 0x2a7   : > { %2730 = vmin.xlane.f32.xlu1 %v2729_v31  ;;  %v2782_v31 = vmin.f32 %v2624_v47, %v2625_v48 }
 0x2a9   : > { %2725 = vmin.xlane.f32.xlu0 %v2724_v55  ;;  %v2783_v55 = vmin.f32 %v2782_v31, %v2626_v38 }
 0x2ab   : > { %v2784_v42 = vmin.f32 %v2783_v55, %v2627_v4 }
 0x2ae   : > { %2750 = vmin.xlane.f32.xlu2 %v2749_v23 }
 0x2af   : > { %2745 = vmin.xlane.f32.xlu1 %v2744_v39 }
 0x2b1   : > { %2740 = vmin.xlane.f32.xlu0 %v2739_v28 }
 0x2b6   : > { %2765 = vmin.xlane.f32.xlu2 %v2764_v27 }
 0x2b7   : > { %2760 = vmin.xlane.f32.xlu1 %v2759_v20 }
 0x2b9   : > { %2755 = vmin.xlane.f32.xlu0 %v2754_v53 }
 0x2be   : > { %2780 = vmin.xlane.f32.xlu2 %v2779_v2 }
 0x2bf   : > { %2775 = vmin.xlane.f32.xlu1 %v2774_v60 }
 0x2c1   : > { %2770 = vmin.xlane.f32.xlu0 %v2769_v21 }
 0x2c7   : > { %2790 = vmin.xlane.f32.xlu1 %v2789_v12 }
 0x2c9   : > { %2785 = vmin.xlane.f32.xlu0 %v2784_v42 }
 0x2e9   : > { %v5124_v36 = vpop.xlane.xlu2 %2655 }
 0x2ea   : > { %v5126_v30 = vpop.xlane.xlu1 %2645  ;;  %vm2847_vm0 = vcmp.eq.f32.partialorder %v5124_v36, inf  ;;  %vm2849_vm4 = vcmp.eq.f32.partialorder %v5124_v36, 0.0 }
 0x2eb   : > { %3591 = vrsqrt.f32 %v5126_v30  ;;  %vm2823_vm12 = vcmp.eq.f32.partialorder %v5126_v30, inf  ;;  %vm2825_vm3 = vcmp.eq.f32.partialorder %v5126_v30, 0.0  ;;  %v2826_v63 = vand.u32 2147483648, %v5126_v30 }
 0x2ec   : > { %3593 = vrsqrt.f32 %v5124_v36  ;;  %v5130_v19 = vpop.xlane.xlu0 %2635 }
 0x2ed   : > { %3595 = vrsqrt.f32 %v5130_v19  ;;  %vm2799_vm10 = vcmp.eq.f32.partialorder %v5130_v19, inf  ;;  %vm2801_vm1 = vcmp.eq.f32.partialorder %v5130_v19, 0.0  ;;  %v2802_v9 = vand.u32 2147483648, %v5130_v19 }
 0x2f1   : > { %v3592_v34 = vpop.eup %3591  ;;  %v5133_v57 = vpop.xlane.xlu2 %2660 }
 0x2f2   : > { %v3594_v15 = vpop.eup %3593  ;;  %v2817_v37 = vmul.f32 %v3592_v34, %v5126_v30  ;;  %3597 = vrsqrt.f32 %v5133_v57  ;;  %v5137_v35 = vpop.xlane.xlu1 %2650  ;;  %vm2859_vm2 = vcmp.eq.f32.partialorder %v5133_v57, inf  ;;  %vm2861_vm5 = vcmp.eq.f32.partialorder %v5133_v57, 0.0 }
 0x2f3   : > { %v3596_v23 = vpop.eup %3595  ;;  %3599 = vrsqrt.f32 %v5137_v35  ;;  %v2841_v43 = vmul.f32 %v3594_v15, %v5124_v36  ;;  %vm2835_vm14 = vcmp.eq.f32.partialorder %v5137_v35, inf  ;;  %vm2837_vm6 = vcmp.eq.f32.partialorder %v5137_v35, 0.0 }
 0x2f4   : > { %v2818_v45 = vmul.f32 %v3592_v34, %v2817_v37  ;;  %v2793_v62 = vmul.f32 %v3596_v23, %v5130_v19  ;;  %v5141_v49 = vpop.xlane.xlu0 %2640 }
 0x2f5   : > { %3601 = vrsqrt.f32 %v5141_v49  ;;  %v2842_v22 = vmul.f32 %v3594_v15, %v2841_v43  ;;  %vm2811_vm11 = vcmp.eq.f32.partialorder %v5141_v49, inf  ;;  %v2814_v55 = vand.u32 2147483648, %v5141_v49 }
 0x2f6   : > { %v2819_v39 = vmul.f32 0.5, %v2818_v45  ;;  %v2794_v18 = vmul.f32 %v3596_v23, %v2793_v62  ;;  %vm2813_vm13 = vcmp.eq.f32.partialorder %v5141_v49, 0.0 }
 0x2f7   : > { %v2843_v52 = vmul.f32 0.5, %v2842_v22 }
 0x2f8   : > { %v5145_v10 = vpop.eup %3597  ;;  %v2795_v8 = vmul.f32 0.5, %v2794_v18  ;;  %v2820_v59 = vsub.f32 1.5, %v2819_v39 }
 0x2f9   : > { %v3600_v28 = vpop.eup %3599  ;;  %v5147_v46 = vpop.xlane.xlu2 %2675  ;;  %v2853_v51 = vmul.f32 %v5145_v10, %v5133_v57  ;;  %v2844_v25 = vsub.f32 1.5, %v2843_v52 }
 0x2fa   : > { %v2796_v17 = vsub.f32 1.5, %v2795_v8  ;;  %v2829_v13 = vmul.f32 %v3600_v28, %v5137_v35  ;;  %v5150_v56 = vpop.xlane.xlu1 %2670  ;;  %3603 = vrsqrt.f32 %v5147_v46  ;;  %v2821_v44 = vmul.f32 %v3592_v34, %v2820_v59 }
 0x2fb   : > { %v3602_v26 = vpop.eup %3601  ;;  %3605 = vrsqrt.f32 %v5150_v56  ;;  %v2854_v1 = vmul.f32 %v5145_v10, %v2853_v51  ;;  %v2845_v33 = vmul.f32 %v3594_v15, %v2844_v25  ;;  %vm2895_vm7 = vcmp.eq.f32.partialorder %v5147_v46, inf }
 0x2fc   : > { %v2830_v16 = vmul.f32 %v3600_v28, %v2829_v13  ;;  %v2805_v40 = vmul.f32 %v3602_v26, %v5141_v49  ;;  %v5156_v50 = vpop.xlane.xlu0 %2665  ;;  %v2797_v27 = vmul.f32 %v3596_v23, %v2796_v17  ;;  %v2822_v32 = vmul.f32 %v2821_v44, %v5126_v30 }
 0x2fd   : > { %v2855_v5 = vmul.f32 0.5, %v2854_v1  ;;  %3607 = vrsqrt.f32 %v5156_v50  ;;  %v2846_v34 = vmul.f32 %v2845_v33, %v5124_v36  ;;  %vm2871_vm8 = vcmp.eq.f32.partialorder %v5156_v50, inf }
 0x2fe   : > { %v2831_v24 = vmul.f32 0.5, %v2830_v16  ;;  %v2806_v20 = vmul.f32 %v3602_v26, %v2805_v40  ;;  %v2798_v7 = vmul.f32 %v2797_v27, %v5130_v19  ;;  %v2824_v21 = vsel %vm2823_vm12, %v5126_v30, %v2822_v32 }
 0x2ff   : > { %v2856_v31 = vsub.f32 1.5, %v2855_v5  ;;  %v2827_v15 = vsel %vm2825_vm3, %v2826_v63, %v2824_v21  ;;  %v2848_v40 = vsel %vm2847_vm0, %v5124_v36, %v2846_v34  ;;  %vm2883_vm12 = vcmp.eq.f32.partialorder %v5150_v56, inf }
 0x300   : > { %v2832_v6 = vsub.f32 1.5, %v2831_v24  ;;  %v2807_v29 = vmul.f32 0.5, %v2806_v20  ;;  %v5161_v53 = vpop.eup %3603  ;;  %v2800_v47 = vsel %vm2799_vm10, %v5130_v19, %v2798_v7  ;;  %v3180_v13 = vsel %vm3176_vm9, %v2827_v15, 0.0 }
 0x301   : > { %v5165_v61 = vpop.xlane.xlu2 %2690  ;;  %v5169_v14 = vpop.eup %3605  ;;  %v2889_v60 = vmul.f32 %v5161_v53, %v5147_v46  ;;  %v2803_v11 = vsel %vm2801_vm1, %v2802_v9, %v2800_v47  ;;  %v2857_v43 = vmul.f32 %v5145_v10, %v2856_v31  ;;  %v2838_v10 = vand.u32 2147483648, %v5137_v35 }
 0x302   : > { %v5167_v41 = vpop.xlane.xlu1 %2685  ;;  %v2833_v3 = vmul.f32 %v3600_v28, %v2832_v6  ;;  %v2808_v58 = vsub.f32 1.5, %v2807_v29  ;;  %v2877_v2 = vmul.f32 %v5169_v14, %v5150_v56  ;;  %3609 = vrsqrt.f32 %v5165_v61 }
 0x303   : > { %v3608_v12 = vpop.eup %3607  ;;  %v2890_v19 = vmul.f32 %v5161_v53, %v2889_v60  ;;  %3611 = vrsqrt.f32 %v5167_v41  ;;  %v3177_v62 = vsel %vm3176_vm9, %v2803_v11, 0.0  ;;  %v2858_v27 = vmul.f32 %v2857_v43, %v5133_v57 }
 0x304   : > { %v5177_v54 = vpop.xlane.xlu0 %2680  ;;  %v2809_v48 = vmul.f32 %v3602_v26, %v2808_v58  ;;  %v2834_v38 = vmul.f32 %v2833_v3, %v5137_v35  ;;  %v2878_v4 = vmul.f32 %v5169_v14, %v2877_v2  ;;  %v2865_v23 = vmul.f32 %v3608_v12, %v5156_v50 }
 0x305   : > { %3613 = vrsqrt.f32 %v5177_v54  ;;  %v2891_v17 = vmul.f32 0.5, %v2890_v19  ;;  %v2862_v60 = vand.u32 2147483648, %v5133_v57  ;;  %vm2873_vm3 = vcmp.eq.f32.partialorder %v5156_v50, 0.0 }
 0x306   : > { %v2810_v0 = vmul.f32 %v2809_v48, %v5141_v49  ;;  %v2879_v30 = vmul.f32 0.5, %v2878_v4  ;;  %v2866_v28 = vmul.f32 %v3608_v12, %v2865_v23  ;;  %v2874_v34 = vand.u32 2147483648, %v5156_v50 }
 0x307   : > { %v2892_v6 = vsub.f32 1.5, %v2891_v17  ;;  %vm2885_vm10 = vcmp.eq.f32.partialorder %v5150_v56, 0.0  ;;  %vm2897_vm1 = vcmp.eq.f32.partialorder %v5147_v46, 0.0  ;;  %vm2919_vm0 = vcmp.eq.f32.partialorder %v5167_v41, inf }
 0x308   : > { %v2812_v42 = vsel %vm2811_vm11, %v5141_v49, %v2810_v0  ;;  %v2836_v49 = vsel %vm2835_vm14, %v5137_v35, %v2834_v38  ;;  %v5210_v18 = vpop.eup %3609  ;;  %v2867_v26 = vmul.f32 0.5, %v2866_v28  ;;  %v2880_v24 = vsub.f32 1.5, %v2879_v30 }
 0x309   : > { %v2815_v37 = vsel %vm2813_vm13, %v2814_v55, %v2812_v42  ;;  %v5213_v22 = vpop.xlane.xlu2 %2705  ;;  %v2925_v51 = vmul.f32 %v5210_v18, %v5165_v61  ;;  %v5223_v16 = vpop.eup %3611  ;;  %v2839_v52 = vsel %vm2837_vm6, %v2838_v10, %v2836_v49  ;;  %v2850_v35 = vand.u32 2147483648, %v5124_v36 }
 0x30a   : > { %v5202_v45 = vpop.xlane.xlu1 %2700  ;;  %v3178_v39 = vsel %vm3176_vm9, %v2815_v37, 0.0  ;;  %v2868_v1 = vsub.f32 1.5, %v2867_v26  ;;  %v2913_v20 = vmul.f32 %v5223_v16, %v5167_v41  ;;  %3615 = vrsqrt.f32 %v5213_v22 }
 0x30b   : > { %v3179_v8 = vadd.f32 %v3178_v39, %v3177_v62  ;;  %v3614_v7 = vpop.eup %3613  ;;  %v3182_v29 = vsel %vm3176_vm9, %v2839_v52, 0.0  ;;  %v2926_v32 = vmul.f32 %v5210_v18, %v2925_v51  ;;  %v2851_v3 = vsel %vm2849_vm4, %v2850_v35, %v2848_v40 }
 0x30c   : > { %v5215_v59 = vpop.xlane.xlu0 %2695  ;;  %v2869_v25 = vmul.f32 %v3608_v12, %v2868_v1  ;;  %v2914_v5 = vmul.f32 %v5223_v16, %v2913_v20  ;;  %v2901_v63 = vmul.f32 %v3614_v7, %v5177_v54  ;;  %3617 = vrsqrt.f32 %v5202_v45 }
 0x30d   : > { %v3181_v44 = vadd.f32 %v3180_v13, %v3179_v8  ;;  %v2860_v36 = vsel %vm2859_vm2, %v5133_v57, %v2858_v27  ;;  %v2881_v47 = vmul.f32 %v5169_v14, %v2880_v24  ;;  %v2893_v33 = vmul.f32 %v5161_v53, %v2892_v6 }
 0x30e   : > { %v2870_v48 = vmul.f32 %v2869_v25, %v5156_v50  ;;  %v2902_v9 = vmul.f32 %v3614_v7, %v2901_v63  ;;  %v3184_v31 = vsel %vm3176_vm9, %v2851_v3, 0.0  ;;  %v2927_v38 = vmul.f32 0.5, %v2926_v32 }
 0x30f   : > { %v3183_v58 = vadd.f32 %v3182_v29, %v3181_v44  ;;  %v2915_v0 = vmul.f32 0.5, %v2914_v5  ;;  %3619 = vrsqrt.f32 %v5215_v59  ;;  %v2863_v55 = vsel %vm2861_vm5, %v2862_v60, %v2860_v36 }
 0x310   : > { %v5247_v21 = vpop.eup %3615  ;;  %v2903_v57 = vmul.f32 0.5, %v2902_v9  ;;  %v2882_v53 = vmul.f32 %v2881_v47, %v5150_v56  ;;  %v2872_v12 = vsel %vm2871_vm8, %v5156_v50, %v2870_v48  ;;  %v2894_v19 = vmul.f32 %v2893_v33, %v5147_v46 }
 0x311   : > { %v5251_v11 = vpop.xlane.xlu2 %2720  ;;  %v3185_v4 = vadd.f32 %v3184_v31, %v3183_v58  ;;  %v2961_v37 = vmul.f32 %v5247_v21, %v5213_v22  ;;  %v3186_v23 = vsel %vm3176_vm9, %v2863_v55, 0.0  ;;  %v2928_v62 = vsub.f32 1.5, %v2927_v38 }
 0x312   : > { %v5238_v2 = vpop.xlane.xlu1 %2715  ;;  %v5260_v42 = vpop.eup %3617  ;;  %v2904_v15 = vsub.f32 1.5, %v2903_v57  ;;  %v2916_v43 = vsub.f32 1.5, %v2915_v0  ;;  %v2875_v8 = vsel %vm2873_vm3, %v2874_v34, %v2872_v12  ;;  %3621 = vrsqrt.f32 %v5251_v11 }
 0x313   : > { %v2949_v49 = vmul.f32 %v5260_v42, %v5202_v45  ;;  %v3187_v39 = vadd.f32 %v3186_v23, %v3185_v4  ;;  %v2898_v10 = vand.u32 2147483648, %v5147_v46  ;;  %v2884_v50 = vsel %vm2883_vm12, %v5150_v56, %v2882_v53 }
 0x314   : > { %v5253_v14 = vpop.xlane.xlu0 %2710  ;;  %v2905_v30 = vmul.f32 %v3614_v7, %v2904_v15  ;;  %v2896_v13 = vsel %vm2895_vm7, %v5147_v46, %v2894_v19  ;;  %v2886_v26 = vand.u32 2147483648, %v5150_v56  ;;  %v2962_v51 = vmul.f32 %v5247_v21, %v2961_v37 }
 0x315   : > { %v3620_v28 = vpop.eup %3619  ;;  %v2950_v17 = vmul.f32 %v5260_v42, %v2949_v49  ;;  %v3188_v52 = vsel %vm3176_vm9, %v2875_v8, 0.0  ;;  %v2929_v44 = vmul.f32 %v5210_v18, %v2928_v62  ;;  %v2917_v24 = vmul.f32 %v5223_v16, %v2916_v43 }
 0x316   : > { %v2937_v40 = vmul.f32 %v3620_v28, %v5215_v59  ;;  %v2906_v1 = vmul.f32 %v2905_v30, %v5177_v54  ;;  %v2887_v20 = vsel %vm2885_vm10, %v2886_v26, %v2884_v50  ;;  %v3189_v35 = vadd.f32 %v3188_v52, %v3187_v39 }
 0x317   : > { %3623 = vrsqrt.f32 %v5238_v2  ;;  %vm2931_vm14 = vcmp.eq.f32.partialorder %v5165_v61, inf  ;;  %vm2907_vm11 = vcmp.eq.f32.partialorder %v5177_v54, inf  ;;  %v2951_v56 = vmul.f32 0.5, %v2950_v17 }
 0x318   : > { %v2938_v6 = vmul.f32 %v3620_v28, %v2937_v40  ;;  %v5296_v18 = vpop.eup %3621  ;;  %v2899_v16 = vsel %vm2897_vm1, %v2898_v10, %v2896_v13  ;;  %vm2933_vm13 = vcmp.eq.f32.partialorder %v5165_v61, 0.0  ;;  %v2910_v25 = vand.u32 2147483648, %v5177_v54 }
 0x319   : > { %v5292_v7 = vpop.xlane.xlu2 %2735  ;;  %v2963_v32 = vmul.f32 0.5, %v2962_v51  ;;  %v3190_v46 = vsel %vm3176_vm9, %v2887_v20, 0.0  ;;  %v2930_v3 = vmul.f32 %v2929_v44, %v5165_v61  ;;  %v2918_v58 = vmul.f32 %v2917_v24, %v5167_v41 }
 0x31a   : > { %v5282_v27 = vpop.xlane.xlu1 %2730  ;;  %v2939_v5 = vmul.f32 0.5, %v2938_v6  ;;  %v2908_v63 = vsel %vm2907_vm11, %v5177_v54, %v2906_v1  ;;  %v3191_v36 = vadd.f32 %v3190_v46, %v3189_v35  ;;  %v2997_v48 = vmul.f32 %v5296_v18, %v5251_v11 }
 0x31b   : > { %3625 = vrsqrt.f32 %v5253_v14  ;;  %v2934_v60 = vand.u32 2147483648, %v5165_v61  ;;  %vm2909_vm6 = vcmp.eq.f32.partialorder %v5177_v54, 0.0  ;;  %v2952_v33 = vsub.f32 1.5, %v2951_v56 }
 0x31c   : > { %v5294_v29 = vpop.xlane.xlu0 %2725  ;;  %v2940_v47 = vsub.f32 1.5, %v2939_v5  ;;  %v2911_v31 = vsel %vm2909_vm6, %v2910_v25, %v2908_v63  ;;  %v2964_v38 = vsub.f32 1.5, %v2963_v32  ;;  %3627 = vrsqrt.f32 %v5292_v7 }
 0x31d   : > { %v5310_v9 = vpop.eup %3623  ;;  %v3192_v55 = vsel %vm3176_vm9, %v2899_v16, 0.0  ;;  %vm2921_vm4 = vcmp.eq.f32.partialorder %v5167_v41, 0.0  ;;  %v2922_v4 = vand.u32 2147483648, %v5167_v41  ;;  %v2932_v54 = vsel %vm2931_vm14, %v5165_v61, %v2930_v3 }
 0x31e   : > { %v2941_v0 = vmul.f32 %v3620_v28, %v2940_v47  ;;  %v2985_v57 = vmul.f32 %v5310_v9, %v5238_v2  ;;  %v2920_v53 = vsel %vm2919_vm0, %v5167_v41, %v2918_v58  ;;  %v3193_v12 = vadd.f32 %v3192_v55, %v3191_v36 }
 0x31f   : > { %v2998_v19 = vmul.f32 %v5296_v18, %v2997_v48  ;;  %v3194_v15 = vsel %vm3176_vm9, %v2911_v31, 0.0  ;;  %vm2967_vm2 = vcmp.eq.f32.partialorder %v5213_v22, inf  ;;  %v2953_v37 = vmul.f32 %v5260_v42, %v2952_v33 }
 0x320   : > { %v2942_v23 = vmul.f32 %v2941_v0, %v5215_v59  ;;  %v2986_v62 = vmul.f32 %v5310_v9, %v2985_v57  ;;  %v2965_v49 = vmul.f32 %v5247_v21, %v2964_v38  ;;  %v2970_v39 = vand.u32 2147483648, %v5213_v22 }
 0x321   : > { %v3626_v43 = vpop.eup %3625  ;;  %vm2955_vm5 = vcmp.eq.f32.partialorder %v5202_v45, inf  ;;  %3629 = vrsqrt.f32 %v5282_v27  ;;  %v2935_v8 = vsel %vm2933_vm13, %v2934_v60, %v2932_v54  ;;  %vm2957_vm7 = vcmp.eq.f32.partialorder %v5202_v45, 0.0  ;;  %v5340_v28 = vpop.xlane.xlu2 %2750 }
 0x322   : > { %v5323_v34 = vpop.xlane.xlu1 %2745  ;;  %v2958_v42 = vand.u32 2147483648, %v5202_v45  ;;  %vm2943_vm8 = vcmp.eq.f32.partialorder %v5215_v59, inf  ;;  %v2973_v30 = vmul.f32 %v3626_v43, %v5253_v14  ;;  %v5344_v10 = vpop.eup %3627  ;;  %v2923_v50 = vsel %vm2921_vm4, %v2922_v4, %v2920_v53 }
 0x323   : > { %v3195_v17 = vadd.f32 %v3194_v15, %v3193_v12  ;;  %v2999_v61 = vmul.f32 0.5, %v2998_v19  ;;  %3631 = vrsqrt.f32 %v5294_v29  ;;  %v2954_v13 = vmul.f32 %v2953_v37, %v5202_v45 }
 0x324   : > { %v5342_v21 = vpop.xlane.xlu0 %2740  ;;  %v2944_v26 = vsel %vm2943_vm8, %v5215_v59, %v2942_v23  ;;  %v2987_v51 = vmul.f32 0.5, %v2986_v62  ;;  %v2974_v40 = vmul.f32 %v3626_v43, %v2973_v30  ;;  %v2966_v52 = vmul.f32 %v2965_v49, %v5213_v22 }
 0x325   : > { %v2946_v44 = vand.u32 2147483648, %v5215_v59  ;;  %v3033_v24 = vmul.f32 %v5344_v10, %v5292_v7  ;;  %3633 = vrsqrt.f32 %v5340_v28  ;;  %v3198_v41 = vsel %vm3176_vm9, %v2935_v8, 0.0 }
 0x326   : > { %v3196_v1 = vsel %vm3176_vm9, %v2923_v50, 0.0  ;;  %vm2969_vm12 = vcmp.eq.f32.partialorder %v5213_v22, 0.0  ;;  %vm2945_vm3 = vcmp.eq.f32.partialorder %v5215_v59, 0.0  ;;  %v2975_v20 = vmul.f32 0.5, %v2974_v40 }
 0x327   : > { %v3630_v35 = vpop.eup %3629  ;;  %v3197_v6 = vadd.f32 %v3196_v1, %v3195_v17  ;;  %v2947_v56 = vsel %vm2945_vm3, %v2946_v44, %v2944_v26  ;;  %v3000_v16 = vsub.f32 1.5, %v2999_v61  ;;  %v3034_v25 = vmul.f32 %v5344_v10, %v3033_v24 }
 0x328   : > { %v2956_v32 = vsel %vm2955_vm5, %v5202_v45, %v2954_v13  ;;  %v3006_v5 = vand.u32 2147483648, %v5251_v11  ;;  %v2988_v46 = vsub.f32 1.5, %v2987_v51  ;;  %v2976_v3 = vsub.f32 1.5, %v2975_v20 }
 0x329   : > { %v3632_v58 = vpop.eup %3631  ;;  %v2968_v59 = vsel %vm2967_vm2, %v5213_v22, %v2966_v52  ;;  %v3035_v63 = vmul.f32 0.5, %v3034_v25  ;;  %v3021_v36 = vmul.f32 %v3630_v35, %v5282_v27  ;;  %3635 = vrsqrt.f32 %v5323_v34  ;;  %v5407_v13 = vpop.xlane.xlu2 %2765 }
 0x32a   : > { %v5370_v47 = vpop.xlane.xlu1 %2760  ;;  %v3200_v48 = vsel %vm3176_vm9, %v2947_v56, 0.0  ;;  %vm3003_vm10 = vcmp.eq.f32.partialorder %v5251_v11, inf  ;;  %v2977_v60 = vmul.f32 %v3626_v43, %v2976_v3  ;;  %vm2979_vm1 = vcmp.eq.f32.partialorder %v5253_v14, inf }
 0x32b   : > { %v3009_v33 = vmul.f32 %v3632_v58, %v5294_v29  ;;  %v5376_v31 = vpop.eup %3633  ;;  %v2959_v38 = vsel %vm2957_vm7, %v2958_v42, %v2956_v32  ;;  %v3199_v0 = vadd.f32 %v3198_v41, %v3197_v6  ;;  %v3001_v55 = vmul.f32 %v5296_v18, %v3000_v16 }
 0x32c   : > { %vm2991_vm14 = vcmp.eq.f32.partialorder %v5238_v2, inf  ;;  %v3022_v4 = vmul.f32 %v3630_v35, %v3021_v36  ;;  %v2989_v57 = vmul.f32 %v5310_v9, %v2988_v46  ;;  %v2978_v54 = vmul.f32 %v2977_v60, %v5253_v14  ;;  %v5386_v19 = vpop.xlane.xlu0 %2755 }
 0x32d   : > { %v3010_v53 = vmul.f32 %v3632_v58, %v3009_v33  ;;  %v3069_v12 = vmul.f32 %v5376_v31, %v5340_v28  ;;  %v3201_v15 = vadd.f32 %v3200_v48, %v3199_v0  ;;  %vm3005_vm11 = vcmp.eq.f32.partialorder %v5251_v11, 0.0 }
 0x32e   : > { %v3036_v45 = vsub.f32 1.5, %v3035_v63  ;;  %v3023_v37 = vmul.f32 0.5, %v3022_v4  ;;  %3637 = vrsqrt.f32 %v5342_v21  ;;  %vm2993_vm13 = vcmp.eq.f32.partialorder %v5238_v2, 0.0 }
 0x32f   : > { %v2994_v18 = vand.u32 2147483648, %v5238_v2  ;;  %v2980_v9 = vsel %vm2979_vm1, %v5253_v14, %v2978_v54  ;;  %v3011_v23 = vmul.f32 0.5, %v3010_v53  ;;  %v3070_v62 = vmul.f32 %v5376_v31, %v3069_v12  ;;  %v5396_v43 = vpop.eup %3635 }
 0x330   : > { %v2971_v49 = vsel %vm2969_vm12, %v2970_v39, %v2968_v59  ;;  %v3002_v8 = vmul.f32 %v3001_v55, %v5251_v11  ;;  %v2982_v42 = vand.u32 2147483648, %v5253_v14  ;;  %v3024_v30 = vsub.f32 1.5, %v3023_v37 }
 0x331   : > { %v3202_v50 = vsel %vm3176_vm9, %v2959_v38, 0.0  ;;  %v2990_v17 = vmul.f32 %v2989_v57, %v5238_v2  ;;  %vm2981_vm0 = vcmp.eq.f32.partialorder %v5253_v14, 0.0  ;;  %v3012_v61 = vsub.f32 1.5, %v3011_v23  ;;  %v5458_v54 = vpop.xlane.xlu2 %2780 }
 0x332   : > { %v3203_v26 = vadd.f32 %v3202_v50, %v3201_v15  ;;  %v2983_v51 = vsel %vm2981_vm0, %v2982_v42, %v2980_v9  ;;  %v3037_v40 = vmul.f32 %v5344_v10, %v3036_v45  ;;  %v3071_v22 = vmul.f32 0.5, %v3070_v62  ;;  %v5420_v10 = vpop.xlane.xlu1 %2775 }
 0x333   : > { %v3204_v39 = vsel %vm3176_vm9, %v2971_v49, 0.0  ;;  %vm3039_vm6 = vcmp.eq.f32.partialorder %v5292_v7, inf  ;;  %v3025_v52 = vmul.f32 %v3630_v35, %v3024_v30  ;;  %v3057_v44 = vmul.f32 %v5396_v43, %v5323_v34  ;;  %v2460_v49 = vld [vmem:[#allocation3] sm:$0xf] }
 0x334   : > { %v3638_v24 = vpop.eup %3637  ;;  %v3004_v14 = vsel %vm3003_vm10, %v5251_v11, %v3002_v8  ;;  %vm3041_vm4 = vcmp.eq.f32.partialorder %v5292_v7, 0.0  ;;  %v3042_v41 = vand.u32 2147483648, %v5292_v7  ;;  %v3013_v1 = vmul.f32 %v3632_v58, %v3012_v61  ;;  %v5437_v59 = vpop.xlane.xlu0 %2770 }
 0x335   : > { %3639 = vrsqrt.f32 %v5407_v13  ;;  %v2992_v20 = vsel %vm2991_vm14, %v5238_v2, %v2990_v17  ;;  %v3206_v35 = vsel %vm3176_vm9, %v2983_v51, 0.0  ;;  %vm3027_vm2 = vcmp.eq.f32.partialorder %v5282_v27, inf }
 0x336   : > { %v3045_v6 = vmul.f32 %v3638_v24, %v5342_v21  ;;  %v3205_v56 = vadd.f32 %v3204_v39, %v3203_v26  ;;  %v3038_v16 = vmul.f32 %v3037_v40, %v5292_v7  ;;  %vm3029_vm5 = vcmp.eq.f32.partialorder %v5282_v27, 0.0 }
 0x337   : > { %v3072_v25 = vsub.f32 1.5, %v3071_v22  ;;  %v3007_v32 = vsel %vm3005_vm11, %v3006_v5, %v3004_v14  ;;  %v3026_v46 = vmul.f32 %v3025_v52, %v5282_v27  ;;  %v3030_v3 = vand.u32 2147483648, %v5282_v27 }
 0x338   : > { %v3058_v58 = vmul.f32 %v5396_v43, %v3057_v44  ;;  %v2995_v63 = vsel %vm2993_vm13, %v2994_v18, %v2992_v20  ;;  %v3207_v36 = vadd.f32 %v3206_v35, %v3205_v56  ;;  %v3014_v48 = vmul.f32 %v3013_v1, %v5294_v29 }
 0x339   : > { %v3046_v60 = vmul.f32 %v3638_v24, %v3045_v6  ;;  %vm3015_vm7 = vcmp.eq.f32.partialorder %v5294_v29, inf  ;;  %vm3017_vm8 = vcmp.eq.f32.partialorder %v5294_v29, 0.0  ;;  %v3018_v11 = vand.u32 2147483648, %v5294_v29 }
 0x33a   : > { %3641 = vrsqrt.f32 %v5370_v47  ;;  %v3040_v33 = vsel %vm3039_vm6, %v5292_v7, %v3038_v16  ;;  %v3073_v2 = vmul.f32 %v5376_v31, %v3072_v25  ;;  %vm3075_vm12 = vcmp.eq.f32.partialorder %v5340_v28, inf  ;;  %v5474_v7 = vpop.xlane.xlu1 %2790 }
 0x33b   : > { %v5446_v5 = vpop.eup %3639  ;;  %v3047_v38 = vmul.f32 0.5, %v3046_v60  ;;  %v3210_v0 = vsel %vm3176_vm9, %v3007_v32, 0.0  ;;  %v3208_v55 = vsel %vm3176_vm9, %v2995_v63, 0.0  ;;  %v3028_v4 = vsel %vm3027_vm2, %v5282_v27, %v3026_v46 }
 0x33c   : > { %v3059_v57 = vmul.f32 0.5, %v3058_v58  ;;  %v3209_v53 = vadd.f32 %v3208_v55, %v3207_v36  ;;  %v3016_v12 = vsel %vm3015_vm7, %v5294_v29, %v3014_v48  ;;  %3643 = vrsqrt.f32 %v5386_v19  ;;  %v5490_v29 = vpop.xlane.xlu0 %2785 }
 0x33d   : > { %v3048_v15 = vsub.f32 1.5, %v3047_v38  ;;  %v3043_v31 = vsel %vm3041_vm4, %v3042_v41, %v3040_v33  ;;  %v3078_v45 = vand.u32 2147483648, %v5340_v28  ;;  %v3066_v37 = vand.u32 2147483648, %v5323_v34 }
 0x33e   : > { %v3105_v18 = vmul.f32 %v5446_v5, %v5407_v13  ;;  %v3031_v9 = vsel %vm3029_vm5, %v3030_v3, %v3028_v4  ;;  %v3074_v23 = vmul.f32 %v3073_v2, %v5340_v28  ;;  %vm3051_vm3 = vcmp.eq.f32.partialorder %v5342_v21, inf }
 0x33f   : > { %v3054_v62 = vand.u32 2147483648, %v5342_v21  ;;  %3645 = vrsqrt.f32 %v5458_v54  ;;  %v3019_v42 = vsel %vm3017_vm8, %v3018_v11, %v3016_v12  ;;  %v3060_v30 = vsub.f32 1.5, %v3059_v57 }
 0x340   : > { %v5476_v8 = vpop.eup %3641  ;;  %v3049_v50 = vmul.f32 %v3638_v24, %v3048_v15  ;;  %3647 = vrsqrt.f32 %v5420_v10  ;;  %v5482_v27 = vsel %vm3176_vm9, %v3043_v31, 0.0  ;;  %v3211_v17 = vadd.f32 %v3210_v0, %v3209_v53 }
 0x341   : > { %v3093_v61 = vmul.f32 %v5476_v8, %v5370_v47  ;;  %3649 = vrsqrt.f32 %v5437_v59  ;;  %vm3053_vm10 = vcmp.eq.f32.partialorder %v5342_v21, 0.0  ;;  %v3106_v26 = vmul.f32 %v5446_v5, %v3105_v18 }
 0x342   : > { %3651 = vrsqrt.f32 %v5474_v7  ;;  %v2462_v51 = vperm.slane %v2460_v49, 0  ;;  %v2463_v40 = vperm.slane %v2460_v49, 1  ;;  %v3644_v22 = vpop.eup %3643  ;;  %v3214_v39 = vsel %vm3176_vm9, %v3031_v9, 0.0 }
 0x343   : > { %v3212_v52 = vsel %vm3176_vm9, %v3019_v42, 0.0  ;;  %v3094_v44 = vmul.f32 %v5476_v8, %v3093_v61  ;;  %v2464_v24 = vperm.slane %v2460_v49, 2  ;;  %v3076_v14 = vsel %vm3075_vm12, %v5340_v28, %v3074_v23 }
 0x344   : > { %vm3077_vm1 = vcmp.eq.f32.partialorder %v5340_v28, 0.0  ;;  %v3061_v41 = vmul.f32 %v5396_v43, %v3060_v30  ;;  %v3050_v1 = vmul.f32 %v3049_v50, %v5342_v21  ;;  %v3081_v20 = vmul.f32 %v3644_v22, %v5386_v19 }
 0x345   : > { %v5502_v35 = vpop.eup %3645  ;;  %v3095_v6 = vmul.f32 0.5, %v3094_v44  ;;  %3653 = vrsqrt.f32 %v5490_v29  ;;  %v2470_v56 = vsel %vm2410_vm15, %v2462_v51, 0.0  ;;  %v2471_v16 = vsel %vm2410_vm15, %v2463_v40, 0.0 }
 0x346   : > { %v5507_v25 = vpop.eup %3647  ;;  %v3213_v32 = vadd.f32 %v3212_v52, %v3211_v17  ;;  %vm3063_vm14 = vcmp.eq.f32.partialorder %v5323_v34, inf  ;;  %v3107_v46 = vmul.f32 0.5, %v3106_v26  ;;  %v3082_v43 = vmul.f32 %v3644_v22, %v3081_v20 }
 0x347   : > { %v3141_v3 = vmul.f32 %v5502_v35, %v5458_v54  ;;  %v3650_v58 = vpop.eup %3649  ;;  %v3129_v63 = vmul.f32 %v5507_v25, %v5420_v10  ;;  %v2465_v36 = vperm.slane %v2460_v49, 3  ;;  %v2472_v48 = vadd.f32 %v2471_v16, %v2470_v56 }
 0x348   : > { %v2473_v60 = vsel %vm2410_vm15, %v2464_v24, 0.0  ;;  %v5515_v11 = vpop.eup %3651  ;;  %v3052_v33 = vsel %vm3051_vm3, %v5342_v21, %v3050_v1  ;;  %v3083_v2 = vmul.f32 0.5, %v3082_v43  ;;  %v3117_v0 = vmul.f32 %v3650_v58, %v5437_v59 }
 0x349   : > { %v3142_v38 = vmul.f32 %v5502_v35, %v3141_v3  ;;  %vm3065_vm11 = vcmp.eq.f32.partialorder %v5323_v34, 0.0  ;;  %v3096_v55 = vsub.f32 1.5, %v3095_v6  ;;  %v3130_v4 = vmul.f32 %v5507_v25, %v3129_v63 }
 0x34a   : > { %v3165_v57 = vmul.f32 %v5515_v11, %v5474_v7  ;;  %v2474_v53 = vadd.f32 %v2473_v60, %v2472_v48  ;;  %v3062_v12 = vmul.f32 %v3061_v41, %v5323_v34  ;;  %v3108_v15 = vsub.f32 1.5, %v3107_v46 }
 0x34b   : > { %v3084_v31 = vsub.f32 1.5, %v3083_v2  ;;  %v3118_v18 = vmul.f32 %v3650_v58, %v3117_v0  ;;  %v3654_v9 = vpop.eup %3653  ;;  %v3215_v23 = vadd.f32 %v3214_v39, %v3213_v32  ;;  %v3055_v49 = vsel %vm3053_vm10, %v3054_v62, %v3052_v33 }
 0x34c   : > { %v3131_v42 = vmul.f32 0.5, %v3130_v4  ;;  %v2475_v30 = vsel %vm2410_vm15, %v2465_v36, 0.0  ;;  %v3143_v17 = vmul.f32 0.5, %v3142_v38  ;;  %v3079_v51 = vsel %vm3077_vm1, %v3078_v45, %v3076_v14 }
 0x34d   : > { %v3085_v50 = vmul.f32 %v3644_v22, %v3084_v31  ;;  %v3119_v61 = vmul.f32 0.5, %v3118_v18  ;;  %v2476_v26 = vadd.f32 %v2475_v30, %v2474_v53  ;;  %vm3111_vm13 = vcmp.eq.f32.partialorder %v5407_v13, inf }
 0x34e   : > { %v3114_v40 = vand.u32 2147483648, %v5407_v13  ;;  %v3097_v39 = vmul.f32 %v5476_v8, %v3096_v55  ;;  %v3166_v21 = vmul.f32 %v5515_v11, %v3165_v57  ;;  %v3109_v62 = vmul.f32 %v5446_v5, %v3108_v15 }
 0x34f   : > { %v3086_v22 = vmul.f32 %v3085_v50, %v5386_v19  ;;  %v3120_v52 = vsub.f32 1.5, %v3119_v61  ;;  %v3153_v44 = vmul.f32 %v3654_v9, %v5490_v29  ;;  %2477 = vadd.xlane.f32.xlu2 %v2476_v26  ;;  %v3064_v28 = vsel %vm3063_vm14, %v5323_v34, %v3062_v12 }
 0x350   : > { %v3218_v45 = vsel %vm3176_vm9, %v3055_v49, 0.0  ;;  %vm3099_vm15 = vcmp.eq.f32.partialorder %v5370_v47, inf  ;;  %v3132_v24 = vsub.f32 1.5, %v3131_v42  ;;  %v3217_v8 = vadd.f32 %v5482_v27, %v3215_v23 }
 0x351   : > { %vm3113_vm0 = vcmp.eq.f32.partialorder %v5407_v13, 0.0  ;;  %vm3087_vm6 = vcmp.eq.f32.partialorder %v5386_v19, inf  ;;  %v3121_v5 = vmul.f32 %v3650_v58, %v3120_v52  ;;  %v3144_v14 = vsub.f32 1.5, %v3143_v17 }
 0x352   : > { %v3098_v41 = vmul.f32 %v3097_v39, %v5370_v47  ;;  %v3088_v1 = vsel %vm3087_vm6, %v5386_v19, %v3086_v22  ;;  %v3090_v20 = vand.u32 2147483648, %v5386_v19  ;;  %v3167_v6 = vmul.f32 0.5, %v3166_v21 }
 0x353   : > { %v3067_v56 = vsel %vm3065_vm11, %v3066_v37, %v3064_v28  ;;  %v3219_v16 = vadd.f32 %v3218_v45, %v3217_v8  ;;  %v3110_v27 = vmul.f32 %v3109_v62, %v5407_v13  ;;  %v3154_v32 = vmul.f32 %v3654_v9, %v3153_v44 }
 0x354   : > { %vm3101_vm4 = vcmp.eq.f32.partialorder %v5370_v47, 0.0  ;;  %vm3089_vm2 = vcmp.eq.f32.partialorder %v5386_v19, 0.0  ;;  %v3133_v46 = vmul.f32 %v5507_v25, %v3132_v24  ;;  %v3122_v43 = vmul.f32 %v3121_v5, %v5437_v59 }
 0x355   : > { %v3102_v3 = vand.u32 2147483648, %v5370_v47  ;;  %v3091_v58 = vsel %vm3089_vm2, %v3090_v20, %v3088_v1  ;;  %v3145_v63 = vmul.f32 %v5502_v35, %v3144_v14  ;;  %v3155_v36 = vmul.f32 0.5, %v3154_v32 }
 0x356   : > { %v3220_v34 = vsel %vm3176_vm9, %v3067_v56, 0.0  ;;  %v3100_v37 = vsel %vm3099_vm15, %v5370_v47, %v3098_v41  ;;  %vm3123_vm5 = vcmp.eq.f32.partialorder %v5437_v59, inf  ;;  %v3168_v48 = vsub.f32 1.5, %v3167_v6 }
 0x357   : > { %v3112_v19 = vsel %vm3111_vm13, %v5407_v13, %v3110_v27  ;;  %v3126_v25 = vand.u32 2147483648, %v5437_v59  ;;  %v3156_v60 = vsub.f32 1.5, %v3155_v36  ;;  %v3221_v33 = vadd.f32 %v3220_v34, %v3219_v16 }
 0x358   : > { %v3134_v35 = vmul.f32 %v3133_v46, %v5420_v10  ;;  %v3124_v2 = vsel %vm3123_vm5, %v5437_v59, %v3122_v43  ;;  %v3222_v38 = vsel %vm3176_vm9, %v3079_v51, 0.0  ;;  %v3224_v0 = vsel %vm3176_vm9, %v3091_v58, 0.0 }
 0x359   : > { %v3103_v55 = vsel %vm3101_vm4, %v3102_v3, %v3100_v37  ;;  %v3146_v4 = vmul.f32 %v3145_v63, %v5458_v54  ;;  %v3157_v57 = vmul.f32 %v3654_v9, %v3156_v60  ;;  %v3223_v53 = vadd.f32 %v3222_v38, %v3221_v33 }
 0x35a   : > { %v3115_v12 = vsel %vm3113_vm0, %v3114_v40, %v3112_v19  ;;  %vm3125_vm7 = vcmp.eq.f32.partialorder %v5437_v59, 0.0  ;;  %v3169_v15 = vmul.f32 %v5515_v11, %v3168_v48  ;;  %vm3135_vm8 = vcmp.eq.f32.partialorder %v5420_v10, inf }
 0x35b   : > { %v3127_v31 = vsel %vm3125_vm7, %v3126_v25, %v3124_v2  ;;  %v3158_v18 = vmul.f32 %v3157_v57, %v5490_v29  ;;  %v3225_v23 = vadd.f32 %v3224_v0, %v3223_v53  ;;  %v3136_v47 = vsel %vm3135_vm8, %v5420_v10, %v3134_v35 }
 0x35c   : > { %vm3137_vm12 = vcmp.eq.f32.partialorder %v5420_v10, 0.0  ;;  %vm3147_vm3 = vcmp.eq.f32.partialorder %v5458_v54, inf  ;;  %v3226_v9 = vsel %vm3176_vm9, %v3103_v55, 0.0  ;;  %v3138_v13 = vand.u32 2147483648, %v5420_v10 }
 0x35d   : > { %v3148_v59 = vsel %vm3147_vm3, %v5458_v54, %v3146_v4  ;;  %vm3159_vm10 = vcmp.eq.f32.partialorder %v5490_v29, inf  ;;  %v3227_v11 = vadd.f32 %v3226_v9, %v3225_v23  ;;  %v3170_v42 = vmul.f32 %v3169_v15, %v5474_v7 }
 0x35e   : > { %v3160_v49 = vsel %vm3159_vm10, %v5490_v29, %v3158_v18  ;;  %v3228_v30 = vsel %vm3176_vm9, %v3115_v12, 0.0  ;;  %v3230_v50 = vsel %vm3176_vm9, %v3127_v31, 0.0  ;;  %v3139_v17 = vsel %vm3137_vm12, %v3138_v13, %v3136_v47 }
 0x35f   : > { %v3150_v61 = vand.u32 2147483648, %v5458_v54  ;;  %v3162_v26 = vand.u32 2147483648, %v5490_v29  ;;  %v3229_v51 = vadd.f32 %v3228_v30, %v3227_v11  ;;  %vm3149_vm1 = vcmp.eq.f32.partialorder %v5458_v54, 0.0 }
 0x360   : > { %vm3161_vm14 = vcmp.eq.f32.partialorder %v5490_v29, 0.0  ;;  %vm3171_vm11 = vcmp.eq.f32.partialorder %v5474_v7, inf  ;;  %v3232_v62 = vsel %vm3176_vm9, %v3139_v17, 0.0  ;;  %v3174_v22 = vand.u32 2147483648, %v5474_v7 }
 0x361   : > { %v3151_v10 = vsel %vm3149_vm1, %v3150_v61, %v3148_v59  ;;  %v3163_v40 = vsel %vm3161_vm14, %v3162_v26, %v3160_v49  ;;  %v3231_v39 = vadd.f32 %v3230_v50, %v3229_v51  ;;  %v3172_v21 = vsel %vm3171_vm11, %v5474_v7, %v3170_v42 }
 0x362   : > { %vm3173_vm13 = vcmp.eq.f32.partialorder %v5474_v7, 0.0  ;;  %v3234_v54 = vsel %vm3176_vm9, %v3151_v10, 0.0  ;;  %v3236_v29 = vsel %vm3176_vm9, %v3163_v40, 0.0  ;;  %v2487_v7 = vstv %s2486_s2 }
 0x363   : > { %v3233_v52 = vadd.f32 %v3232_v62, %v3231_v39  ;;  %v3175_v44 = vsel %vm3173_vm13, %v3174_v22, %v3172_v21  ;;  %3655 = vrcp.f32 %v2487_v7  ;;  %v2499_v6 = vand.u32 2147483648, %v2487_v7 }
 0x364   : > { %v3238_v24 = vsel %vm3176_vm9, %v3175_v44, 0.0  ;;  %vm2493_vm9 = vweird.f32 %v2487_v7  ;;  %v2497_v27 = vand.u32 2147483647, %v2487_v7 }
 0x365   : > { %v3235_v28 = vadd.f32 %v3234_v54, %v3233_v52  ;;  %v2500_v43 = vor.u32 1.1754944e-38, %v2499_v6 }
 0x366   : > { %vm2498_vm6 = vcmp.eq.f32.partialorder %v2497_v27, 8.507059e+37 }
 0x367   : > { %v3237_v45 = vadd.f32 %v3236_v29, %v3235_v28 }
 0x369   : > { %v3239_v8 = vadd.f32 %v3238_v24, %v3237_v45  ;;  %v3656_v41 = vpop.eup %3655 }
 0x36a   : > { %v2489_v20 = vmul.f32 %v3656_v41, %v2487_v7  ;;  %vm2494_vm15 = vweird.f32 %v3656_v41 }
 0x36b   : > { %3240 = vadd.xlane.f32.xlu0 %v3239_v8  ;;  %vm2495_vm0 = vmor %vm2493_vm9, %vm2494_vm15 }
 0x36c   : > { %v2490_v16 = vsub.f32 1.0, %v2489_v20 }
 0x36e   : > { %v2491_v46 = vmul.f32 %v3656_v41, %v2490_v16 }
 0x370   : > { %v2492_v58 = vadd.f32 %v3656_v41, %v2491_v46 }
 0x372   : > { %v2496_v36 = vsel %vm2495_vm0, %v3656_v41, %v2492_v58 }
 0x373   : > { %v2501_v34 = vsel %vm2498_vm6, %v2500_v43, %v2496_v36 }
 0x3c2   : > { %v2478_v5 = vpop.xlane.xlu2 %2477 }
 0x3c3   : > { %v2479_v14 = vrot.slane %v2478_v5, 4 }
 0x3c5   : > { %v2480_v1 = vadd.f32 %v2479_v14, %v2478_v5 }
 0x3c7   : > { %v2481_v56 = vrot.slane %v2480_v1, 2 }
 0x3c9   : > { %v2482_v32 = vadd.f32 %v2481_v56, %v2480_v1 }
 0x3cb   : > { %v2483_v3 = vrot.slane %v2482_v32, 1 }
 0x3cd   : > { %v2484_v63 = vadd.f32 %v2483_v3, %v2482_v32 }
 0x3cf   : > { %3502 = vpush %v2484_v63 }
 0x3d0   : > { %3504 = vpush %v2501_v34 }
 0x3de   : > { %v3241_v37 = vpop.xlane.xlu0 %3240 }
 0x3df   : > { %v3242_v48 = vrot.slane %v3241_v37, 4 }
 0x3e1   : > { %v3243_v19 = vadd.f32 %v3242_v48, %v3241_v37 }
 0x3e3   : > { %v3244_v25 = vrot.slane %v3243_v19, 2 }
 0x3e5   : > { %v3245_v60 = vadd.f32 %v3244_v25, %v3243_v19 }
 0x3e7   : > { %v3246_v33 = vrot.slane %v3245_v60, 1 }
 0x3e9   : > { %v3247_v35 = vadd.f32 %v3246_v33, %v3245_v60 }
 0x3eb   : > { %3506 = vpush %v3247_v35 }
 0x400   : > { %s3503_s21 = spop %3502 }
 0x401   : > { %s3505_s0 = spop %3504 }
 0x402   : > { %s2503_s25 = smul.f32 %s3505_s0, %s3503_s21 }
 0x41c   : > { %s3507_s26 = spop %3506 }
 0x41d   : > { %s3249_s4 = smul.f32 0.00390625, %s3507_s26 }
 0x41f   : > { %s3250_s8 = sadd.f32 %s3249_s4, %s2503_s25 }
 0x421   : > { %s3251_s6 = smul.f32 0.1, %s3250_s8 }
 0x423   : > { %s5749_s6 = smov (!%p3252_p7, %s3251_s6), 0.0 }
 0x424   : > { %v3254_v2 = vstv %s5749_s6 }
 0x425   : > { %3255 = vst [vmem:[%s3879_s29] sm:$0x1] %v3254_v2 }
 0x426 PF: > { %s3265_s13 = scalar_lea.hbm %s5679_s3, %s3753_s20  ;;  %s3267_s7 = sshll.u32 %s3879_s29, 4  ;;  %s3268_s7 = int_to_ptr.vmem [resolvable:$true] %s3267_s7 }
 0x427   : > { %s3269_s19 = sshll.u32 %s3265_s13, 4  ;;  %s5731_s14 = sand.u32 1, %s3741_s17   ;;  %s3270_s19 = int_to_ptr.hbm [resolvable:$true] %s3269_s19 }
 0x428   : > { %s3257_s10 = scalar_lea.sflag [#allocation7], %s5731_s14  ;;  %s3683_s23 = sshra.s32 %s3270_s19, 4  ;;  %s3684_s23 = int_to_ptr.hbm [resolvable:$true] %s3683_s23 }
 0x429   : > { %s3685_s12 = scalar_lea.hbm %s3684_s23, 1  ;;  %s3689_s15 = scalar_lea.hbm %s5679_s3, 2 }
 0x42a   : > { %p3686_p8 = scmp.ne.s32.totalorder %s3684_s23, %s3685_s12  ;;  %p3690_p12 = scmp.lt.s32.totalorder %s3684_s23, %s5679_s3 }
 0x42b   : > { %p3691_p13 = scmp.lt.s32.totalorder %s3689_s15, %s3685_s12 }
 0x42c   : > { %p3687_p10 = pnand %p3686_p8, %p3843_p3 }
 0x42d   : > { %p3692_p0 = por %p3691_p13, %p3690_p12 }
 0x42e   : > { %p3688_p11 = pneg %p3687_p10 }
 0x430   : > { %p3693_p1 = pnand %p3692_p0, %p3688_p11 }
 0x432   : > { %3696 = shalt.err (!%p3693_p1)
}
 0x433   : > { %3508 = dma.vmem_to_hbm [thread:$0]  (%p3843_p3), %s3268_s7, 16, %s3270_s19, %s3257_s10  }
 0x434 PF: > { %p3514_p2 = scmp.ge.s32.totalorder %s3765_s22, 2  ;;  %s3281_s20 = sand.u32 1, %s3737_s16  }
 0x435   : > { %s3282_s29 = scalar_lea.sflag [#allocation7], %s3281_s20 }
 0x436   : > { %p3511_p4 = pnand %p3514_p2, %p3853_p9 }
 0x438   : > { %p3512_p5 = pneg %p3511_p4 }
 0x43a   : > { %3732 = dma.done.wait (%p3512_p5), %s3282_s29, 16  }
 0x43b   : > { %3734 = vsyncadd (%p3512_p5), %s3282_s29, 4294967280  ;;  %s24_s22 = sadd.s32 1, %s3765_s22   ;;  %s5732_s2 = sld [smem:[#allocation14_spill]] }
 0x43c   : > { %p21_p6 = scmp.ge.s32.totalorder %s24_s22, 10   ;;  %s5733_s19 = sld [smem:[#allocation10_spill]] }
 0x43d   : > { %s5734_s20 = sld [smem:[#allocation11_spill]]  ;;  %s5737_s16 = smov %s3741_s17 }
 0x43e   : > { %s5735_s21 = sld [smem:[#allocation12_spill]]  ;;  %s5738_s17 = smov %s3745_s18 }
 0x43f   : > { %s5736_s0 = sld [smem:[#allocation13_spill]]  ;;  %23 = sbr.rel (!%p21_p6) target bundleno = 12 (0xc), region = 76 }
 0x441   : > { %s5739_s18 = smov %s5732_s2 }
 0x444   :  { %3287 = vsyncpa [#allocation7], 1 }
 0x445   :  { %3289 = vsyncpa [#allocation7 + $0x1], 1 }

</bundles_post_ra>
